<compile_context>
chip_gen: v7x
topology: tpu7x:2x2x1
jax: 0.10.0
libtpu: 0.0.40
codegen_flags: <defaults>
</compile_context>

<pallas_src>
import jax
import jax.numpy as jnp
from jax.experimental import pallas as pl
from jax.experimental.pallas import tpu as pltpu

HIDDEN = 128
INPUT_SIZE = 28
NUM_CLASSES = 10
NUM_LAYERS = 2          # hard-coded as two explicit layers inside the kernel
OUT_PAD = 128           # lane-padded FC output width (sliced to NUM_CLASSES in wrapper)


def lstm_fc_kernel(xf_ref, w0x_ref, b0_ref, wcomb_ref, b1_ref, wfc_ref, bfc_ref,
                   out_ref, pre0_ref):
    """2-layer LSTM recurrence over T steps + final FC on the last hidden state.

    xf_ref   : (T*B, D)     bf16  time-major flattened input
    w0x_ref  : (D, 4H)      bf16  layer-0 input weights (pre-transposed)
    b0_ref   : (1, 4H)      f32   layer-0 bias (b_ih + b_hh)
    wcomb_ref: (2H, 8H)     bf16  [[W0h, W_ih1], [0, W_hh1]]  (pre-transposed)
    b1_ref   : (1, 4H)      f32   layer-1 bias (b_ih + b_hh)
    wfc_ref  : (H, OUT_PAD) bf16  FC weight, zero-padded past NUM_CLASSES
    bfc_ref  : (1, OUT_PAD) f32
    out_ref  : (B, OUT_PAD) f32
    pre0_ref : (T*B, 4H)    f32   scratch: hoisted layer-0 input projection (+ bias)
    """
    B = out_ref.shape[0]
    T = xf_ref.shape[0] // B
    H = wcomb_ref.shape[0] // 2

    # ---- Prologue: hoist the layer-0 input projection out of the recurrence.
    # One (T*B, D)x(D, 4H) matmul instead of T tiny (B, D) matmuls; bias folded in.
    pre0_ref[...] = (
        jnp.dot(xf_ref[...], w0x_ref[...], preferred_element_type=jnp.float32)
        + b0_ref[...]
    )

    # Hoist the layer-1 bias broadcast out of the (unrolled) time loop.
    b1b = jnp.broadcast_to(b1_ref[...], (B, 4 * H))

    def activations(gates, c_prev):
        # PyTorch gate order along 4H: [i, f, g, o]; all math in f32.
        i = jax.nn.sigmoid(gates[:, 0 * H:1 * H])
        g = jnp.tanh(gates[:, 2 * H:3 * H])
        o = jax.nn.sigmoid(gates[:, 3 * H:4 * H])
        if c_prev is None:               # peeled zero-state step: f * 0 vanishes
            c_new = i * g
        else:
            f = jax.nn.sigmoid(gates[:, 1 * H:2 * H])
            c_new = f * c_prev + i * g
        h_new = o * jnp.tanh(c_new)
        return h_new, c_new

    # ---- t = 0 peel: all states are zero, so both recurrent matmuls vanish.
    h0, c0 = activations(pre0_ref[0:B, :], None)
    h0_bf = h0.astype(jnp.bfloat16)

    if T == 1:
        # Only layer-1 gates needed; W_hh1 half multiplies zeros -> skip it.
        gates1 = (jnp.dot(h0_bf, wcomb_ref[0:H, 4 * H:],
                          preferred_element_type=jnp.float32) + b1b)
        h1, c1 = activations(gates1, None)
    else:
        # K = H only (h1(-1) = 0): yields layer-1 gates for t=0 AND the layer-0
        # recurrent term for t=1 in a single MXU push.
        comb = jnp.dot(h0_bf, wcomb_ref[0:H, :],
                       preferred_element_type=jnp.float32)
        rec0_next = comb[:, :4 * H]                       # h0(0) @ W0h
        h1, c1 = activations(comb[:, 4 * H:] + b1b, None)

        # Fully unrolled static time loop: cross-iteration visibility lets the
        # scheduler interleave the single fused MXU push with EUP/VPU work.
        for t in range(1, T):
            # ---- Layer 0: recurrent term was produced by last step's fused dot.
            gates0 = pre0_ref[t * B:(t + 1) * B, :] + rec0_next
            h0, c0 = activations(gates0, c0)

            # Single bf16 cast per state per step (reused below).
            h0_bf = h0.astype(jnp.bfloat16)
            h1_bf = h1.astype(jnp.bfloat16)
            xh = jnp.concatenate([h0_bf, h1_bf], axis=1)   # (B, 2H)

            if t < T - 1:
                # Fused: [h0(t)|h1(t-1)] @ [[W0h, W_ih1],[0, W_hh1]]
                comb = jnp.dot(xh, wcomb_ref[...],
                               preferred_element_type=jnp.float32)
                rec0_next = comb[:, :4 * H]                # h0(t) @ W0h  (for t+1)
                gates1 = comb[:, 4 * H:] + b1b
            else:
                # Epilogue peel: no t+1, so only the layer-1 half of Wcomb.
                gates1 = (jnp.dot(xh, wcomb_ref[:, 4 * H:],
                                  preferred_element_type=jnp.float32) + b1b)
            h1, c1 = activations(gates1, c1)

    # ---- fc(out[:, -1, :]) on the last top-layer hidden state (lane-dense store).
    out_ref[...] = (
        jnp.dot(h1.astype(jnp.bfloat16), wfc_ref[...],
                preferred_element_type=jnp.float32)
        + bfc_ref[...]
    )


def prepare_params(params):
    """One-time weight prep (casts / concat / pad) hoisted off the per-call path."""
    wih0, whh0, b0, wih1, whh1, b1, wfc, bfc = params

    w0x = wih0.astype(jnp.bfloat16)                               # (D, 4H)

    # Stacked weight for the fused per-step matmul:
    #   [[W0h, W_ih1],
    #    [ 0 , W_hh1]]   shape (2H, 8H)
    # The zero block keeps h1 from leaking into layer-0 gates.
    zeros_blk = jnp.zeros((HIDDEN, 4 * HIDDEN), jnp.float32)
    wcomb = jnp.concatenate(
        [jnp.concatenate([whh0, wih1], axis=1),
         jnp.concatenate([zeros_blk, whh1], axis=1)],
        axis=0).astype(jnp.bfloat16)                              # (2H, 8H)

    # Lane-pad FC weight/bias to 128 output lanes (avoids masked partial stores).
    wfc_p = jnp.zeros((HIDDEN, OUT_PAD), jnp.float32).at[:, :NUM_CLASSES].set(wfc)
    wfc_p = wfc_p.astype(jnp.bfloat16)
    bfc_p = jnp.zeros((1, OUT_PAD), jnp.float32).at[:, :NUM_CLASSES].set(bfc)

    return (w0x, b0, wcomb, b1, wfc_p, bfc_p)


def rnn_forward(x, kparams):
    """x: (B, T, D) float32 (batch_first, like PyTorch). Returns (B, NUM_CLASSES)."""
    B, T, D = x.shape
    w0x, b0, wcomb, b1, wfc_p, bfc_p = kparams

    # Time-major, flattened input for the hoisted layer-0 projection.
    xf = jnp.transpose(x, (1, 0, 2)).reshape(T * B, D).astype(jnp.bfloat16)

    vmem = pl.BlockSpec(memory_space=pltpu.MemorySpace.VMEM)
    out_pad = pl.pallas_call(
        lstm_fc_kernel,
        out_shape=jax.ShapeDtypeStruct((B, OUT_PAD), jnp.float32),
        in_specs=[vmem] * 7,
        out_specs=vmem,
        scratch_shapes=[
            pltpu.VMEM((T * B, 4 * HIDDEN), jnp.float32),  # hoisted layer-0 projection
        ],
    )(xf, w0x, b0, wcomb, b1, wfc_p, bfc_p)
    return out_pad[:, :NUM_CLASSES]


def init_params(key):
    """Deterministic init mimicking PyTorch's U(-1/sqrt(H), 1/sqrt(H)).

    Weights are stored already transposed relative to PyTorch:
      wih0: (INPUT_SIZE, 4H), whh0: (H, 4H), wih1: (H, 4H), whh1: (H, 4H)
      biases: (1, 4H) = bias_ih + bias_hh summed (PyTorch adds both).
      fc: (H, NUM_CLASSES), bias (1, NUM_CLASSES).
    """
    bound = 1.0 / jnp.sqrt(jnp.float32(HIDDEN))
    ks = jax.random.split(key, 12)
    u = lambda k, shape, b: jax.random.uniform(k, shape, jnp.float32, -b, b)

    wih0 = u(ks[0], (INPUT_SIZE, 4 * HIDDEN), bound)
    whh0 = u(ks[1], (HIDDEN, 4 * HIDDEN), bound)
    b0 = (u(ks[2], (1, 4 * HIDDEN), bound) + u(ks[3], (1, 4 * HIDDEN), bound))

    wih1 = u(ks[4], (HIDDEN, 4 * HIDDEN), bound)
    whh1 = u(ks[5], (HIDDEN, 4 * HIDDEN), bound)
    b1 = (u(ks[6], (1, 4 * HIDDEN), bound) + u(ks[7], (1, 4 * HIDDEN), bound))

    fc_bound = 1.0 / jnp.sqrt(jnp.float32(HIDDEN))
    wfc = u(ks[8], (HIDDEN, NUM_CLASSES), fc_bound)
    bfc = u(ks[9], (1, NUM_CLASSES), fc_bound)

    return (wih0, whh0, b0, wih1, whh1, b1, wfc, bfc)


def reference_forward(x, params):
    """Pure-JAX f32 reference of the same semantics (for a sanity check)."""
    wih0, whh0, b0, wih1, whh1, b1, wfc, bfc = params
    B, T, D = x.shape
    H = HIDDEN

    def cell(x_t, h, c, wih, whh, b):
        g = x_t @ wih + h @ whh + b
        i = jax.nn.sigmoid(g[:, 0 * H:1 * H])
        f = jax.nn.sigmoid(g[:, 1 * H:2 * H])
        gg = jnp.tanh(g[:, 2 * H:3 * H])
        o = jax.nn.sigmoid(g[:, 3 * H:4 * H])
        c_new = f * c + i * gg
        return o * jnp.tanh(c_new), c_new

    h0 = jnp.zeros((B, H), jnp.float32)
    c0 = jnp.zeros((B, H), jnp.float32)
    h1 = jnp.zeros((B, H), jnp.float32)
    c1 = jnp.zeros((B, H), jnp.float32)
    for t in range(T):
        x_t = x[:, t, :]
        h0, c0 = cell(x_t, h0, c0, wih0, whh0, b0)
        h1, c1 = cell(h0, h1, c1, wih1, whh1, b1)
    return h1 @ wfc + bfc


if __name__ == "__main__":
    key = jax.random.PRNGKey(0)
    k_param, k_x = jax.random.split(key)

    B, T = 8, 8  # small batch / sequence length; feature dim fixed by the module (28)
    x = jax.random.normal(k_x, (B, T, INPUT_SIZE), jnp.float32)
    params = init_params(k_param)

    # Weight prep is done once (hoisted out of the per-call hot path).
    kparams = jax.block_until_ready(prepare_params(params))

    forward = jax.jit(rnn_forward)
    out = forward(x, kparams)
    out = jax.block_until_ready(out)

    ref = reference_forward(x, params)
    assert out.shape == (B, NUM_CLASSES)
    # bf16 MXU operands with f32 accumulation vs. pure-f32 reference.
    assert jnp.max(jnp.abs(out - ref)) < 2e-2

    print("KERNEL_OK")
</pallas_src>

<mosaic_0001>
module attributes {stable_mosaic.version = 11 : i64} {
  func.func @lstm_fc_kernel(%arg0: memref<64x28xbf16, #tpu.memory_space<vmem>>, %arg1: memref<28x512xbf16, #tpu.memory_space<vmem>>, %arg2: memref<1x512xf32, #tpu.memory_space<vmem>>, %arg3: memref<256x1024xbf16, #tpu.memory_space<vmem>>, %arg4: memref<1x512xf32, #tpu.memory_space<vmem>>, %arg5: memref<128x128xbf16, #tpu.memory_space<vmem>>, %arg6: memref<1x128xf32, #tpu.memory_space<vmem>>, %arg7: memref<8x128xf32, #tpu.memory_space<vmem>>, %arg8: memref<64x512xf32, #tpu.memory_space<vmem>>) attributes {dimension_semantics = [], scalar_prefetch = 0 : i64, scratch_operands = 1 : i64, tpu.core_type = #tpu.core_type<tc>} {
    %c0 = arith.constant 0 : index
    %c0_0 = arith.constant 0 : index
    %0 = vector.load %arg0[%c0, %c0_0] : memref<64x28xbf16, #tpu.memory_space<vmem>>, vector<64x28xbf16>
    %c0_1 = arith.constant 0 : index
    %c0_2 = arith.constant 0 : index
    %1 = vector.load %arg1[%c0_1, %c0_2] : memref<28x512xbf16, #tpu.memory_space<vmem>>, vector<28x512xbf16>
    %cst = arith.constant dense<0.000000e+00> : vector<64x512xf32>
    %2 = tpu.matmul %0, %1, %cst {dimension_numbers = #tpu.dot_dimension_numbers<[1], [0], [0], [1], [0, 0, 1, 1], [], []>} : vector<64x28xbf16>, vector<28x512xbf16>, vector<64x512xf32> -> vector<64x512xf32>
    %c0_3 = arith.constant 0 : index
    %c0_4 = arith.constant 0 : index
    %3 = vector.load %arg2[%c0_3, %c0_4] : memref<1x512xf32, #tpu.memory_space<vmem>>, vector<1x512xf32>
    %4 = vector.broadcast %3 : vector<1x512xf32> to vector<64x512xf32>
    %5 = arith.addf %2, %4 : vector<64x512xf32>
    %c0_5 = arith.constant 0 : index
    %c0_6 = arith.constant 0 : index
    %6 = vector.load %arg8[%c0_5, %c0_6] : memref<64x512xf32, #tpu.memory_space<vmem>>, vector<64x512xf32>
    tpu.vector_store %arg8[%c0_5, %c0_6], %5 {strides = array<i32>} : memref<64x512xf32, #tpu.memory_space<vmem>>, vector<64x512xf32>,
    %c0_7 = arith.constant 0 : index
    %c0_8 = arith.constant 0 : index
    %7 = vector.load %arg4[%c0_7, %c0_8] : memref<1x512xf32, #tpu.memory_space<vmem>>, vector<1x512xf32>
    %8 = vector.shape_cast %7 : vector<1x512xf32> to vector<1x512xf32>
    %9 = vector.broadcast %8 : vector<1x512xf32> to vector<8x512xf32>
    %c0_9 = arith.constant 0 : index
    %c0_10 = arith.constant 0 : index
    %10 = vector.load %arg8[%c0_9, %c0_10] : memref<64x512xf32, #tpu.memory_space<vmem>>, vector<8x512xf32>
    %11 = vector.extract_strided_slice %10 {offsets = [0, 0], sizes = [8, 128], strides = [1, 1]} : vector<8x512xf32> to vector<8x128xf32>
    %12 = arith.negf %11 : vector<8x128xf32>
    %13 = math.exp %12 : vector<8x128xf32>
    %cst_11 = arith.constant 1.000000e+00 : f32
    %14 = vector.broadcast %cst_11 : f32 to vector<8x128xf32>
    %15 = arith.addf %14, %13 : vector<8x128xf32>
    %16 = arith.divf %14, %15 : vector<8x128xf32>
    %17 = vector.extract_strided_slice %10 {offsets = [0, 256], sizes = [8, 128], strides = [1, 1]} : vector<8x512xf32> to vector<8x128xf32>
    %18 = math.tanh %17 : vector<8x128xf32>
    %19 = vector.extract_strided_slice %10 {offsets = [0, 384], sizes = [8, 128], strides = [1, 1]} : vector<8x512xf32> to vector<8x128xf32>
    %20 = arith.negf %19 : vector<8x128xf32>
    %21 = math.exp %20 : vector<8x128xf32>
    %cst_12 = arith.constant 1.000000e+00 : f32
    %22 = vector.broadcast %cst_12 : f32 to vector<8x128xf32>
    %23 = arith.addf %22, %21 : vector<8x128xf32>
    %24 = arith.divf %22, %23 : vector<8x128xf32>
    %25 = arith.mulf %16, %18 : vector<8x128xf32>
    %26 = math.tanh %25 : vector<8x128xf32>
    %27 = arith.mulf %24, %26 : vector<8x128xf32>
    %28 = arith.truncf %27 : vector<8x128xf32> to vector<8x128xbf16>
    %c0_13 = arith.constant 0 : index
    %c0_14 = arith.constant 0 : index
    %29 = vector.load %arg3[%c0_13, %c0_14] : memref<256x1024xbf16, #tpu.memory_space<vmem>>, vector<128x1024xbf16>
    %cst_15 = arith.constant dense<0.000000e+00> : vector<8x1024xf32>
    %30 = tpu.matmul %28, %29, %cst_15 {dimension_numbers = #tpu.dot_dimension_numbers<[1], [0], [0], [1], [0, 0, 1, 1], [], []>} : vector<8x128xbf16>, vector<128x1024xbf16>, vector<8x1024xf32> -> vector<8x1024xf32>
    %31 = vector.extract_strided_slice %30 {offsets = [0, 0], sizes = [8, 512], strides = [1, 1]} : vector<8x1024xf32> to vector<8x512xf32>
    %32 = vector.extract_strided_slice %30 {offsets = [0, 512], sizes = [8, 512], strides = [1, 1]} : vector<8x1024xf32> to vector<8x512xf32>
    %33 = arith.addf %32, %9 : vector<8x512xf32>
    %34 = vector.extract_strided_slice %33 {offsets = [0, 0], sizes = [8, 128], strides = [1, 1]} : vector<8x512xf32> to vector<8x128xf32>
    %35 = arith.negf %34 : vector<8x128xf32>
    %36 = math.exp %35 : vector<8x128xf32>
    %cst_16 = arith.constant 1.000000e+00 : f32
    %37 = vector.broadcast %cst_16 : f32 to vector<8x128xf32>
    %38 = arith.addf %37, %36 : vector<8x128xf32>
    %39 = arith.divf %37, %38 : vector<8x128xf32>
    %40 = vector.extract_strided_slice %33 {offsets = [0, 256], sizes = [8, 128], strides = [1, 1]} : vector<8x512xf32> to vector<8x128xf32>
    %41 = math.tanh %40 : vector<8x128xf32>
    %42 = vector.extract_strided_slice %33 {offsets = [0, 384], sizes = [8, 128], strides = [1, 1]} : vector<8x512xf32> to vector<8x128xf32>
    %43 = arith.negf %42 : vector<8x128xf32>
    %44 = math.exp %43 : vector<8x128xf32>
    %cst_17 = arith.constant 1.000000e+00 : f32
    %45 = vector.broadcast %cst_17 : f32 to vector<8x128xf32>
    %46 = arith.addf %45, %44 : vector<8x128xf32>
    %47 = arith.divf %45, %46 : vector<8x128xf32>
    %48 = arith.mulf %39, %41 : vector<8x128xf32>
    %49 = math.tanh %48 : vector<8x128xf32>
    %50 = arith.mulf %47, %49 : vector<8x128xf32>
    %c8 = arith.constant 8 : index
    %c0_18 = arith.constant 0 : index
    %51 = vector.load %arg8[%c8, %c0_18] : memref<64x512xf32, #tpu.memory_space<vmem>>, vector<8x512xf32>
    %52 = arith.addf %51, %31 : vector<8x512xf32>
    %53 = vector.extract_strided_slice %52 {offsets = [0, 0], sizes = [8, 128], strides = [1, 1]} : vector<8x512xf32> to vector<8x128xf32>
    %54 = arith.negf %53 : vector<8x128xf32>
    %55 = math.exp %54 : vector<8x128xf32>
    %cst_19 = arith.constant 1.000000e+00 : f32
    %56 = vector.broadcast %cst_19 : f32 to vector<8x128xf32>
    %57 = arith.addf %56, %55 : vector<8x128xf32>
    %58 = arith.divf %56, %57 : vector<8x128xf32>
    %59 = vector.extract_strided_slice %52 {offsets = [0, 256], sizes = [8, 128], strides = [1, 1]} : vector<8x512xf32> to vector<8x128xf32>
    %60 = math.tanh %59 : vector<8x128xf32>
    %61 = vector.extract_strided_slice %52 {offsets = [0, 384], sizes = [8, 128], strides = [1, 1]} : vector<8x512xf32> to vector<8x128xf32>
    %62 = arith.negf %61 : vector<8x128xf32>
    %63 = math.exp %62 : vector<8x128xf32>
    %cst_20 = arith.constant 1.000000e+00 : f32
    %64 = vector.broadcast %cst_20 : f32 to vector<8x128xf32>
    %65 = arith.addf %64, %63 : vector<8x128xf32>
    %66 = arith.divf %64, %65 : vector<8x128xf32>
    %67 = vector.extract_strided_slice %52 {offsets = [0, 128], sizes = [8, 128], strides = [1, 1]} : vector<8x512xf32> to vector<8x128xf32>
    %68 = arith.negf %67 : vector<8x128xf32>
    %69 = math.exp %68 : vector<8x128xf32>
    %cst_21 = arith.constant 1.000000e+00 : f32
    %70 = vector.broadcast %cst_21 : f32 to vector<8x128xf32>
    %71 = arith.addf %70, %69 : vector<8x128xf32>
    %72 = arith.divf %70, %71 : vector<8x128xf32>
    %73 = arith.mulf %72, %25 : vector<8x128xf32>
    %74 = arith.mulf %58, %60 : vector<8x128xf32>
    %75 = arith.addf %73, %74 : vector<8x128xf32>
    %76 = math.tanh %75 : vector<8x128xf32>
    %77 = arith.mulf %66, %76 : vector<8x128xf32>
    %78 = arith.truncf %77 : vector<8x128xf32> to vector<8x128xbf16>
    %79 = arith.truncf %50 : vector<8x128xf32> to vector<8x128xbf16>
    %80 = tpu.concatenate %78, %79 in 1 : vector<8x128xbf16>, vector<8x128xbf16> -> vector<8x256xbf16>
    %c0_22 = arith.constant 0 : index
    %c0_23 = arith.constant 0 : index
    %81 = vector.load %arg3[%c0_22, %c0_23] : memref<256x1024xbf16, #tpu.memory_space<vmem>>, vector<256x1024xbf16>
    %cst_24 = arith.constant dense<0.000000e+00> : vector<8x1024xf32>
    %82 = tpu.matmul %80, %81, %cst_24 {dimension_numbers = #tpu.dot_dimension_numbers<[1], [0], [0], [1], [0, 0, 1, 1], [], []>} : vector<8x256xbf16>, vector<256x1024xbf16>, vector<8x1024xf32> -> vector<8x1024xf32>
    %83 = vector.extract_strided_slice %82 {offsets = [0, 0], sizes = [8, 512], strides = [1, 1]} : vector<8x1024xf32> to vector<8x512xf32>
    %84 = vector.extract_strided_slice %82 {offsets = [0, 512], sizes = [8, 512], strides = [1, 1]} : vector<8x1024xf32> to vector<8x512xf32>
    %85 = arith.addf %84, %9 : vector<8x512xf32>
    %86 = vector.extract_strided_slice %85 {offsets = [0, 0], sizes = [8, 128], strides = [1, 1]} : vector<8x512xf32> to vector<8x128xf32>
    %87 = arith.negf %86 : vector<8x128xf32>
    %88 = math.exp %87 : vector<8x128xf32>
    %cst_25 = arith.constant 1.000000e+00 : f32
    %89 = vector.broadcast %cst_25 : f32 to vector<8x128xf32>
    %90 = arith.addf %89, %88 : vector<8x128xf32>
    %91 = arith.divf %89, %90 : vector<8x128xf32>
    %92 = vector.extract_strided_slice %85 {offsets = [0, 256], sizes = [8, 128], strides = [1, 1]} : vector<8x512xf32> to vector<8x128xf32>
    %93 = math.tanh %92 : vector<8x128xf32>
    %94 = vector.extract_strided_slice %85 {offsets = [0, 384], sizes = [8, 128], strides = [1, 1]} : vector<8x512xf32> to vector<8x128xf32>
    %95 = arith.negf %94 : vector<8x128xf32>
    %96 = math.exp %95 : vector<8x128xf32>
    %cst_26 = arith.constant 1.000000e+00 : f32
    %97 = vector.broadcast %cst_26 : f32 to vector<8x128xf32>
    %98 = arith.addf %97, %96 : vector<8x128xf32>
    %99 = arith.divf %97, %98 : vector<8x128xf32>
    %100 = vector.extract_strided_slice %85 {offsets = [0, 128], sizes = [8, 128], strides = [1, 1]} : vector<8x512xf32> to vector<8x128xf32>
    %101 = arith.negf %100 : vector<8x128xf32>
    %102 = math.exp %101 : vector<8x128xf32>
    %cst_27 = arith.constant 1.000000e+00 : f32
    %103 = vector.broadcast %cst_27 : f32 to vector<8x128xf32>
    %104 = arith.addf %103, %102 : vector<8x128xf32>
    %105 = arith.divf %103, %104 : vector<8x128xf32>
    %106 = arith.mulf %105, %48 : vector<8x128xf32>
    %107 = arith.mulf %91, %93 : vector<8x128xf32>
    %108 = arith.addf %106, %107 : vector<8x128xf32>
    %109 = math.tanh %108 : vector<8x128xf32>
    %110 = arith.mulf %99, %109 : vector<8x128xf32>
    %c16 = arith.constant 16 : index
    %c0_28 = arith.constant 0 : index
    %111 = vector.load %arg8[%c16, %c0_28] : memref<64x512xf32, #tpu.memory_space<vmem>>, vector<8x512xf32>
    %112 = arith.addf %111, %83 : vector<8x512xf32>
    %113 = vector.extract_strided_slice %112 {offsets = [0, 0], sizes = [8, 128], strides = [1, 1]} : vector<8x512xf32> to vector<8x128xf32>
    %114 = arith.negf %113 : vector<8x128xf32>
    %115 = math.exp %114 : vector<8x128xf32>
    %cst_29 = arith.constant 1.000000e+00 : f32
    %116 = vector.broadcast %cst_29 : f32 to vector<8x128xf32>
    %117 = arith.addf %116, %115 : vector<8x128xf32>
    %118 = arith.divf %116, %117 : vector<8x128xf32>
    %119 = vector.extract_strided_slice %112 {offsets = [0, 256], sizes = [8, 128], strides = [1, 1]} : vector<8x512xf32> to vector<8x128xf32>
    %120 = math.tanh %119 : vector<8x128xf32>
    %121 = vector.extract_strided_slice %112 {offsets = [0, 384], sizes = [8, 128], strides = [1, 1]} : vector<8x512xf32> to vector<8x128xf32>
    %122 = arith.negf %121 : vector<8x128xf32>
    %123 = math.exp %122 : vector<8x128xf32>
    %cst_30 = arith.constant 1.000000e+00 : f32
    %124 = vector.broadcast %cst_30 : f32 to vector<8x128xf32>
    %125 = arith.addf %124, %123 : vector<8x128xf32>
    %126 = arith.divf %124, %125 : vector<8x128xf32>
    %127 = vector.extract_strided_slice %112 {offsets = [0, 128], sizes = [8, 128], strides = [1, 1]} : vector<8x512xf32> to vector<8x128xf32>
    %128 = arith.negf %127 : vector<8x128xf32>
    %129 = math.exp %128 : vector<8x128xf32>
    %cst_31 = arith.constant 1.000000e+00 : f32
    %130 = vector.broadcast %cst_31 : f32 to vector<8x128xf32>
    %131 = arith.addf %130, %129 : vector<8x128xf32>
    %132 = arith.divf %130, %131 : vector<8x128xf32>
    %133 = arith.mulf %132, %75 : vector<8x128xf32>
    %134 = arith.mulf %118, %120 : vector<8x128xf32>
    %135 = arith.addf %133, %134 : vector<8x128xf32>
    %136 = math.tanh %135 : vector<8x128xf32>
    %137 = arith.mulf %126, %136 : vector<8x128xf32>
    %138 = arith.truncf %137 : vector<8x128xf32> to vector<8x128xbf16>
    %139 = arith.truncf %110 : vector<8x128xf32> to vector<8x128xbf16>
    %140 = tpu.concatenate %138, %139 in 1 : vector<8x128xbf16>, vector<8x128xbf16> -> vector<8x256xbf16>
    %c0_32 = arith.constant 0 : index
    %c0_33 = arith.constant 0 : index
    %141 = vector.load %arg3[%c0_32, %c0_33] : memref<256x1024xbf16, #tpu.memory_space<vmem>>, vector<256x1024xbf16>
    %cst_34 = arith.constant dense<0.000000e+00> : vector<8x1024xf32>
    %142 = tpu.matmul %140, %141, %cst_34 {dimension_numbers = #tpu.dot_dimension_numbers<[1], [0], [0], [1], [0, 0, 1, 1], [], []>} : vector<8x256xbf16>, vector<256x1024xbf16>, vector<8x1024xf32> -> vector<8x1024xf32>
    %143 = vector.extract_strided_slice %142 {offsets = [0, 0], sizes = [8, 512], strides = [1, 1]} : vector<8x1024xf32> to vector<8x512xf32>
    %144 = vector.extract_strided_slice %142 {offsets = [0, 512], sizes = [8, 512], strides = [1, 1]} : vector<8x1024xf32> to vector<8x512xf32>
    %145 = arith.addf %144, %9 : vector<8x512xf32>
    %146 = vector.extract_strided_slice %145 {offsets = [0, 0], sizes = [8, 128], strides = [1, 1]} : vector<8x512xf32> to vector<8x128xf32>
    %147 = arith.negf %146 : vector<8x128xf32>
    %148 = math.exp %147 : vector<8x128xf32>
    %cst_35 = arith.constant 1.000000e+00 : f32
    %149 = vector.broadcast %cst_35 : f32 to vector<8x128xf32>
    %150 = arith.addf %149, %148 : vector<8x128xf32>
    %151 = arith.divf %149, %150 : vector<8x128xf32>
    %152 = vector.extract_strided_slice %145 {offsets = [0, 256], sizes = [8, 128], strides = [1, 1]} : vector<8x512xf32> to vector<8x128xf32>
    %153 = math.tanh %152 : vector<8x128xf32>
    %154 = vector.extract_strided_slice %145 {offsets = [0, 384], sizes = [8, 128], strides = [1, 1]} : vector<8x512xf32> to vector<8x128xf32>
    %155 = arith.negf %154 : vector<8x128xf32>
    %156 = math.exp %155 : vector<8x128xf32>
    %cst_36 = arith.constant 1.000000e+00 : f32
    %157 = vector.broadcast %cst_36 : f32 to vector<8x128xf32>
    %158 = arith.addf %157, %156 : vector<8x128xf32>
    %159 = arith.divf %157, %158 : vector<8x128xf32>
    %160 = vector.extract_strided_slice %145 {offsets = [0, 128], sizes = [8, 128], strides = [1, 1]} : vector<8x512xf32> to vector<8x128xf32>
    %161 = arith.negf %160 : vector<8x128xf32>
    %162 = math.exp %161 : vector<8x128xf32>
    %cst_37 = arith.constant 1.000000e+00 : f32
    %163 = vector.broadcast %cst_37 : f32 to vector<8x128xf32>
    %164 = arith.addf %163, %162 : vector<8x128xf32>
    %165 = arith.divf %163, %164 : vector<8x128xf32>
    %166 = arith.mulf %165, %108 : vector<8x128xf32>
    %167 = arith.mulf %151, %153 : vector<8x128xf32>
    %168 = arith.addf %166, %167 : vector<8x128xf32>
    %169 = math.tanh %168 : vector<8x128xf32>
    %170 = arith.mulf %159, %169 : vector<8x128xf32>
    %c24 = arith.constant 24 : index
    %c0_38 = arith.constant 0 : index
    %171 = vector.load %arg8[%c24, %c0_38] : memref<64x512xf32, #tpu.memory_space<vmem>>, vector<8x512xf32>
    %172 = arith.addf %171, %143 : vector<8x512xf32>
    %173 = vector.extract_strided_slice %172 {offsets = [0, 0], sizes = [8, 128], strides = [1, 1]} : vector<8x512xf32> to vector<8x128xf32>
    %174 = arith.negf %173 : vector<8x128xf32>
    %175 = math.exp %174 : vector<8x128xf32>
    %cst_39 = arith.constant 1.000000e+00 : f32
    %176 = vector.broadcast %cst_39 : f32 to vector<8x128xf32>
    %177 = arith.addf %176, %175 : vector<8x128xf32>
    %178 = arith.divf %176, %177 : vector<8x128xf32>
    %179 = vector.extract_strided_slice %172 {offsets = [0, 256], sizes = [8, 128], strides = [1, 1]} : vector<8x512xf32> to vector<8x128xf32>
    %180 = math.tanh %179 : vector<8x128xf32>
    %181 = vector.extract_strided_slice %172 {offsets = [0, 384], sizes = [8, 128], strides = [1, 1]} : vector<8x512xf32> to vector<8x128xf32>
    %182 = arith.negf %181 : vector<8x128xf32>
    %183 = math.exp %182 : vector<8x128xf32>
    %cst_40 = arith.constant 1.000000e+00 : f32
    %184 = vector.broadcast %cst_40 : f32 to vector<8x128xf32>
    %185 = arith.addf %184, %183 : vector<8x128xf32>
    %186 = arith.divf %184, %185 : vector<8x128xf32>
    %187 = vector.extract_strided_slice %172 {offsets = [0, 128], sizes = [8, 128], strides = [1, 1]} : vector<8x512xf32> to vector<8x128xf32>
    %188 = arith.negf %187 : vector<8x128xf32>
    %189 = math.exp %188 : vector<8x128xf32>
    %cst_41 = arith.constant 1.000000e+00 : f32
    %190 = vector.broadcast %cst_41 : f32 to vector<8x128xf32>
    %191 = arith.addf %190, %189 : vector<8x128xf32>
    %192 = arith.divf %190, %191 : vector<8x128xf32>
    %193 = arith.mulf %192, %135 : vector<8x128xf32>
    %194 = arith.mulf %178, %180 : vector<8x128xf32>
    %195 = arith.addf %193, %194 : vector<8x128xf32>
    %196 = math.tanh %195 : vector<8x128xf32>
    %197 = arith.mulf %186, %196 : vector<8x128xf32>
    %198 = arith.truncf %197 : vector<8x128xf32> to vector<8x128xbf16>
    %199 = arith.truncf %170 : vector<8x128xf32> to vector<8x128xbf16>
    %200 = tpu.concatenate %198, %199 in 1 : vector<8x128xbf16>, vector<8x128xbf16> -> vector<8x256xbf16>
    %c0_42 = arith.constant 0 : index
    %c0_43 = arith.constant 0 : index
    %201 = vector.load %arg3[%c0_42, %c0_43] : memref<256x1024xbf16, #tpu.memory_space<vmem>>, vector<256x1024xbf16>
    %cst_44 = arith.constant dense<0.000000e+00> : vector<8x1024xf32>
    %202 = tpu.matmul %200, %201, %cst_44 {dimension_numbers = #tpu.dot_dimension_numbers<[1], [0], [0], [1], [0, 0, 1, 1], [], []>} : vector<8x256xbf16>, vector<256x1024xbf16>, vector<8x1024xf32> -> vector<8x1024xf32>
    %203 = vector.extract_strided_slice %202 {offsets = [0, 0], sizes = [8, 512], strides = [1, 1]} : vector<8x1024xf32> to vector<8x512xf32>
    %204 = vector.extract_strided_slice %202 {offsets = [0, 512], sizes = [8, 512], strides = [1, 1]} : vector<8x1024xf32> to vector<8x512xf32>
    %205 = arith.addf %204, %9 : vector<8x512xf32>
    %206 = vector.extract_strided_slice %205 {offsets = [0, 0], sizes = [8, 128], strides = [1, 1]} : vector<8x512xf32> to vector<8x128xf32>
    %207 = arith.negf %206 : vector<8x128xf32>
    %208 = math.exp %207 : vector<8x128xf32>
    %cst_45 = arith.constant 1.000000e+00 : f32
    %209 = vector.broadcast %cst_45 : f32 to vector<8x128xf32>
    %210 = arith.addf %209, %208 : vector<8x128xf32>
    %211 = arith.divf %209, %210 : vector<8x128xf32>
    %212 = vector.extract_strided_slice %205 {offsets = [0, 256], sizes = [8, 128], strides = [1, 1]} : vector<8x512xf32> to vector<8x128xf32>
    %213 = math.tanh %212 : vector<8x128xf32>
    %214 = vector.extract_strided_slice %205 {offsets = [0, 384], sizes = [8, 128], strides = [1, 1]} : vector<8x512xf32> to vector<8x128xf32>
    %215 = arith.negf %214 : vector<8x128xf32>
    %216 = math.exp %215 : vector<8x128xf32>
    %cst_46 = arith.constant 1.000000e+00 : f32
    %217 = vector.broadcast %cst_46 : f32 to vector<8x128xf32>
    %218 = arith.addf %217, %216 : vector<8x128xf32>
    %219 = arith.divf %217, %218 : vector<8x128xf32>
    %220 = vector.extract_strided_slice %205 {offsets = [0, 128], sizes = [8, 128], strides = [1, 1]} : vector<8x512xf32> to vector<8x128xf32>
    %221 = arith.negf %220 : vector<8x128xf32>
    %222 = math.exp %221 : vector<8x128xf32>
    %cst_47 = arith.constant 1.000000e+00 : f32
    %223 = vector.broadcast %cst_47 : f32 to vector<8x128xf32>
    %224 = arith.addf %223, %222 : vector<8x128xf32>
    %225 = arith.divf %223, %224 : vector<8x128xf32>
    %226 = arith.mulf %225, %168 : vector<8x128xf32>
    %227 = arith.mulf %211, %213 : vector<8x128xf32>
    %228 = arith.addf %226, %227 : vector<8x128xf32>
    %229 = math.tanh %228 : vector<8x128xf32>
    %230 = arith.mulf %219, %229 : vector<8x128xf32>
    %c32 = arith.constant 32 : index
    %c0_48 = arith.constant 0 : index
    %231 = vector.load %arg8[%c32, %c0_48] : memref<64x512xf32, #tpu.memory_space<vmem>>, vector<8x512xf32>
    %232 = arith.addf %231, %203 : vector<8x512xf32>
    %233 = vector.extract_strided_slice %232 {offsets = [0, 0], sizes = [8, 128], strides = [1, 1]} : vector<8x512xf32> to vector<8x128xf32>
    %234 = arith.negf %233 : vector<8x128xf32>
    %235 = math.exp %234 : vector<8x128xf32>
    %cst_49 = arith.constant 1.000000e+00 : f32
    %236 = vector.broadcast %cst_49 : f32 to vector<8x128xf32>
    %237 = arith.addf %236, %235 : vector<8x128xf32>
    %238 = arith.divf %236, %237 : vector<8x128xf32>
    %239 = vector.extract_strided_slice %232 {offsets = [0, 256], sizes = [8, 128], strides = [1, 1]} : vector<8x512xf32> to vector<8x128xf32>
    %240 = math.tanh %239 : vector<8x128xf32>
    %241 = vector.extract_strided_slice %232 {offsets = [0, 384], sizes = [8, 128], strides = [1, 1]} : vector<8x512xf32> to vector<8x128xf32>
    %242 = arith.negf %241 : vector<8x128xf32>
    %243 = math.exp %242 : vector<8x128xf32>
    %cst_50 = arith.constant 1.000000e+00 : f32
    %244 = vector.broadcast %cst_50 : f32 to vector<8x128xf32>
    %245 = arith.addf %244, %243 : vector<8x128xf32>
    %246 = arith.divf %244, %245 : vector<8x128xf32>
    %247 = vector.extract_strided_slice %232 {offsets = [0, 128], sizes = [8, 128], strides = [1, 1]} : vector<8x512xf32> to vector<8x128xf32>
    %248 = arith.negf %247 : vector<8x128xf32>
    %249 = math.exp %248 : vector<8x128xf32>
    %cst_51 = arith.constant 1.000000e+00 : f32
    %250 = vector.broadcast %cst_51 : f32 to vector<8x128xf32>
    %251 = arith.addf %250, %249 : vector<8x128xf32>
    %252 = arith.divf %250, %251 : vector<8x128xf32>
    %253 = arith.mulf %252, %195 : vector<8x128xf32>
    %254 = arith.mulf %238, %240 : vector<8x128xf32>
    %255 = arith.addf %253, %254 : vector<8x128xf32>
    %256 = math.tanh %255 : vector<8x128xf32>
    %257 = arith.mulf %246, %256 : vector<8x128xf32>
    %258 = arith.truncf %257 : vector<8x128xf32> to vector<8x128xbf16>
    %259 = arith.truncf %230 : vector<8x128xf32> to vector<8x128xbf16>
    %260 = tpu.concatenate %258, %259 in 1 : vector<8x128xbf16>, vector<8x128xbf16> -> vector<8x256xbf16>
    %c0_52 = arith.constant 0 : index
    %c0_53 = arith.constant 0 : index
    %261 = vector.load %arg3[%c0_52, %c0_53] : memref<256x1024xbf16, #tpu.memory_space<vmem>>, vector<256x1024xbf16>
    %cst_54 = arith.constant dense<0.000000e+00> : vector<8x1024xf32>
    %262 = tpu.matmul %260, %261, %cst_54 {dimension_numbers = #tpu.dot_dimension_numbers<[1], [0], [0], [1], [0, 0, 1, 1], [], []>} : vector<8x256xbf16>, vector<256x1024xbf16>, vector<8x1024xf32> -> vector<8x1024xf32>
    %263 = vector.extract_strided_slice %262 {offsets = [0, 0], sizes = [8, 512], strides = [1, 1]} : vector<8x1024xf32> to vector<8x512xf32>
    %264 = vector.extract_strided_slice %262 {offsets = [0, 512], sizes = [8, 512], strides = [1, 1]} : vector<8x1024xf32> to vector<8x512xf32>
    %265 = arith.addf %264, %9 : vector<8x512xf32>
    %266 = vector.extract_strided_slice %265 {offsets = [0, 0], sizes = [8, 128], strides = [1, 1]} : vector<8x512xf32> to vector<8x128xf32>
    %267 = arith.negf %266 : vector<8x128xf32>
    %268 = math.exp %267 : vector<8x128xf32>
    %cst_55 = arith.constant 1.000000e+00 : f32
    %269 = vector.broadcast %cst_55 : f32 to vector<8x128xf32>
    %270 = arith.addf %269, %268 : vector<8x128xf32>
    %271 = arith.divf %269, %270 : vector<8x128xf32>
    %272 = vector.extract_strided_slice %265 {offsets = [0, 256], sizes = [8, 128], strides = [1, 1]} : vector<8x512xf32> to vector<8x128xf32>
    %273 = math.tanh %272 : vector<8x128xf32>
    %274 = vector.extract_strided_slice %265 {offsets = [0, 384], sizes = [8, 128], strides = [1, 1]} : vector<8x512xf32> to vector<8x128xf32>
    %275 = arith.negf %274 : vector<8x128xf32>
    %276 = math.exp %275 : vector<8x128xf32>
    %cst_56 = arith.constant 1.000000e+00 : f32
    %277 = vector.broadcast %cst_56 : f32 to vector<8x128xf32>
    %278 = arith.addf %277, %276 : vector<8x128xf32>
    %279 = arith.divf %277, %278 : vector<8x128xf32>
    %280 = vector.extract_strided_slice %265 {offsets = [0, 128], sizes = [8, 128], strides = [1, 1]} : vector<8x512xf32> to vector<8x128xf32>
    %281 = arith.negf %280 : vector<8x128xf32>
    %282 = math.exp %281 : vector<8x128xf32>
    %cst_57 = arith.constant 1.000000e+00 : f32
    %283 = vector.broadcast %cst_57 : f32 to vector<8x128xf32>
    %284 = arith.addf %283, %282 : vector<8x128xf32>
    %285 = arith.divf %283, %284 : vector<8x128xf32>
    %286 = arith.mulf %285, %228 : vector<8x128xf32>
    %287 = arith.mulf %271, %273 : vector<8x128xf32>
    %288 = arith.addf %286, %287 : vector<8x128xf32>
    %289 = math.tanh %288 : vector<8x128xf32>
    %290 = arith.mulf %279, %289 : vector<8x128xf32>
    %c40 = arith.constant 40 : index
    %c0_58 = arith.constant 0 : index
    %291 = vector.load %arg8[%c40, %c0_58] : memref<64x512xf32, #tpu.memory_space<vmem>>, vector<8x512xf32>
    %292 = arith.addf %291, %263 : vector<8x512xf32>
    %293 = vector.extract_strided_slice %292 {offsets = [0, 0], sizes = [8, 128], strides = [1, 1]} : vector<8x512xf32> to vector<8x128xf32>
    %294 = arith.negf %293 : vector<8x128xf32>
    %295 = math.exp %294 : vector<8x128xf32>
    %cst_59 = arith.constant 1.000000e+00 : f32
    %296 = vector.broadcast %cst_59 : f32 to vector<8x128xf32>
    %297 = arith.addf %296, %295 : vector<8x128xf32>
    %298 = arith.divf %296, %297 : vector<8x128xf32>
    %299 = vector.extract_strided_slice %292 {offsets = [0, 256], sizes = [8, 128], strides = [1, 1]} : vector<8x512xf32> to vector<8x128xf32>
    %300 = math.tanh %299 : vector<8x128xf32>
    %301 = vector.extract_strided_slice %292 {offsets = [0, 384], sizes = [8, 128], strides = [1, 1]} : vector<8x512xf32> to vector<8x128xf32>
    %302 = arith.negf %301 : vector<8x128xf32>
    %303 = math.exp %302 : vector<8x128xf32>
    %cst_60 = arith.constant 1.000000e+00 : f32
    %304 = vector.broadcast %cst_60 : f32 to vector<8x128xf32>
    %305 = arith.addf %304, %303 : vector<8x128xf32>
    %306 = arith.divf %304, %305 : vector<8x128xf32>
    %307 = vector.extract_strided_slice %292 {offsets = [0, 128], sizes = [8, 128], strides = [1, 1]} : vector<8x512xf32> to vector<8x128xf32>
    %308 = arith.negf %307 : vector<8x128xf32>
    %309 = math.exp %308 : vector<8x128xf32>
    %cst_61 = arith.constant 1.000000e+00 : f32
    %310 = vector.broadcast %cst_61 : f32 to vector<8x128xf32>
    %311 = arith.addf %310, %309 : vector<8x128xf32>
    %312 = arith.divf %310, %311 : vector<8x128xf32>
    %313 = arith.mulf %312, %255 : vector<8x128xf32>
    %314 = arith.mulf %298, %300 : vector<8x128xf32>
    %315 = arith.addf %313, %314 : vector<8x128xf32>
    %316 = math.tanh %315 : vector<8x128xf32>
    %317 = arith.mulf %306, %316 : vector<8x128xf32>
    %318 = arith.truncf %317 : vector<8x128xf32> to vector<8x128xbf16>
    %319 = arith.truncf %290 : vector<8x128xf32> to vector<8x128xbf16>
    %320 = tpu.concatenate %318, %319 in 1 : vector<8x128xbf16>, vector<8x128xbf16> -> vector<8x256xbf16>
    %c0_62 = arith.constant 0 : index
    %c0_63 = arith.constant 0 : index
    %321 = vector.load %arg3[%c0_62, %c0_63] : memref<256x1024xbf16, #tpu.memory_space<vmem>>, vector<256x1024xbf16>
    %cst_64 = arith.constant dense<0.000000e+00> : vector<8x1024xf32>
    %322 = tpu.matmul %320, %321, %cst_64 {dimension_numbers = #tpu.dot_dimension_numbers<[1], [0], [0], [1], [0, 0, 1, 1], [], []>} : vector<8x256xbf16>, vector<256x1024xbf16>, vector<8x1024xf32> -> vector<8x1024xf32>
    %323 = vector.extract_strided_slice %322 {offsets = [0, 0], sizes = [8, 512], strides = [1, 1]} : vector<8x1024xf32> to vector<8x512xf32>
    %324 = vector.extract_strided_slice %322 {offsets = [0, 512], sizes = [8, 512], strides = [1, 1]} : vector<8x1024xf32> to vector<8x512xf32>
    %325 = arith.addf %324, %9 : vector<8x512xf32>
    %326 = vector.extract_strided_slice %325 {offsets = [0, 0], sizes = [8, 128], strides = [1, 1]} : vector<8x512xf32> to vector<8x128xf32>
    %327 = arith.negf %326 : vector<8x128xf32>
    %328 = math.exp %327 : vector<8x128xf32>
    %cst_65 = arith.constant 1.000000e+00 : f32
    %329 = vector.broadcast %cst_65 : f32 to vector<8x128xf32>
    %330 = arith.addf %329, %328 : vector<8x128xf32>
    %331 = arith.divf %329, %330 : vector<8x128xf32>
    %332 = vector.extract_strided_slice %325 {offsets = [0, 256], sizes = [8, 128], strides = [1, 1]} : vector<8x512xf32> to vector<8x128xf32>
    %333 = math.tanh %332 : vector<8x128xf32>
    %334 = vector.extract_strided_slice %325 {offsets = [0, 384], sizes = [8, 128], strides = [1, 1]} : vector<8x512xf32> to vector<8x128xf32>
    %335 = arith.negf %334 : vector<8x128xf32>
    %336 = math.exp %335 : vector<8x128xf32>
    %cst_66 = arith.constant 1.000000e+00 : f32
    %337 = vector.broadcast %cst_66 : f32 to vector<8x128xf32>
    %338 = arith.addf %337, %336 : vector<8x128xf32>
    %339 = arith.divf %337, %338 : vector<8x128xf32>
    %340 = vector.extract_strided_slice %325 {offsets = [0, 128], sizes = [8, 128], strides = [1, 1]} : vector<8x512xf32> to vector<8x128xf32>
    %341 = arith.negf %340 : vector<8x128xf32>
    %342 = math.exp %341 : vector<8x128xf32>
    %cst_67 = arith.constant 1.000000e+00 : f32
    %343 = vector.broadcast %cst_67 : f32 to vector<8x128xf32>
    %344 = arith.addf %343, %342 : vector<8x128xf32>
    %345 = arith.divf %343, %344 : vector<8x128xf32>
    %346 = arith.mulf %345, %288 : vector<8x128xf32>
    %347 = arith.mulf %331, %333 : vector<8x128xf32>
    %348 = arith.addf %346, %347 : vector<8x128xf32>
    %349 = math.tanh %348 : vector<8x128xf32>
    %350 = arith.mulf %339, %349 : vector<8x128xf32>
    %c48 = arith.constant 48 : index
    %c0_68 = arith.constant 0 : index
    %351 = vector.load %arg8[%c48, %c0_68] : memref<64x512xf32, #tpu.memory_space<vmem>>, vector<8x512xf32>
    %352 = arith.addf %351, %323 : vector<8x512xf32>
    %353 = vector.extract_strided_slice %352 {offsets = [0, 0], sizes = [8, 128], strides = [1, 1]} : vector<8x512xf32> to vector<8x128xf32>
    %354 = arith.negf %353 : vector<8x128xf32>
    %355 = math.exp %354 : vector<8x128xf32>
    %cst_69 = arith.constant 1.000000e+00 : f32
    %356 = vector.broadcast %cst_69 : f32 to vector<8x128xf32>
    %357 = arith.addf %356, %355 : vector<8x128xf32>
    %358 = arith.divf %356, %357 : vector<8x128xf32>
    %359 = vector.extract_strided_slice %352 {offsets = [0, 256], sizes = [8, 128], strides = [1, 1]} : vector<8x512xf32> to vector<8x128xf32>
    %360 = math.tanh %359 : vector<8x128xf32>
    %361 = vector.extract_strided_slice %352 {offsets = [0, 384], sizes = [8, 128], strides = [1, 1]} : vector<8x512xf32> to vector<8x128xf32>
    %362 = arith.negf %361 : vector<8x128xf32>
    %363 = math.exp %362 : vector<8x128xf32>
    %cst_70 = arith.constant 1.000000e+00 : f32
    %364 = vector.broadcast %cst_70 : f32 to vector<8x128xf32>
    %365 = arith.addf %364, %363 : vector<8x128xf32>
    %366 = arith.divf %364, %365 : vector<8x128xf32>
    %367 = vector.extract_strided_slice %352 {offsets = [0, 128], sizes = [8, 128], strides = [1, 1]} : vector<8x512xf32> to vector<8x128xf32>
    %368 = arith.negf %367 : vector<8x128xf32>
    %369 = math.exp %368 : vector<8x128xf32>
    %cst_71 = arith.constant 1.000000e+00 : f32
    %370 = vector.broadcast %cst_71 : f32 to vector<8x128xf32>
    %371 = arith.addf %370, %369 : vector<8x128xf32>
    %372 = arith.divf %370, %371 : vector<8x128xf32>
    %373 = arith.mulf %372, %315 : vector<8x128xf32>
    %374 = arith.mulf %358, %360 : vector<8x128xf32>
    %375 = arith.addf %373, %374 : vector<8x128xf32>
    %376 = math.tanh %375 : vector<8x128xf32>
    %377 = arith.mulf %366, %376 : vector<8x128xf32>
    %378 = arith.truncf %377 : vector<8x128xf32> to vector<8x128xbf16>
    %379 = arith.truncf %350 : vector<8x128xf32> to vector<8x128xbf16>
    %380 = tpu.concatenate %378, %379 in 1 : vector<8x128xbf16>, vector<8x128xbf16> -> vector<8x256xbf16>
    %c0_72 = arith.constant 0 : index
    %c0_73 = arith.constant 0 : index
    %381 = vector.load %arg3[%c0_72, %c0_73] : memref<256x1024xbf16, #tpu.memory_space<vmem>>, vector<256x1024xbf16>
    %cst_74 = arith.constant dense<0.000000e+00> : vector<8x1024xf32>
    %382 = tpu.matmul %380, %381, %cst_74 {dimension_numbers = #tpu.dot_dimension_numbers<[1], [0], [0], [1], [0, 0, 1, 1], [], []>} : vector<8x256xbf16>, vector<256x1024xbf16>, vector<8x1024xf32> -> vector<8x1024xf32>
    %383 = vector.extract_strided_slice %382 {offsets = [0, 0], sizes = [8, 512], strides = [1, 1]} : vector<8x1024xf32> to vector<8x512xf32>
    %384 = vector.extract_strided_slice %382 {offsets = [0, 512], sizes = [8, 512], strides = [1, 1]} : vector<8x1024xf32> to vector<8x512xf32>
    %385 = arith.addf %384, %9 : vector<8x512xf32>
    %386 = vector.extract_strided_slice %385 {offsets = [0, 0], sizes = [8, 128], strides = [1, 1]} : vector<8x512xf32> to vector<8x128xf32>
    %387 = arith.negf %386 : vector<8x128xf32>
    %388 = math.exp %387 : vector<8x128xf32>
    %cst_75 = arith.constant 1.000000e+00 : f32
    %389 = vector.broadcast %cst_75 : f32 to vector<8x128xf32>
    %390 = arith.addf %389, %388 : vector<8x128xf32>
    %391 = arith.divf %389, %390 : vector<8x128xf32>
    %392 = vector.extract_strided_slice %385 {offsets = [0, 256], sizes = [8, 128], strides = [1, 1]} : vector<8x512xf32> to vector<8x128xf32>
    %393 = math.tanh %392 : vector<8x128xf32>
    %394 = vector.extract_strided_slice %385 {offsets = [0, 384], sizes = [8, 128], strides = [1, 1]} : vector<8x512xf32> to vector<8x128xf32>
    %395 = arith.negf %394 : vector<8x128xf32>
    %396 = math.exp %395 : vector<8x128xf32>
    %cst_76 = arith.constant 1.000000e+00 : f32
    %397 = vector.broadcast %cst_76 : f32 to vector<8x128xf32>
    %398 = arith.addf %397, %396 : vector<8x128xf32>
    %399 = arith.divf %397, %398 : vector<8x128xf32>
    %400 = vector.extract_strided_slice %385 {offsets = [0, 128], sizes = [8, 128], strides = [1, 1]} : vector<8x512xf32> to vector<8x128xf32>
    %401 = arith.negf %400 : vector<8x128xf32>
    %402 = math.exp %401 : vector<8x128xf32>
    %cst_77 = arith.constant 1.000000e+00 : f32
    %403 = vector.broadcast %cst_77 : f32 to vector<8x128xf32>
    %404 = arith.addf %403, %402 : vector<8x128xf32>
    %405 = arith.divf %403, %404 : vector<8x128xf32>
    %406 = arith.mulf %405, %348 : vector<8x128xf32>
    %407 = arith.mulf %391, %393 : vector<8x128xf32>
    %408 = arith.addf %406, %407 : vector<8x128xf32>
    %409 = math.tanh %408 : vector<8x128xf32>
    %410 = arith.mulf %399, %409 : vector<8x128xf32>
    %c56 = arith.constant 56 : index
    %c0_78 = arith.constant 0 : index
    %411 = vector.load %arg8[%c56, %c0_78] : memref<64x512xf32, #tpu.memory_space<vmem>>, vector<8x512xf32>
    %412 = arith.addf %411, %383 : vector<8x512xf32>
    %413 = vector.extract_strided_slice %412 {offsets = [0, 0], sizes = [8, 128], strides = [1, 1]} : vector<8x512xf32> to vector<8x128xf32>
    %414 = arith.negf %413 : vector<8x128xf32>
    %415 = math.exp %414 : vector<8x128xf32>
    %cst_79 = arith.constant 1.000000e+00 : f32
    %416 = vector.broadcast %cst_79 : f32 to vector<8x128xf32>
    %417 = arith.addf %416, %415 : vector<8x128xf32>
    %418 = arith.divf %416, %417 : vector<8x128xf32>
    %419 = vector.extract_strided_slice %412 {offsets = [0, 256], sizes = [8, 128], strides = [1, 1]} : vector<8x512xf32> to vector<8x128xf32>
    %420 = math.tanh %419 : vector<8x128xf32>
    %421 = vector.extract_strided_slice %412 {offsets = [0, 384], sizes = [8, 128], strides = [1, 1]} : vector<8x512xf32> to vector<8x128xf32>
    %422 = arith.negf %421 : vector<8x128xf32>
    %423 = math.exp %422 : vector<8x128xf32>
    %cst_80 = arith.constant 1.000000e+00 : f32
    %424 = vector.broadcast %cst_80 : f32 to vector<8x128xf32>
    %425 = arith.addf %424, %423 : vector<8x128xf32>
    %426 = arith.divf %424, %425 : vector<8x128xf32>
    %427 = vector.extract_strided_slice %412 {offsets = [0, 128], sizes = [8, 128], strides = [1, 1]} : vector<8x512xf32> to vector<8x128xf32>
    %428 = arith.negf %427 : vector<8x128xf32>
    %429 = math.exp %428 : vector<8x128xf32>
    %cst_81 = arith.constant 1.000000e+00 : f32
    %430 = vector.broadcast %cst_81 : f32 to vector<8x128xf32>
    %431 = arith.addf %430, %429 : vector<8x128xf32>
    %432 = arith.divf %430, %431 : vector<8x128xf32>
    %433 = arith.mulf %432, %375 : vector<8x128xf32>
    %434 = arith.mulf %418, %420 : vector<8x128xf32>
    %435 = arith.addf %433, %434 : vector<8x128xf32>
    %436 = math.tanh %435 : vector<8x128xf32>
    %437 = arith.mulf %426, %436 : vector<8x128xf32>
    %438 = arith.truncf %437 : vector<8x128xf32> to vector<8x128xbf16>
    %439 = arith.truncf %410 : vector<8x128xf32> to vector<8x128xbf16>
    %440 = tpu.concatenate %438, %439 in 1 : vector<8x128xbf16>, vector<8x128xbf16> -> vector<8x256xbf16>
    %c0_82 = arith.constant 0 : index
    %c512 = arith.constant 512 : index
    %441 = vector.load %arg3[%c0_82, %c512] : memref<256x1024xbf16, #tpu.memory_space<vmem>>, vector<256x512xbf16>
    %cst_83 = arith.constant dense<0.000000e+00> : vector<8x512xf32>
    %442 = tpu.matmul %440, %441, %cst_83 {dimension_numbers = #tpu.dot_dimension_numbers<[1], [0], [0], [1], [0, 0, 1, 1], [], []>} : vector<8x256xbf16>, vector<256x512xbf16>, vector<8x512xf32> -> vector<8x512xf32>
    %443 = arith.addf %442, %9 : vector<8x512xf32>
    %444 = vector.extract_strided_slice %443 {offsets = [0, 0], sizes = [8, 128], strides = [1, 1]} : vector<8x512xf32> to vector<8x128xf32>
    %445 = arith.negf %444 : vector<8x128xf32>
    %446 = math.exp %445 : vector<8x128xf32>
    %cst_84 = arith.constant 1.000000e+00 : f32
    %447 = vector.broadcast %cst_84 : f32 to vector<8x128xf32>
    %448 = arith.addf %447, %446 : vector<8x128xf32>
    %449 = arith.divf %447, %448 : vector<8x128xf32>
    %450 = vector.extract_strided_slice %443 {offsets = [0, 256], sizes = [8, 128], strides = [1, 1]} : vector<8x512xf32> to vector<8x128xf32>
    %451 = math.tanh %450 : vector<8x128xf32>
    %452 = vector.extract_strided_slice %443 {offsets = [0, 384], sizes = [8, 128], strides = [1, 1]} : vector<8x512xf32> to vector<8x128xf32>
    %453 = arith.negf %452 : vector<8x128xf32>
    %454 = math.exp %453 : vector<8x128xf32>
    %cst_85 = arith.constant 1.000000e+00 : f32
    %455 = vector.broadcast %cst_85 : f32 to vector<8x128xf32>
    %456 = arith.addf %455, %454 : vector<8x128xf32>
    %457 = arith.divf %455, %456 : vector<8x128xf32>
    %458 = vector.extract_strided_slice %443 {offsets = [0, 128], sizes = [8, 128], strides = [1, 1]} : vector<8x512xf32> to vector<8x128xf32>
    %459 = arith.negf %458 : vector<8x128xf32>
    %460 = math.exp %459 : vector<8x128xf32>
    %cst_86 = arith.constant 1.000000e+00 : f32
    %461 = vector.broadcast %cst_86 : f32 to vector<8x128xf32>
    %462 = arith.addf %461, %460 : vector<8x128xf32>
    %463 = arith.divf %461, %462 : vector<8x128xf32>
    %464 = arith.mulf %463, %408 : vector<8x128xf32>
    %465 = arith.mulf %449, %451 : vector<8x128xf32>
    %466 = arith.addf %464, %465 : vector<8x128xf32>
    %467 = math.tanh %466 : vector<8x128xf32>
    %468 = arith.mulf %457, %467 : vector<8x128xf32>
    %469 = arith.truncf %468 : vector<8x128xf32> to vector<8x128xbf16>
    %c0_87 = arith.constant 0 : index
    %c0_88 = arith.constant 0 : index
    %470 = vector.load %arg5[%c0_87, %c0_88] : memref<128x128xbf16, #tpu.memory_space<vmem>>, vector<128x128xbf16>
    %cst_89 = arith.constant dense<0.000000e+00> : vector<8x128xf32>
    %471 = tpu.matmul %469, %470, %cst_89 {dimension_numbers = #tpu.dot_dimension_numbers<[1], [0], [0], [1], [0, 0, 1, 1], [], []>} : vector<8x128xbf16>, vector<128x128xbf16>, vector<8x128xf32> -> vector<8x128xf32>
    %c0_90 = arith.constant 0 : index
    %c0_91 = arith.constant 0 : index
    %472 = vector.load %arg6[%c0_90, %c0_91] : memref<1x128xf32, #tpu.memory_space<vmem>>, vector<1x128xf32>
    %473 = vector.broadcast %472 : vector<1x128xf32> to vector<8x128xf32>
    %474 = arith.addf %471, %473 : vector<8x128xf32>
    %c0_92 = arith.constant 0 : index
    %c0_93 = arith.constant 0 : index
    %475 = vector.load %arg7[%c0_92, %c0_93] : memref<8x128xf32, #tpu.memory_space<vmem>>, vector<8x128xf32>
    tpu.vector_store %arg7[%c0_92, %c0_93], %474 {strides = array<i32>} : memref<8x128xf32, #tpu.memory_space<vmem>>, vector<8x128xf32>,
    return
  }
}

</mosaic_0001>

<bundles_post_ra>
// kernel: rnn_forward.1
= control target key start
LH: loop header
LB: loop body
LE: loop exit
PB: predicated region body
PF: predicated region fallthrough
CT: control target
= control target key end

     0   :  { %12 = vsyncpa [#allocation4], 0  ;;  %s5575_s0 = inlined_call_operand.vmem [shape: bf16[64,28], index: 0, kind: input, shape index: {}]   ;;  %s5576_s1 = inlined_call_operand.vmem [shape: bf16[28,512], index: 1, kind: input, shape index: {}]   ;;  %s5577_s2 = inlined_call_operand.vmem [shape: f32[1,512], index: 2, kind: input, shape index: {}]   ;;  %s5578_s3 = inlined_call_operand.hbm [shape: bf16[256,1024], index: 3, kind: input, shape index: {}]   ;;  %s5579_s4 = inlined_call_operand.vmem [shape: f32[1,512], index: 4, kind: input, shape index: {}]   ;;  %s5580_s5 = inlined_call_operand.vmem [shape: bf16[128,128], index: 5, kind: input, shape index: {}]   ;;  %s5581_s6 = inlined_call_operand.vmem [shape: f32[1,128], index: 6, kind: input, shape index: {}]   ;;  %s5582_s7 = inlined_call_operand.hbm [shape: f32[8,128], index: 7, kind: output, shape index: {}]  }
   0x1   :  { %13 = vsyncpa [#allocation5], 0  ;;  %s3965_s24 = smov [#allocation3]   ;;  %s3917_s28 = scalar_lea.hbm %s5578_s3, 16384 }
   0x2   :  { %s25_s25 = sshll.u32 %s3965_s24, 4  ;;  %p3918_p0 = scmp.ne.s32.totalorder %s5578_s3, %s3917_s28  ;;  %s26_s25 = int_to_ptr.vmem [resolvable:$true] %s25_s25 }
   0x3   :  { %p3921_p1 = scmp.lt.u32.totalorder %s3917_s28, %s5578_s3 }
   0x5   :  { %p3923_p2 = pnand %p3921_p1, %p3918_p0 }
   0x7   :  { %3926 = shalt.err (!%p3923_p2)
}
   0x8   :  { %s3927_s10 = scalar_lea.vmem %s26_s25, 16384  ;;  %p3932_p4 = scmp.lt.s32.totalorder %s26_s25, %s26_s25 }
   0x9   :  { %p3928_p3 = scmp.ne.s32.totalorder %s26_s25, %s3927_s10  ;;  %p3933_p5 = scmp.lt.s32.totalorder %s3927_s10, %s3927_s10 }
   0xb   :  { %p3934_p6 = por %p3933_p5, %p3932_p4 }
   0xd   :  { %p3935_p7 = pnand %p3934_p6, %p3928_p3 }
   0xf   :  { %3938 = shalt.err (!%p3935_p7)
}
  0x10   :  { %s3966_s11 = smov 512   ;;  %s3967_s12 = smov 32  }
  0x11   :  { %31 = dma.hbm_to_vmem [thread:$0]  %s5578_s3, 16384, %s26_s25, [#allocation4], %s3966_s11, %s3966_s11, %s3967_s12  }
  0x12   :  { %3961 = dma.done.wait [#allocation4], 16384  }
  0x13   :  { %3962 = vsyncadd [#allocation4], 4294950912  ;;  %v5586_v0 = vmov 0   ;;  %v3645_v1 = vld [vmem:[%s5576_s1 + $0x4] ss:$16 sps:$4 sm:$0xff]   ;;  %vm149_vm0 = vcmask 1045504  }
  0x14   :  { %194 = vmatprep.mubr.bf16.mxu0 %v5586_v0  ;;  %267 = vmatprep.mubr.bf16.mxu1 %v5586_v0  ;;  %v3647_v2 = vld [vmem:[%s5576_s1] ss:$16 sps:$4 sm:$0xff]   ;;  %v3648_v3 = vld [vmem:[%s5576_s1 + $0x24] ss:$16 sps:$4 sm:$0x3f]   ;;  %vm136_vm1 = vcmask 228352  }
  0x15   :  { %162 = vmatprep.subr.bf16.mxu0 %v3645_v1  ;;  %v3650_v4 = vld [vmem:[%s5576_s1 + $0x20] ss:$16 sps:$4 sm:$0x3f]   ;;  %v3652_v7 = vld [vmem:[%s5576_s1 + $0xc] ss:$16 sps:$4 sm:$0xff]   ;;  %vm3970_vm2 = vmmov 0  }
  0x16   :  { %163 = vmatpush1.bf16.msra.mxu0 %v3647_v2  ;;  %v151_v5 = vsel %vm149_vm0, %v3650_v4, 0  ;;  %v3651_v6 = vld [vmem:[%s5575_s0] sm:$0xff]   ;;  %v3654_v8 = vld [vmem:[%s5576_s1 + $0x8] ss:$16 sps:$4 sm:$0xff]   ;;  %235 = vmatprep.subr.bf16.mxu1 %v3652_v7  ;;  %v3659_v45 = vld [vmem:[%s5575_s0 + $0x10] sm:$0xff]   ;;  %s3971_s8 = smov [#allocation6]  }
  0x17   :  { %3352 = vmatprep.subr.msk.bf16.mxu0 %vm149_vm0, %v3648_v3  ;;  %v3655_v9 = vld [vmem:[%s5576_s1 + $0x2c] ss:$16 sps:$4 sm:$0x3f]   ;;  %v3657_v10 = vld [vmem:[%s5576_s1 + $0x28] ss:$16 sps:$4 sm:$0x3f]   ;;  %236 = vmatpush1.bf16.msra.mxu1 %v3654_v8 }
  0x18   :  { %3357 = vmatprep.subr.msk.bf16.mxu1 %vm149_vm0, %v3655_v9  ;;  %v157_v11 = vsel %vm149_vm0, %v3657_v10, 0  ;;  %v382_v12 = vld [vmem:[#allocation3] sm:$0xff]  ;;  %v383_v14 = vld [vmem:[#allocation3 + $0x8] sm:$0xff]  ;;  %v3660_v60 = vld [vmem:[%s5575_s0 + $0x18] sm:$0xff]   ;;  %s3331_s1 = sshll.u32 %s3971_s8, 4  ;;  %s3332_s1 = int_to_ptr.vmem [resolvable:$true] %s3331_s1 }
  0x19   :  { %v386_v13 = vld [vmem:[#allocation3 + $0x20] sm:$0xff]  ;;  %v387_v16 = vld [vmem:[#allocation3 + $0x28] sm:$0xff]  ;;  %s3939_s9 = scalar_lea.vmem %s3332_s1, 128  ;;  %p3944_p9 = scmp.lt.s32.totalorder %s3332_s1, %s3332_s1 }
  0x1a   :  { %165 = vmatpush1.bf16.msra.mxu0 %v151_v5  ;;  %v4061_v15 = vcombine.high %v382_v12, %v386_v13  ;;  %v4063_v17 = vcombine.low %v382_v12, %v386_v13  ;;  %v4065_v18 = vcombine.low %v383_v14, %v387_v16  ;;  %v4067_v19 = vcombine.high %v383_v14, %v387_v16  ;;  %v390_v20 = vld [vmem:[#allocation3 + $0x40] sm:$0xff]  ;;  %v391_v22 = vld [vmem:[#allocation3 + $0x48] sm:$0xff]  ;;  %v388_v12 = vld [vmem:[#allocation3 + $0x30] sm:$0xff]  ;;  %p3940_p8 = scmp.ne.s32.totalorder %s3332_s1, %s3939_s9  ;;  %p3945_p10 = scmp.lt.s32.totalorder %s3939_s9, %s3939_s9 }
  0x1b   :  { %238 = vmatpush1.bf16.msra.mxu1 %v157_v11  ;;  %v394_v21 = vld [vmem:[#allocation3 + $0x60] sm:$0xff]  ;;  %v395_v24 = vld [vmem:[#allocation3 + $0x68] sm:$0xff]  ;;  %v384_v11 = vld [vmem:[#allocation3 + $0x10] sm:$0xff] }
  0x1c   :  { %5872 = vst [vmem:[#allocation9_spill] sm:$0xff] %v4061_v15  ;;  %5873 = vst [vmem:[#allocation10_spill] sm:$0xff] %v4063_v17  ;;  %766 = vmatprep.subr.bf16.mxu0 %v4061_v15  ;;  %807 = vmatprep.subr.bf16.mxu1 %v4067_v19  ;;  %v4073_v23 = vcombine.high %v390_v20, %v394_v21  ;;  %v4075_v25 = vcombine.low %v390_v20, %v394_v21  ;;  %v3658_v28 = vld [vmem:[%s5575_s0 + $0x8] sm:$0xff]   ;;  %v398_v29 = vld [vmem:[#allocation3 + $0x80] sm:$0xff]  ;;  %p3946_p11 = por %p3945_p10, %p3944_p9 }
  0x1d   :  { %3353 = vmatmul.mubr.msk.bf16.vlgmr.msra.gmra.mrb[0].mxu0 %vm136_vm1, %v3651_v6  ;;  %5874 = vst [vmem:[#allocation11_spill] sm:$0xff] %v4065_v18  ;;  %5875 = vst [vmem:[#allocation12_spill] sm:$0xff] %v4067_v19  ;;  %v4077_v26 = vcombine.low %v391_v22, %v395_v24  ;;  %v4079_v27 = vcombine.high %v391_v22, %v395_v24  ;;  %v402_v30 = vld [vmem:[#allocation3 + $0xa0] sm:$0xff]  ;;  %v399_v31 = vld [vmem:[#allocation3 + $0x88] sm:$0xff]  ;;  %v4161_v16 = vcombine.low %v384_v11, %v388_v12 }
  0x1e   :  { %204 = vmatprep.mubr.bf16.mxu0 %v5586_v0  ;;  %3358 = vmatmul.mubr.msk.bf16.vlgmr.msra.gmra.mrb[0].mxu1 %vm136_vm1, %v3651_v6  ;;  %5876 = vst [vmem:[#allocation13_spill] sm:$0xff] %v4073_v23  ;;  %5877 = vst [vmem:[#allocation14_spill] sm:$0xff] %v4075_v25  ;;  %v4089_v32 = vcombine.high %v398_v29, %v402_v30  ;;  %v403_v33 = vld [vmem:[#allocation3 + $0xa8] sm:$0xff]  ;;  %v4091_v34 = vcombine.low %v398_v29, %v402_v30  ;;  %v406_v37 = vld [vmem:[#allocation3 + $0xc0] sm:$0xff]  ;;  %p3947_p12 = pnand %p3946_p11, %p3940_p8 }
  0x1f   :  { %277 = vmatprep.mubr.bf16.mxu1 %v5586_v0  ;;  %767 = vmatpush1.bf16.msra.mxu0 %v4063_v17  ;;  %5878 = vst [vmem:[#allocation15_spill] sm:$0xff] %v4077_v26  ;;  %5879 = vst [vmem:[#allocation16_spill] sm:$0xff] %v4079_v27  ;;  %v4093_v35 = vcombine.low %v399_v31, %v403_v33  ;;  %v4095_v36 = vcombine.high %v399_v31, %v403_v33  ;;  %v410_v38 = vld [vmem:[#allocation3 + $0xe0] sm:$0xff]  ;;  %v407_v39 = vld [vmem:[#allocation3 + $0xc8] sm:$0xff]  ;;  %v60_v33 = vlaneseq }
  0x20   :  { %808 = vmatpush1.bf16.msra.mxu1 %v4065_v18  ;;  %768 = vmatprep.subr.bf16.mxu0 %v4073_v23  ;;  %5880 = vst [vmem:[#allocation17_spill] sm:$0xff] %v4089_v32  ;;  %5881 = vst [vmem:[#allocation18_spill] sm:$0xff] %v4091_v34  ;;  %v4104_v40 = vcombine.high %v406_v37, %v410_v38  ;;  %v411_v41 = vld [vmem:[#allocation3 + $0xe8] sm:$0xff]  ;;  %v4106_v42 = vcombine.low %v406_v37, %v410_v38  ;;  %v414_v46 = vld [vmem:[#allocation3 + $0x100] sm:$0xff] }
  0x21   :  { %809 = vmatprep.subr.bf16.mxu1 %v4079_v27  ;;  %5882 = vst [vmem:[#allocation19_spill] sm:$0xff] %v4093_v35  ;;  %5883 = vst [vmem:[#allocation20_spill] sm:$0xff] %v4095_v36  ;;  %v4108_v43 = vcombine.low %v407_v39, %v411_v41  ;;  %v4110_v44 = vcombine.high %v407_v39, %v411_v41  ;;  %v418_v47 = vld [vmem:[#allocation3 + $0x120] sm:$0xff]  ;;  %v415_v48 = vld [vmem:[#allocation3 + $0x108] sm:$0xff]  ;;  %v4179_v30 = vcombine.high %v384_v11, %v388_v12 }
  0x22   :  { %5884 = vst [vmem:[#allocation21_spill] sm:$0xff] %v4104_v40  ;;  %5885 = vst [vmem:[#allocation22_spill] sm:$0xff] %v4106_v42  ;;  %v4120_v49 = vcombine.high %v414_v46, %v418_v47  ;;  %v419_v50 = vld [vmem:[#allocation3 + $0x128] sm:$0xff]  ;;  %v4122_v51 = vcombine.low %v414_v46, %v418_v47  ;;  %v422_v54 = vld [vmem:[#allocation3 + $0x140] sm:$0xff]  ;;  %v4188_v37 = vshrl.u32 %v60_v33, 7 }
  0x23   :  { %769 = vmatpush1.bf16.msra.mxu0 %v4075_v25  ;;  %5886 = vst [vmem:[#allocation23_spill] sm:$0xff] %v4108_v43  ;;  %5887 = vst [vmem:[#allocation24_spill] sm:$0xff] %v4110_v44  ;;  %v4124_v52 = vcombine.low %v415_v48, %v419_v50  ;;  %v4126_v53 = vcombine.high %v415_v48, %v419_v50  ;;  %v426_v55 = vld [vmem:[#allocation3 + $0x160] sm:$0xff]  ;;  %v423_v56 = vld [vmem:[#allocation3 + $0x148] sm:$0xff] }
  0x24   :  { %810 = vmatpush1.bf16.msra.mxu1 %v4077_v26  ;;  %770 = vmatprep.subr.bf16.mxu0 %v4089_v32  ;;  %5888 = vst [vmem:[#allocation25_spill] sm:$0xff] %v4120_v49  ;;  %5889 = vst [vmem:[#allocation26_spill] sm:$0xff] %v4122_v51  ;;  %v4135_v57 = vcombine.low %v422_v54, %v426_v55  ;;  %v4137_v58 = vcombine.high %v422_v54, %v426_v55  ;;  %v427_v59 = vld [vmem:[#allocation3 + $0x168] sm:$0xff]  ;;  %v430_v61 = vld [vmem:[#allocation3 + $0x180] sm:$0xff]  ;;  %v5585_v38 = vsub.s32 0, %v4188_v37 }
  0x25   :  { %3354 = vmatmul.mubr.msk.bf16.gmra.mrb[4].mxu0 %vm136_vm1, %v3658_v28  ;;  %811 = vmatprep.subr.bf16.mxu1 %v4095_v36  ;;  %5890 = vst [vmem:[#allocation27_spill] sm:$0xff] %v4124_v52  ;;  %5891 = vst [vmem:[#allocation28_spill] sm:$0xff] %v4126_v53  ;;  %v4142_v62 = vcombine.low %v423_v56, %v427_v59  ;;  %v4144_v63 = vcombine.high %v423_v56, %v427_v59  ;;  %v434_v1 = vld [vmem:[#allocation3 + $0x1a0] sm:$0xff]  ;;  %v431_v2 = vld [vmem:[#allocation3 + $0x188] sm:$0xff] }
  0x26   :  { %3359 = vmatmul.mubr.msk.bf16.gmra.mrb[4].mxu1 %vm136_vm1, %v3658_v28  ;;  %214 = vmatprep.mubr.bf16.mxu0 %v5586_v0  ;;  %5892 = vst [vmem:[#allocation29_spill] sm:$0xff] %v4135_v57  ;;  %5893 = vst [vmem:[#allocation30_spill] sm:$0xff] %v4137_v58  ;;  %v435_v3 = vld [vmem:[#allocation3 + $0x1a8] sm:$0xff]  ;;  %v4147_v4 = vcombine.high %v430_v61, %v434_v1  ;;  %v438_v6 = vld [vmem:[#allocation3 + $0x1c0] sm:$0xff]  ;;  %v4153_v9 = vcombine.low %v430_v61, %v434_v1 }
  0x27   :  { %287 = vmatprep.mubr.bf16.mxu1 %v5586_v0  ;;  %771 = vmatpush1.bf16.msra.mxu0 %v4091_v34  ;;  %5894 = vst [vmem:[#allocation31_spill] sm:$0xff] %v4142_v62  ;;  %5895 = vst [vmem:[#allocation32_spill] sm:$0xff] %v4144_v63  ;;  %v4149_v5 = vcombine.high %v431_v2, %v435_v3  ;;  %v442_v7 = vld [vmem:[#allocation3 + $0x1e0] sm:$0xff]  ;;  %v439_v8 = vld [vmem:[#allocation3 + $0x1c8] sm:$0xff]  ;;  %v4157_v13 = vcombine.low %v431_v2, %v435_v3 }
  0x28   :  { %812 = vmatpush1.bf16.msra.mxu1 %v4093_v35  ;;  %772 = vmatprep.subr.bf16.mxu0 %v4104_v40  ;;  %5896 = vst [vmem:[#allocation33_spill] sm:$0xff] %v4147_v4  ;;  %5898 = vst [vmem:[#allocation35_spill] sm:$0xff] %v4153_v9  ;;  %v443_v10 = vld [vmem:[#allocation3 + $0x1e8] sm:$0xff]  ;;  %v4159_v14 = vcombine.high %v438_v6, %v442_v7  ;;  %v385_v20 = vld [vmem:[#allocation3 + $0x18] sm:$0xff]  ;;  %v4172_v28 = vcombine.low %v438_v6, %v442_v7 }
  0x29   :  { %813 = vmatprep.subr.bf16.mxu1 %v4110_v44  ;;  %5897 = vst [vmem:[#allocation34_spill] sm:$0xff] %v4149_v5  ;;  %5899 = vst [vmem:[#allocation36_spill] sm:$0xff] %v4157_v13  ;;  %v389_v21 = vld [vmem:[#allocation3 + $0x38] sm:$0xff]  ;;  %v4165_v22 = vcombine.high %v439_v8, %v443_v10  ;;  %v4177_v29 = vcombine.low %v439_v8, %v443_v10  ;;  %v4194_v39 = vld [vmem:[%s5577_s2] sm:$0xf] }
  0x2a   :  { %5900 = vst [vmem:[#allocation37_spill] sm:$0xff] %v4159_v14  ;;  %v4167_v24 = vcombine.low %v385_v20, %v389_v21  ;;  %5903 = vst [vmem:[#allocation40_spill] sm:$0xff] %v4172_v28  ;;  %v4182_v31 = vcombine.high %v385_v20, %v389_v21  ;;  %v4199_v41 = vrot.slane %v4194_v39, %v5585_v38  ;;  %v412_v38 = vld [vmem:[#allocation3 + $0xf0] sm:$0xff] }
  0x2b   :  { %773 = vmatpush1.bf16.msra.mxu0 %v4106_v42  ;;  %5901 = vst [vmem:[#allocation38_spill] sm:$0xff] %v4165_v22  ;;  %5904 = vst [vmem:[#allocation41_spill] sm:$0xff] %v4177_v29 }
  0x2c   :  { %814 = vmatpush1.bf16.msra.mxu1 %v4108_v43  ;;  %774 = vmatprep.subr.bf16.mxu0 %v4120_v49  ;;  %5902 = vst [vmem:[#allocation39_spill] sm:$0xff] %v4167_v24  ;;  %5905 = vst [vmem:[#allocation42_spill] sm:$0xff] %v4179_v30 }
  0x2d   :  { %3355 = vmatmul.mubr.msk.bf16.gmra.mrb[8].mxu0 %vm136_vm1, %v3659_v45  ;;  %815 = vmatprep.subr.bf16.mxu1 %v4126_v53  ;;  %5906 = vst [vmem:[#allocation43_spill] sm:$0xff] %v4182_v31  ;;  %5907 = vst [vmem:[#allocation44_spill] sm:$0xff] %v4199_v41 }
  0x2e   :  { %3360 = vmatmul.mubr.msk.bf16.gmra.mrb[8].mxu1 %vm136_vm1, %v3659_v45  ;;  %224 = vmatprep.mubr.bf16.mxu0 %v5586_v0  ;;  %v5584_v45 = vsub.s32 3, %v4188_v37 }
  0x2f   :  { %297 = vmatprep.mubr.bf16.mxu1 %v5586_v0  ;;  %775 = vmatpush1.bf16.msra.mxu0 %v4122_v51 }
  0x30   :  { %816 = vmatpush1.bf16.msra.mxu1 %v4124_v52  ;;  %776 = vmatprep.subr.bf16.mxu0 %v4137_v58  ;;  %v4208_v54 = vrot.slane %v4194_v39, %v5584_v45  ;;  %v408_v45 = vld [vmem:[#allocation3 + $0xd0] sm:$0xff] }
  0x31   :  { %817 = vmatprep.subr.bf16.mxu1 %v4144_v63 }
  0x32   :  { %5908 = vst [vmem:[#allocation45_spill] sm:$0xff] %v4208_v54 }
  0x33   :  { %777 = vmatpush1.bf16.msra.mxu0 %v4135_v57 }
  0x34   :  { %818 = vmatpush1.bf16.msra.mxu1 %v4142_v62  ;;  %778 = vmatprep.subr.bf16.mxu0 %v4147_v4 }
  0x35   :  { %3356 = vmatmul.mubr.msk.bf16.gmra.mrb[12].mxu0 %vm136_vm1, %v3660_v60  ;;  %819 = vmatprep.subr.bf16.mxu1 %v4149_v5 }
  0x36   :  { %3361 = vmatmul.mubr.msk.bf16.gmra.mrb[12].mxu1 %vm136_vm1, %v3660_v60  ;;  %798 = vmatprep.mubr.bf16.mxu0 %v5586_v0  ;;  %v5583_v60 = vsub.s32 2, %v4188_v37 }
  0x37   :  { %779 = vmatpush1.bf16.msra.mxu0 %v4153_v9  ;;  %839 = vmatprep.mubr.bf16.mxu1 %v5586_v0  ;;  %v409_v0 = vld [vmem:[#allocation3 + $0xd8] sm:$0xff] }
  0x38   :  { %820 = vmatpush1.bf16.msra.mxu1 %v4157_v13  ;;  %780 = vmatprep.subr.bf16.mxu0 %v4159_v14  ;;  %v4221_v7 = vrot.slane %v4194_v39, %v5583_v60 }
  0x39   :  { %821 = vmatprep.subr.bf16.mxu1 %v4165_v22 }
  0x3a   :  { %5910 = vst [vmem:[#allocation47_spill] sm:$0xff] %v4221_v7 }
  0x3b   :  { %781 = vmatpush1.bf16.msra.mxu0 %v4172_v28 }
  0x3c   :  { %822 = vmatpush1.bf16.msra.mxu1 %v4177_v29  ;;  %848 = vmatprep.subr.bf16.mxu0 %v4179_v30 }
  0x3d   :  { %888 = vmatprep.subr.bf16.mxu1 %v4182_v31 }
  0xf0   :  { %v196_v46 = vpop.f32.mrb[0].mxu0 }
  0xf1   :  { %v197_v47 = vadd.f32 %v196_v46, %v4199_v41  ;;  %v198_v48 = vpop.f32.mrb[1].mxu0  ;;  %v269_v59 = vpop.f32.mrb[0].mxu1 }
  0xf2   :  { %v4203_v50 = vpop.f32.mrb[2].mxu0  ;;  %v271_v61 = vpop.f32.mrb[1].mxu1  ;;  %v270_v8 = vadd.f32 %v269_v59, %v4221_v7  ;;  %v392_v48 = vld [vmem:[#allocation3 + $0x50] sm:$0xff] }
  0xf3   :  { %v3362_v55 = vmul.f32 -1.442695, %v197_v47  ;;  %v4210_v56 = vpop.f32.mrb[3].mxu0  ;;  %v272_v1 = vadd.f32 %v271_v61, %v4208_v54  ;;  %v4214_v2 = vpop.f32.mrb[2].mxu1  ;;  %v396_v61 = vld [vmem:[#allocation3 + $0x70] sm:$0xff] }
  0xf4   :  { %v4216_v3 = vpop.f32.mrb[3].mxu1 }
  0xf5   :  { %3669 = vpow2.f32 %v3362_v55  ;;  %5909 = vst [vmem:[#allocation46_spill] sm:$0xff] %v4216_v3  ;;  %v3363_v6 = vmul.f32 -1.442695, %v272_v1  ;;  %v393_v1 = vld [vmem:[#allocation3 + $0x58] sm:$0xff]  ;;  %v5918_v3 = vmov 0  }
  0xf7   :  { %3671 = vpow2.f32 %v3363_v6  ;;  %v397_v6 = vld [vmem:[#allocation3 + $0x78] sm:$0xff] }
  0xf8   :  { %3673 = vtanh.f32 %v270_v8  ;;  %v4229_v8 = vcombine.high %v392_v48, %v396_v61 }
  0xfa   :  { %5912 = vst [vmem:[#allocation49_spill] sm:$0xff] %v4229_v8 }
  0xff   :  { %v3670_v10 = vpop.eup %3669 }
 0x100   :  { %v368_v11 = vadd.f32 1.0, %v3670_v10  ;;  %v4231_v10 = vcombine.high %v393_v1, %v397_v6 }
 0x101   :  { %v3672_v12 = vpop.eup %3671 }
 0x102   :  { %3675 = vrcp.f32 %v368_v11  ;;  %v375_v20 = vadd.f32 1.0, %v3672_v12  ;;  %v3674_v21 = vpop.eup %3673  ;;  %5913 = vst [vmem:[#allocation50_spill] sm:$0xff] %v4231_v10  ;;  %v400_v11 = vld [vmem:[#allocation3 + $0x90] sm:$0xff] }
 0x103   :  { %v404_v12 = vld [vmem:[#allocation3 + $0xb0] sm:$0xff] }
 0x104   :  { %3677 = vrcp.f32 %v375_v20  ;;  %v4237_v20 = vcombine.low %v392_v48, %v396_v61  ;;  %v4251_v48 = vcombine.low %v400_v11, %v404_v12 }
 0x106   :  { %5914 = vst [vmem:[#allocation51_spill] sm:$0xff] %v4237_v20  ;;  %5919 = vst [vmem:[#allocation55_spill] sm:$0xff] %v4251_v48 }
 0x10c   :  { %v3676_v33 = vpop.eup %3675 }
 0x10d   :  { %v4224_v46 = vmul.f32 %v3676_v33, %v3674_v21  ;;  %v401_v21 = vld [vmem:[#allocation3 + $0x98] sm:$0xff] }
 0x10e   :  { %v3678_v47 = vpop.eup %3677  ;;  %v405_v33 = vld [vmem:[#allocation3 + $0xb8] sm:$0xff] }
 0x10f   :  { %5911 = vst [vmem:[#allocation48_spill] sm:$0xff] %v4224_v46  ;;  %3679 = vtanh.f32 %v4224_v46  ;;  %v413_v46 = vld [vmem:[#allocation3 + $0xf8] sm:$0xff]  ;;  %v4253_v61 = vcombine.low %v401_v21, %v405_v33 }
 0x111   :  { %5920 = vst [vmem:[#allocation56_spill] sm:$0xff] %v4253_v61 }
 0x119   :  { %v3680_v55 = vpop.eup %3679 }
 0x11a   :  { %v380_v59 = vmul.f32 %v3680_v55, %v3678_v47  ;;  %v4239_v47 = vcombine.low %v393_v1, %v397_v6  ;;  %v4243_v55 = vcombine.high %v400_v11, %v404_v12  ;;  %v4257_v1 = vcombine.high %v408_v45, %v412_v38 }
 0x11b   :  { %v4259_v6 = vcombine.high %v409_v0, %v413_v46  ;;  %v4263_v11 = vcombine.low %v408_v45, %v412_v38  ;;  %v4265_v12 = vcombine.low %v409_v0, %v413_v46 }
 0x11c   :  { %v4227_v60 = vpack.c.bf16 %v380_v59, %v380_v59  ;;  %5915 = vst [vmem:[#allocation52_spill] sm:$0xff] %v4239_v47  ;;  %5916 = vst [vmem:[#allocation53_spill] sm:$0xff] %v4243_v55  ;;  %v4245_v59 = vcombine.high %v401_v21, %v405_v33 }
 0x11d   :  { %5921 = vst [vmem:[#allocation57_spill] sm:$0xff] %v4257_v1  ;;  %5922 = vst [vmem:[#allocation58_spill] sm:$0xff] %v4259_v6 }
 0x11e   :  { %799 = vmatmul.mubr.bf16.vlgmr.msra.gmra.mrb[16].mxu0 %v4227_v60  ;;  %840 = vmatmul.mubr.bf16.vlgmr.msra.gmra.mrb[16].mxu1 %v4227_v60  ;;  %5917 = vst [vmem:[#allocation54_spill] sm:$0xff] %v4245_v59  ;;  %5923 = vst [vmem:[#allocation59_spill] sm:$0xff] %v4263_v11 }
 0x11f   :  { %849 = vmatpush1.bf16.msra.mxu0 %v4161_v16  ;;  %889 = vmatpush1.bf16.msra.mxu1 %v4167_v24  ;;  %v417_v24 = vld [vmem:[#allocation3 + $0x118] sm:$0xff]  ;;  %5924 = vst [vmem:[#allocation60_spill] sm:$0xff] %v4265_v12 }
 0x120   :  { %850 = vmatprep.subr.bf16.mxu0 %v4229_v8  ;;  %890 = vmatprep.subr.bf16.mxu1 %v4231_v10  ;;  %v416_v10 = vld [vmem:[#allocation3 + $0x110] sm:$0xff] }
 0x121   :  { %880 = vmatprep.mubr.bf16.mxu0 %v5918_v3  ;;  %920 = vmatprep.mubr.bf16.mxu1 %v5918_v3  ;;  %v420_v8 = vld [vmem:[#allocation3 + $0x130] sm:$0xff]  ;;  %v421_v3 = vld [vmem:[#allocation3 + $0x138] sm:$0xff] }
 0x122   :  { %v4269_v21 = vcombine.high %v416_v10, %v420_v8  ;;  %v4271_v33 = vcombine.high %v417_v24, %v421_v3  ;;  %v4275_v38 = vcombine.low %v416_v10, %v420_v8  ;;  %v4277_v0 = vcombine.low %v417_v24, %v421_v3 }
 0x123   :  { %851 = vmatpush1.bf16.msra.mxu0 %v4237_v20  ;;  %891 = vmatpush1.bf16.msra.mxu1 %v4239_v47  ;;  %v425_v47 = vld [vmem:[#allocation3 + $0x158] sm:$0xff] }
 0x124   :  { %852 = vmatprep.subr.bf16.mxu0 %v4243_v55  ;;  %892 = vmatprep.subr.bf16.mxu1 %v4245_v59  ;;  %5925 = vst [vmem:[#allocation61_spill] sm:$0xff] %v4269_v21  ;;  %5926 = vst [vmem:[#allocation62_spill] sm:$0xff] %v4271_v33  ;;  %v424_v59 = vld [vmem:[#allocation3 + $0x150] sm:$0xff]  ;;  %v429_v20 = vld [vmem:[#allocation3 + $0x178] sm:$0xff] }
 0x125   :  { %v428_v55 = vld [vmem:[#allocation3 + $0x170] sm:$0xff]  ;;  %5927 = vst [vmem:[#allocation63_spill] sm:$0xff] %v4275_v38  ;;  %5928 = vst [vmem:[#allocation64_spill] sm:$0xff] %v4277_v0  ;;  %v4283_v46 = vcombine.high %v425_v47, %v429_v20  ;;  %v4289_v24 = vcombine.low %v425_v47, %v429_v20 }
 0x126   :  { %v4281_v45 = vcombine.high %v424_v59, %v428_v55  ;;  %v4287_v8 = vcombine.low %v424_v59, %v428_v55 }
 0x127   :  { %853 = vmatpush1.bf16.msra.mxu0 %v4251_v48  ;;  %893 = vmatpush1.bf16.msra.mxu1 %v4253_v61  ;;  %5930 = vst [vmem:[#allocation66_spill] sm:$0xff] %v4283_v46  ;;  %v433_v61 = vld [vmem:[#allocation3 + $0x198] sm:$0xff]  ;;  %5932 = vst [vmem:[#allocation68_spill] sm:$0xff] %v4289_v24 }
 0x128   :  { %854 = vmatprep.subr.bf16.mxu0 %v4257_v1  ;;  %894 = vmatprep.subr.bf16.mxu1 %v4259_v6  ;;  %5929 = vst [vmem:[#allocation65_spill] sm:$0xff] %v4281_v45  ;;  %v432_v6 = vld [vmem:[#allocation3 + $0x190] sm:$0xff]  ;;  %v437_v48 = vld [vmem:[#allocation3 + $0x1b8] sm:$0xff]  ;;  %5931 = vst [vmem:[#allocation67_spill] sm:$0xff] %v4287_v8 }
 0x129   :  { %v436_v1 = vld [vmem:[#allocation3 + $0x1b0] sm:$0xff]  ;;  %v4295_v3 = vcombine.high %v433_v61, %v437_v48  ;;  %v4301_v20 = vcombine.low %v433_v61, %v437_v48  ;;  %v4351_v61 = vpop.f32.mrb[4].mxu1 }
 0x12a   :  { %v4293_v10 = vcombine.high %v432_v6, %v436_v1  ;;  %v4299_v55 = vcombine.low %v432_v6, %v436_v1  ;;  %5943 = vst [vmem:[#allocation79_spill] sm:$0xff] %v4351_v61  ;;  %v4357_v6 = vpop.f32.mrb[5].mxu1 }
 0x12b   :  { %855 = vmatpush1.bf16.msra.mxu0 %v4263_v11  ;;  %895 = vmatpush1.bf16.msra.mxu1 %v4265_v12  ;;  %5934 = vst [vmem:[#allocation70_spill] sm:$0xff] %v4295_v3  ;;  %v441_v12 = vld [vmem:[#allocation3 + $0x1d8] sm:$0xff]  ;;  %5936 = vst [vmem:[#allocation72_spill] sm:$0xff] %v4301_v20 }
 0x12c   :  { %856 = vmatprep.subr.bf16.mxu0 %v4269_v21  ;;  %896 = vmatprep.subr.bf16.mxu1 %v4271_v33  ;;  %5933 = vst [vmem:[#allocation69_spill] sm:$0xff] %v4293_v10  ;;  %v440_v33 = vld [vmem:[#allocation3 + $0x1d0] sm:$0xff]  ;;  %v445_v11 = vld [vmem:[#allocation3 + $0x1f8] sm:$0xff]  ;;  %5935 = vst [vmem:[#allocation71_spill] sm:$0xff] %v4299_v55 }
 0x12d   :  { %v444_v21 = vld [vmem:[#allocation3 + $0x1f0] sm:$0xff]  ;;  %v4307_v59 = vcombine.high %v441_v12, %v445_v11  ;;  %5945 = vst [vmem:[#allocation81_spill] sm:$0xff] %v4357_v6 }
 0x12e   :  { %v4305_v47 = vcombine.high %v440_v33, %v444_v21 }
 0x12f   :  { %857 = vmatpush1.bf16.msra.mxu0 %v4275_v38  ;;  %897 = vmatpush1.bf16.msra.mxu1 %v4277_v0  ;;  %5938 = vst [vmem:[#allocation74_spill] sm:$0xff] %v4307_v59 }
 0x130   :  { %858 = vmatprep.subr.bf16.mxu0 %v4281_v45  ;;  %898 = vmatprep.subr.bf16.mxu1 %v4283_v46  ;;  %5937 = vst [vmem:[#allocation73_spill] sm:$0xff] %v4305_v47  ;;  %v4311_v46 = vcombine.low %v440_v33, %v444_v21 }
 0x132   :  { %5939 = vst [vmem:[#allocation75_spill] sm:$0xff] %v4311_v46 }
 0x133   :  { %859 = vmatpush1.bf16.msra.mxu0 %v4287_v8  ;;  %899 = vmatpush1.bf16.msra.mxu1 %v4289_v24  ;;  %v4313_v8 = vcombine.low %v441_v12, %v445_v11  ;;  %v4363_v12 = vpop.f32.mrb[6].mxu1 }
 0x134   :  { %860 = vmatprep.subr.bf16.mxu0 %v4293_v10  ;;  %900 = vmatprep.subr.bf16.mxu1 %v4295_v3  ;;  %5947 = vst [vmem:[#allocation83_spill] sm:$0xff] %v4363_v12  ;;  %v4365_v21 = vpop.f32.mrb[7].mxu1 }
 0x135   :  { %5940 = vst [vmem:[#allocation76_spill] sm:$0xff] %v4313_v8  ;;  %5948 = vst [vmem:[#allocation84_spill] sm:$0xff] %v4365_v21 }
 0x137   :  { %861 = vmatpush1.bf16.msra.mxu0 %v4299_v55  ;;  %901 = vmatpush1.bf16.msra.mxu1 %v4301_v20 }
 0x138   :  { %862 = vmatprep.subr.bf16.mxu0 %v4305_v47  ;;  %902 = vmatprep.subr.bf16.mxu1 %v4307_v59 }
 0x13b   :  { %863 = vmatpush1.bf16.msra.mxu0 %v4311_v46  ;;  %903 = vmatpush1.bf16.msra.mxu1 %v4313_v8 }
 0x13c   :  { %1750 = vmatprep.subr.bf16.mxu0 %v4061_v15  ;;  %1791 = vmatprep.subr.bf16.mxu1 %v4067_v19 }
 0x13e   :  { %881 = vmatmul.mubr.bf16.vlgmr.msra.gmra.mrb[20].mxu0 %v4227_v60  ;;  %921 = vmatmul.mubr.bf16.vlgmr.msra.gmra.mrb[20].mxu1 %v4227_v60  ;;  %v4347_v60 = vpop.f32.mrb[4].mxu0 }
 0x13f   :  { %1751 = vmatpush1.bf16.msra.mxu0 %v4063_v17  ;;  %1792 = vmatpush1.bf16.msra.mxu1 %v4065_v18  ;;  %5941 = vst [vmem:[#allocation77_spill] sm:$0xff] %v4347_v60  ;;  %v4349_v48 = vpop.f32.mrb[5].mxu0 }
 0x140   :  { %1752 = vmatprep.subr.bf16.mxu0 %v4073_v23  ;;  %1793 = vmatprep.subr.bf16.mxu1 %v4079_v27  ;;  %5942 = vst [vmem:[#allocation78_spill] sm:$0xff] %v4349_v48  ;;  %v4355_v1 = vpop.f32.mrb[6].mxu0 }
 0x141   :  { %5944 = vst [vmem:[#allocation80_spill] sm:$0xff] %v4355_v1  ;;  %v4361_v11 = vpop.f32.mrb[7].mxu0  ;;  %v4373_v1 = vpop.f32.mrb[8].mxu1 }
 0x142   :  { %5946 = vst [vmem:[#allocation82_spill] sm:$0xff] %v4361_v11  ;;  %v4369_v33 = vpop.f32.mrb[8].mxu0  ;;  %5951 = vst [vmem:[#allocation87_spill] sm:$0xff] %v4373_v1  ;;  %v4377_v61 = vpop.f32.mrb[9].mxu1 }
 0x143   :  { %1753 = vmatpush1.bf16.msra.mxu0 %v4075_v25  ;;  %1794 = vmatpush1.bf16.msra.mxu1 %v4077_v26  ;;  %5949 = vst [vmem:[#allocation85_spill] sm:$0xff] %v4369_v33  ;;  %v4371_v48 = vpop.f32.mrb[9].mxu0  ;;  %5953 = vst [vmem:[#allocation89_spill] sm:$0xff] %v4377_v61  ;;  %v4381_v11 = vpop.f32.mrb[10].mxu1 }
 0x144   :  { %1754 = vmatprep.subr.bf16.mxu0 %v4089_v32  ;;  %1795 = vmatprep.subr.bf16.mxu1 %v4095_v36  ;;  %5950 = vst [vmem:[#allocation86_spill] sm:$0xff] %v4371_v48  ;;  %v4375_v6 = vpop.f32.mrb[10].mxu0  ;;  %5955 = vst [vmem:[#allocation91_spill] sm:$0xff] %v4381_v11  ;;  %v4383_v12 = vpop.f32.mrb[11].mxu1  ;;  %v1050_v11 = vld [vmem:[#allocation3 + $0x220] sm:$0xff] }
 0x145   :  { %5952 = vst [vmem:[#allocation88_spill] sm:$0xff] %v4375_v6  ;;  %v4379_v60 = vpop.f32.mrb[11].mxu0  ;;  %5956 = vst [vmem:[#allocation92_spill] sm:$0xff] %v4383_v12  ;;  %v4391_v33 = vpop.f32.mrb[12].mxu1 }
 0x146   :  { %5954 = vst [vmem:[#allocation90_spill] sm:$0xff] %v4379_v60  ;;  %v4385_v21 = vpop.f32.mrb[12].mxu0  ;;  %5960 = vst [vmem:[#allocation96_spill] sm:$0xff] %v4391_v33  ;;  %v4395_v1 = vpop.f32.mrb[13].mxu1  ;;  %v1046_v60 = vld [vmem:[#allocation3 + $0x200] sm:$0xff]  ;;  %v1059_v33 = vld [vmem:[#allocation3 + $0x268] sm:$0xff] }
 0x147   :  { %1755 = vmatpush1.bf16.msra.mxu0 %v4091_v34  ;;  %1796 = vmatpush1.bf16.msra.mxu1 %v4093_v35  ;;  %5957 = vst [vmem:[#allocation93_spill] sm:$0xff] %v4385_v21  ;;  %5962 = vst [vmem:[#allocation98_spill] sm:$0xff] %v4395_v1  ;;  %v4397_v6 = vpop.f32.mrb[14].mxu1  ;;  %v4401_v12 = vcombine.high %v1046_v60, %v1050_v11  ;;  %v1051_v21 = vld [vmem:[#allocation3 + $0x228] sm:$0xff] }
 0x148   :  { %1756 = vmatprep.subr.bf16.mxu0 %v4104_v40  ;;  %1797 = vmatprep.subr.bf16.mxu1 %v4110_v44  ;;  %5963 = vst [vmem:[#allocation99_spill] sm:$0xff] %v4397_v6  ;;  %v4399_v61 = vpop.f32.mrb[15].mxu1  ;;  %v1055_v6 = vld [vmem:[#allocation3 + $0x248] sm:$0xff] }
 0x149   :  { %5964 = vst [vmem:[#allocation100_spill] sm:$0xff] %v4399_v61  ;;  %5965 = vst [vmem:[#allocation101_spill] sm:$0xff] %v4401_v12  ;;  %v1058_v61 = vld [vmem:[#allocation3 + $0x260] sm:$0xff] }
 0x14b   :  { %1757 = vmatpush1.bf16.msra.mxu0 %v4106_v42  ;;  %1798 = vmatpush1.bf16.msra.mxu1 %v4108_v43 }
 0x14c   :  { %1758 = vmatprep.subr.bf16.mxu0 %v4120_v49  ;;  %1799 = vmatprep.subr.bf16.mxu1 %v4126_v53 }
 0x14f   :  { %1759 = vmatpush1.bf16.msra.mxu0 %v4122_v51  ;;  %1800 = vmatpush1.bf16.msra.mxu1 %v4124_v52 }
 0x150   :  { %1760 = vmatprep.subr.bf16.mxu0 %v4137_v58  ;;  %1801 = vmatprep.subr.bf16.mxu1 %v4144_v63 }
 0x153   :  { %1761 = vmatpush1.bf16.msra.mxu0 %v4135_v57  ;;  %1802 = vmatpush1.bf16.msra.mxu1 %v4142_v62  ;;  %v1107_v62 = vld [vmem:[#allocation3 + $0x3e8] sm:$0xff] }
 0x154   :  { %1762 = vmatprep.subr.bf16.mxu0 %v4147_v4  ;;  %1803 = vmatprep.subr.bf16.mxu1 %v4149_v5  ;;  %v1103_v4 = vld [vmem:[#allocation3 + $0x3c8] sm:$0xff] }
 0x157   :  { %1763 = vmatpush1.bf16.msra.mxu0 %v4153_v9  ;;  %1804 = vmatpush1.bf16.msra.mxu1 %v4157_v13  ;;  %v4415_v13 = vcombine.high %v1055_v6, %v1059_v33  ;;  %v1102_v9 = vld [vmem:[#allocation3 + $0x3c0] sm:$0xff] }
 0x158   :  { %1764 = vmatprep.subr.bf16.mxu0 %v4159_v14  ;;  %1805 = vmatprep.subr.bf16.mxu1 %v4165_v22  ;;  %v1047_v22 = vld [vmem:[#allocation3 + $0x208] sm:$0xff] }
 0x159   :  { %v4403_v14 = vcombine.high %v1047_v22, %v1051_v21  ;;  %5970 = vst [vmem:[#allocation106_spill] sm:$0xff] %v4415_v13 }
 0x15b   :  { %1765 = vmatpush1.bf16.msra.mxu0 %v4172_v28  ;;  %1806 = vmatpush1.bf16.msra.mxu1 %v4177_v29  ;;  %v4387_v28 = vpop.f32.mrb[13].mxu0  ;;  %5966 = vst [vmem:[#allocation102_spill] sm:$0xff] %v4403_v14 }
 0x15c   :  { %5958 = vst [vmem:[#allocation94_spill] sm:$0xff] %v4387_v28  ;;  %v4389_v29 = vpop.f32.mrb[14].mxu0  ;;  %v4405_v28 = vcombine.low %v1046_v60, %v1050_v11  ;;  %1766 = vmatprep.subr.bf16.mxu0 %v4401_v12  ;;  %1807 = vmatprep.subr.bf16.mxu1 %v4403_v14  ;;  %v1062_v11 = vld [vmem:[#allocation3 + $0x280] sm:$0xff]  ;;  %v1067_v14 = vld [vmem:[#allocation3 + $0x2a8] sm:$0xff] }
 0x15d   :  { %5959 = vst [vmem:[#allocation95_spill] sm:$0xff] %v4389_v29  ;;  %v4393_v48 = vpop.f32.mrb[15].mxu0  ;;  %v4407_v29 = vcombine.low %v1047_v22, %v1051_v21  ;;  %v4419_v22 = vcombine.low %v1055_v6, %v1059_v33  ;;  %v1066_v21 = vld [vmem:[#allocation3 + $0x2a0] sm:$0xff] }
 0x15e   :  { %5961 = vst [vmem:[#allocation97_spill] sm:$0xff] %v4393_v48  ;;  %5967 = vst [vmem:[#allocation103_spill] sm:$0xff] %v4405_v28  ;;  %v1054_v48 = vld [vmem:[#allocation3 + $0x240] sm:$0xff] }
 0x15f   :  { %5968 = vst [vmem:[#allocation104_spill] sm:$0xff] %v4407_v29  ;;  %1767 = vmatpush1.bf16.msra.mxu0 %v4405_v28  ;;  %1808 = vmatpush1.bf16.msra.mxu1 %v4407_v29  ;;  %v4413_v1 = vcombine.high %v1054_v48, %v1058_v61  ;;  %v4417_v60 = vcombine.low %v1054_v48, %v1058_v61  ;;  %5972 = vst [vmem:[#allocation108_spill] sm:$0xff] %v4419_v22  ;;  %v1063_v28 = vld [vmem:[#allocation3 + $0x288] sm:$0xff]  ;;  %v1070_v6 = vld [vmem:[#allocation3 + $0x2c0] sm:$0xff] }
 0x160   :  { %1809 = vmatprep.subr.bf16.mxu1 %v4415_v13  ;;  %v4425_v29 = vcombine.high %v1062_v11, %v1066_v21  ;;  %v4427_v12 = vcombine.high %v1063_v28, %v1067_v14  ;;  %v4429_v48 = vcombine.low %v1062_v11, %v1066_v21  ;;  %v4431_v61 = vcombine.low %v1063_v28, %v1067_v14  ;;  %v1074_v33 = vld [vmem:[#allocation3 + $0x2e0] sm:$0xff]  ;;  %v1075_v13 = vld [vmem:[#allocation3 + $0x2e8] sm:$0xff] }
 0x161   :  { %5969 = vst [vmem:[#allocation105_spill] sm:$0xff] %v4413_v1  ;;  %5971 = vst [vmem:[#allocation107_spill] sm:$0xff] %v4417_v60  ;;  %1768 = vmatprep.subr.bf16.mxu0 %v4413_v1  ;;  %v4441_v11 = vcombine.low %v1070_v6, %v1074_v33  ;;  %v1078_v28 = vld [vmem:[#allocation3 + $0x300] sm:$0xff] }
 0x162   :  { %5973 = vst [vmem:[#allocation109_spill] sm:$0xff] %v4425_v29  ;;  %5974 = vst [vmem:[#allocation110_spill] sm:$0xff] %v4427_v12  ;;  %v1082_v21 = vld [vmem:[#allocation3 + $0x320] sm:$0xff] }
 0x163   :  { %1769 = vmatpush1.bf16.msra.mxu0 %v4417_v60  ;;  %1810 = vmatpush1.bf16.msra.mxu1 %v4419_v22  ;;  %5975 = vst [vmem:[#allocation111_spill] sm:$0xff] %v4429_v48  ;;  %5976 = vst [vmem:[#allocation112_spill] sm:$0xff] %v4431_v61  ;;  %v1071_v60 = vld [vmem:[#allocation3 + $0x2c8] sm:$0xff]  ;;  %v4437_v22 = vcombine.high %v1070_v6, %v1074_v33  ;;  %v4453_v6 = vcombine.low %v1078_v28, %v1082_v21  ;;  %v1090_v33 = vld [vmem:[#allocation3 + $0x360] sm:$0xff] }
 0x164   :  { %1770 = vmatprep.subr.bf16.mxu0 %v4425_v29  ;;  %1811 = vmatprep.subr.bf16.mxu1 %v4427_v12  ;;  %v4439_v1 = vcombine.high %v1071_v60, %v1075_v13  ;;  %5979 = vst [vmem:[#allocation115_spill] sm:$0xff] %v4441_v11  ;;  %v4443_v14 = vcombine.low %v1071_v60, %v1075_v13  ;;  %v1083_v12 = vld [vmem:[#allocation3 + $0x328] sm:$0xff]  ;;  %v1086_v60 = vld [vmem:[#allocation3 + $0x340] sm:$0xff] }
 0x165   :  { %5977 = vst [vmem:[#allocation113_spill] sm:$0xff] %v4437_v22  ;;  %5983 = vst [vmem:[#allocation119_spill] sm:$0xff] %v4453_v6 }
 0x166   :  { %5978 = vst [vmem:[#allocation114_spill] sm:$0xff] %v4439_v1  ;;  %5980 = vst [vmem:[#allocation116_spill] sm:$0xff] %v4443_v14 }
 0x167   :  { %1771 = vmatpush1.bf16.msra.mxu0 %v4429_v48  ;;  %1812 = vmatpush1.bf16.msra.mxu1 %v4431_v61  ;;  %v1079_v48 = vld [vmem:[#allocation3 + $0x308] sm:$0xff]  ;;  %v4449_v61 = vcombine.high %v1078_v28, %v1082_v21  ;;  %v1094_v28 = vld [vmem:[#allocation3 + $0x380] sm:$0xff] }
 0x168   :  { %1772 = vmatprep.subr.bf16.mxu0 %v4437_v22  ;;  %1813 = vmatprep.subr.bf16.mxu1 %v4439_v1  ;;  %v4451_v29 = vcombine.high %v1079_v48, %v1083_v12  ;;  %v4455_v13 = vcombine.low %v1079_v48, %v1083_v12  ;;  %v1091_v1 = vld [vmem:[#allocation3 + $0x368] sm:$0xff]  ;;  %v4463_v22 = vcombine.low %v1086_v60, %v1090_v33  ;;  %v1098_v21 = vld [vmem:[#allocation3 + $0x3a0] sm:$0xff] }
 0x169   :  { %5981 = vst [vmem:[#allocation117_spill] sm:$0xff] %v4449_v61 }
 0x16a   :  { %5982 = vst [vmem:[#allocation118_spill] sm:$0xff] %v4451_v29  ;;  %5984 = vst [vmem:[#allocation120_spill] sm:$0xff] %v4455_v13 }
 0x16b   :  { %1773 = vmatpush1.bf16.msra.mxu0 %v4441_v11  ;;  %1814 = vmatpush1.bf16.msra.mxu1 %v4443_v14  ;;  %v1087_v11 = vld [vmem:[#allocation3 + $0x348] sm:$0xff]  ;;  %v4461_v14 = vcombine.high %v1086_v60, %v1090_v33  ;;  %5986 = vst [vmem:[#allocation122_spill] sm:$0xff] %v4463_v22  ;;  %v4476_v60 = vcombine.low %v1094_v28, %v1098_v21 }
 0x16c   :  { %1774 = vmatprep.subr.bf16.mxu0 %v4449_v61  ;;  %1815 = vmatprep.subr.bf16.mxu1 %v4451_v29  ;;  %v4465_v12 = vcombine.high %v1087_v11, %v1091_v1  ;;  %v4467_v48 = vcombine.low %v1087_v11, %v1091_v1  ;;  %v4469_v61 = vcombine.high %v1094_v28, %v1098_v21  ;;  %v1095_v29 = vld [vmem:[#allocation3 + $0x388] sm:$0xff] }
 0x16d   :  { %5985 = vst [vmem:[#allocation121_spill] sm:$0xff] %v4461_v14  ;;  %5991 = vst [vmem:[#allocation127_spill] sm:$0xff] %v4476_v60  ;;  %v4485_v33 = vcombine.high %v1103_v4, %v1107_v62  ;;  %v4492_v28 = vcombine.low %v1103_v4, %v1107_v62  ;;  %v201_v62 = vadd.f32 %v4203_v50, %v4199_v41 }
 0x16e   :  { %5987 = vst [vmem:[#allocation123_spill] sm:$0xff] %v4465_v12  ;;  %5988 = vst [vmem:[#allocation124_spill] sm:$0xff] %v4467_v48  ;;  %v274_v4 = vadd.f32 %v4214_v2, %v4221_v7 }
 0x16f   :  { %1775 = vmatpush1.bf16.msra.mxu0 %v4453_v6  ;;  %1816 = vmatpush1.bf16.msra.mxu1 %v4455_v13  ;;  %5989 = vst [vmem:[#allocation125_spill] sm:$0xff] %v4469_v61  ;;  %v1099_v6 = vld [vmem:[#allocation3 + $0x3a8] sm:$0xff]  ;;  %v1106_v13 = vld [vmem:[#allocation3 + $0x3e0] sm:$0xff]  ;;  %5994 = vst [vmem:[#allocation130_spill] sm:$0xff] %v4485_v33 }
 0x170   :  { %1776 = vmatprep.subr.bf16.mxu0 %v4461_v14  ;;  %v4472_v5 = vcombine.high %v1095_v29, %v1099_v6  ;;  %1817 = vmatprep.subr.bf16.mxu1 %v4465_v12  ;;  %v4480_v1 = vcombine.low %v1095_v29, %v1099_v6  ;;  %v4482_v11 = vcombine.high %v1102_v9, %v1106_v13  ;;  %v5695_v29 = vsub.s32 1, %v4188_v37 }
 0x171   :  { %v4488_v14 = vcombine.low %v1102_v9, %v1106_v13  ;;  %5996 = vst [vmem:[#allocation132_spill] sm:$0xff] %v4492_v28  ;;  %v5998_v13 = vld [vmem:[#allocation46_spill] sm:$0xff] }
 0x172   :  { %5990 = vst [vmem:[#allocation126_spill] sm:$0xff] %v4472_v5  ;;  %5992 = vst [vmem:[#allocation128_spill] sm:$0xff] %v4480_v1  ;;  %v4503_v9 = vrot.slane %v4194_v39, %v5695_v29  ;;  %v276_v21 = vadd.f32 %v5998_v13, %v4208_v54 }
 0x173   :  { %1777 = vmatpush1.bf16.msra.mxu0 %v4463_v22  ;;  %1818 = vmatpush1.bf16.msra.mxu1 %v4467_v48  ;;  %5993 = vst [vmem:[#allocation129_spill] sm:$0xff] %v4482_v11  ;;  %5995 = vst [vmem:[#allocation131_spill] sm:$0xff] %v4488_v14 }
 0x174   :  { %1778 = vmatprep.subr.bf16.mxu0 %v4469_v61  ;;  %1819 = vmatprep.subr.bf16.mxu1 %v4472_v5  ;;  %5997 = vst [vmem:[#allocation133_spill] sm:$0xff] %v4503_v9  ;;  %v203_v6 = vadd.f32 %v4210_v56, %v4503_v9 }
 0x177   :  { %1779 = vmatpush1.bf16.msra.mxu0 %v4476_v60  ;;  %1820 = vmatpush1.bf16.msra.mxu1 %v4480_v1 }
 0x178   :  { %1780 = vmatprep.subr.bf16.mxu0 %v4482_v11  ;;  %1821 = vmatprep.subr.bf16.mxu1 %v4485_v33 }
 0x17b   :  { %1781 = vmatpush1.bf16.msra.mxu0 %v4488_v14  ;;  %1822 = vmatpush1.bf16.msra.mxu1 %v4492_v28 }
 0x17c   :  { %1832 = vmatprep.subr.bf16.mxu0 %v4179_v30  ;;  %1873 = vmatprep.subr.bf16.mxu1 %v4182_v31 }
 0x1f1   :  { %v800_v31 = vpop.f32.mrb[16].mxu0  ;;  %v841_v30 = vpop.f32.mrb[16].mxu1 }
 0x1f2   :  { %v952_v28 = vadd.f32 %v800_v31, %v201_v62  ;;  %v954_v14 = vadd.f32 %v841_v30, %v274_v4  ;;  %v802_v33 = vpop.f32.mrb[17].mxu0  ;;  %v843_v11 = vpop.f32.mrb[17].mxu1  ;;  %v4516_v30 = vld [vmem:[%s5579_s4] sm:$0xf] }
 0x1f3   :  { %v953_v39 = vadd.f32 %v802_v33, %v203_v6  ;;  %v955_v29 = vadd.f32 %v843_v11, %v276_v21  ;;  %v804_v1 = vpop.f32.mrb[18].mxu0  ;;  %v845_v60 = vpop.f32.mrb[18].mxu1  ;;  %v6001_v33 = vld [vmem:[#allocation48_spill] sm:$0xff]  ;;  %v6002_v6 = vsub.s32 3, %v4188_v37 }
 0x1f4   :  { %v3430_v50 = vmul.f32 -1.442695, %v952_v28  ;;  %v805_v41 = vpop.f32.mrb[19].mxu0  ;;  %v846_v5 = vpop.f32.mrb[19].mxu1 }
 0x1f5   :  { %v3432_v2 = vmul.f32 -1.442695, %v953_v39  ;;  %v5999_v5 = vsub.s32 0, %v4188_v37  ;;  %v4530_v21 = vrot.slane %v4516_v30, %v6002_v6 }
 0x1f6   :  { %3681 = vpow2.f32 %v3430_v50 }
 0x1f7   :  { %3683 = vpow2.f32 %v3432_v2  ;;  %v4521_v11 = vrot.slane %v4516_v30, %v5999_v5  ;;  %6003 = vst [vmem:[#allocation48_spill] sm:$0xff] %v4530_v21 }
 0x1f8   :  { %3685 = vtanh.f32 %v954_v14 }
 0x1f9   :  { %6000 = vst [vmem:[#allocation46_spill] sm:$0xff] %v4521_v11 }
 0x200   :  { %v3682_v56 = vpop.eup %3681 }
 0x201   :  { %v3684_v9 = vpop.eup %3683  ;;  %v959_v7 = vadd.f32 1.0, %v3682_v56 }
 0x202   :  { %v972_v13 = vadd.f32 1.0, %v3684_v9  ;;  %v3686_v31 = vpop.eup %3685 }
 0x203   :  { %3687 = vrcp.f32 %v959_v7 }
 0x204   :  { %3689 = vrcp.f32 %v972_v13 }
 0x20d   :  { %v3688_v60 = vpop.eup %3687 }
 0x20e   :  { %v3690_v1 = vpop.eup %3689  ;;  %v976_v41 = vmul.f32 %v3688_v60, %v3686_v31 }
 0x20f   :  { %v975_v28 = vmul.f32 %v3690_v1, %v6001_v33  ;;  %v3431_v1 = vmul.f32 -1.442695, %v955_v29 }
 0x211   :  { %v4524_v14 = vadd.f32 %v976_v41, %v975_v28  ;;  %v882_v7 = vpop.f32.mrb[20].mxu0  ;;  %v922_v9 = vpop.f32.mrb[20].mxu1  ;;  %v6004_v41 = vsub.s32 2, %v4188_v37 }
 0x212   :  { %v929_v62 = vadd.f32 %v882_v7, %v4521_v11  ;;  %v884_v4 = vpop.f32.mrb[21].mxu0  ;;  %v924_v39 = vpop.f32.mrb[21].mxu1 }
 0x213   :  { %v885_v50 = vpop.f32.mrb[22].mxu0  ;;  %v926_v2 = vpop.f32.mrb[22].mxu1  ;;  %v931_v60 = vadd.f32 %v924_v39, %v4530_v21  ;;  %v4536_v5 = vrot.slane %v4516_v30, %v6004_v41 }
 0x214   :  { %v3428_v56 = vmul.f32 -1.442695, %v929_v62  ;;  %v886_v13 = vpop.f32.mrb[23].mxu0  ;;  %v927_v31 = vpop.f32.mrb[23].mxu1 }
 0x215   :  { %6005 = vst [vmem:[#allocation134_spill] sm:$0xff] %v4536_v5  ;;  %v3429_v33 = vmul.f32 -1.442695, %v931_v60  ;;  %v930_v28 = vadd.f32 %v922_v9, %v4536_v5 }
 0x216   :  { %3691 = vpow2.f32 %v3428_v56 }
 0x217   :  { %3693 = vpow2.f32 %v3431_v1 }
 0x218   :  { %3695 = vpow2.f32 %v3429_v33 }
 0x219   :  { %3697 = vtanh.f32 %v930_v28 }
 0x220   :  { %v3692_v7 = vpop.eup %3691 }
 0x221   :  { %v935_v4 = vadd.f32 1.0, %v3692_v7  ;;  %v3694_v62 = vpop.eup %3693  ;;  %v6006_v7 = vld [vmem:[#allocation39_spill] sm:$0xff] }
 0x222   :  { %v3696_v6 = vpop.eup %3695  ;;  %v966_v50 = vadd.f32 1.0, %v3694_v62  ;;  %v6008_v62 = vld [vmem:[#allocation50_spill] sm:$0xff] }
 0x223   :  { %3699 = vrcp.f32 %v935_v4  ;;  %v942_v2 = vadd.f32 1.0, %v3696_v6  ;;  %v3698_v39 = vpop.eup %3697  ;;  %v6007_v4 = vld [vmem:[#allocation49_spill] sm:$0xff]  ;;  %v6009_v6 = vld [vmem:[#allocation51_spill] sm:$0xff] }
 0x224   :  { %3701 = vtanh.f32 %v4524_v14 }
 0x225   :  { %3703 = vrcp.f32 %v966_v50  ;;  %v6010_v50 = vld [vmem:[#allocation52_spill] sm:$0xff] }
 0x226   :  { %3705 = vrcp.f32 %v942_v2  ;;  %v6011_v2 = vld [vmem:[#allocation53_spill] sm:$0xff] }
 0x22d   :  { %v3700_v29 = vpop.eup %3699 }
 0x22e   :  { %v4540_v56 = vmul.f32 %v3700_v29, %v3698_v39  ;;  %v3702_v9 = vpop.eup %3701  ;;  %v6012_v39 = vld [vmem:[#allocation54_spill] sm:$0xff]  ;;  %v6013_v29 = vld [vmem:[#allocation55_spill] sm:$0xff] }
 0x22f   :  { %v3704_v13 = vpop.eup %3703 }
 0x230   :  { %3707 = vtanh.f32 %v4540_v56  ;;  %v3706_v31 = vpop.eup %3705  ;;  %v979_v1 = vmul.f32 %v3704_v13, %v3702_v9  ;;  %v6014_v9 = vld [vmem:[#allocation56_spill] sm:$0xff]  ;;  %v6015_v13 = vld [vmem:[#allocation57_spill] sm:$0xff] }
 0x232   :  { %v4543_v28 = vpack.c.bf16 %v979_v1, %v979_v1  ;;  %v6018_v1 = vld [vmem:[#allocation60_spill] sm:$0xff] }
 0x23a   :  { %v3708_v60 = vpop.eup %3707 }
 0x23b   :  { %v947_v41 = vmul.f32 %v3708_v60, %v3706_v31  ;;  %v6016_v31 = vld [vmem:[#allocation58_spill] sm:$0xff]  ;;  %v6017_v60 = vld [vmem:[#allocation59_spill] sm:$0xff] }
 0x23d   :  { %v981_v33 = vpack.c.bf16 %v947_v41, %v947_v41  ;;  %v6019_v41 = vld [vmem:[#allocation61_spill] sm:$0xff] }
 0x23f   :  { %1782 = vmatprep.mubr.bf16.mxu0 %v981_v33  ;;  %1823 = vmatprep.mubr.bf16.mxu1 %v981_v33 }
 0x240   :  { %1783 = vmatmul.mubr.bf16.vlgmr.msra.gmra.mrb[24].mxu0 %v4543_v28  ;;  %1824 = vmatmul.mubr.bf16.vlgmr.msra.gmra.mrb[24].mxu1 %v4543_v28 }
 0x241   :  { %1833 = vmatpush1.bf16.msra.mxu0 %v4161_v16  ;;  %1874 = vmatpush1.bf16.msra.mxu1 %v6006_v7 }
 0x242   :  { %1864 = vmatprep.mubr.bf16.mxu0 %v981_v33  ;;  %1905 = vmatprep.mubr.bf16.mxu1 %v981_v33  ;;  %v6020_v33 = vld [vmem:[#allocation62_spill] sm:$0xff] }
 0x243   :  { %1834 = vmatprep.subr.bf16.mxu0 %v6007_v4  ;;  %1875 = vmatprep.subr.bf16.mxu1 %v6008_v62 }
 0x245   :  { %1835 = vmatpush1.bf16.msra.mxu0 %v6009_v6  ;;  %1876 = vmatpush1.bf16.msra.mxu1 %v6010_v50 }
 0x246   :  { %1836 = vmatprep.subr.bf16.mxu0 %v6011_v2  ;;  %1877 = vmatprep.subr.bf16.mxu1 %v6012_v39 }
 0x249   :  { %1837 = vmatpush1.bf16.msra.mxu0 %v6013_v29  ;;  %1878 = vmatpush1.bf16.msra.mxu1 %v6014_v9  ;;  %v6021_v29 = vld [vmem:[#allocation66_spill] sm:$0xff]  ;;  %v6022_v9 = vld [vmem:[#allocation67_spill] sm:$0xff] }
 0x24a   :  { %1838 = vmatprep.subr.bf16.mxu0 %v6015_v13  ;;  %1879 = vmatprep.subr.bf16.mxu1 %v6016_v31  ;;  %v1065_v31 = vld [vmem:[#allocation3 + $0x298] sm:$0xff] }
 0x24b   :  { %v1069_v13 = vld [vmem:[#allocation3 + $0x2b8] sm:$0xff] }
 0x24d   :  { %1839 = vmatpush1.bf16.msra.mxu0 %v6017_v60  ;;  %1880 = vmatpush1.bf16.msra.mxu1 %v6018_v1  ;;  %v1048_v1 = vld [vmem:[#allocation3 + $0x210] sm:$0xff]  ;;  %v1049_v60 = vld [vmem:[#allocation3 + $0x218] sm:$0xff] }
 0x24e   :  { %1840 = vmatprep.subr.bf16.mxu0 %v6019_v41  ;;  %1881 = vmatprep.subr.bf16.mxu1 %v6020_v33  ;;  %v1052_v41 = vld [vmem:[#allocation3 + $0x230] sm:$0xff]  ;;  %v1053_v33 = vld [vmem:[#allocation3 + $0x238] sm:$0xff] }
 0x251   :  { %1841 = vmatpush1.bf16.msra.mxu0 %v4275_v38  ;;  %1882 = vmatpush1.bf16.msra.mxu1 %v4277_v0  ;;  %v4581_v0 = vcombine.low %v1048_v1, %v1052_v41  ;;  %v1068_v38 = vld [vmem:[#allocation3 + $0x2b0] sm:$0xff] }
 0x252   :  { %1842 = vmatprep.subr.bf16.mxu0 %v4281_v45  ;;  %1883 = vmatprep.subr.bf16.mxu1 %v6021_v29  ;;  %v4575_v29 = vcombine.high %v1048_v1, %v1052_v41  ;;  %v1057_v45 = vld [vmem:[#allocation3 + $0x258] sm:$0xff] }
 0x253   :  { %6025 = vst [vmem:[#allocation50_spill] sm:$0xff] %v4581_v0 }
 0x254   :  { %6023 = vst [vmem:[#allocation39_spill] sm:$0xff] %v4575_v29 }
 0x255   :  { %1843 = vmatpush1.bf16.msra.mxu0 %v6022_v9  ;;  %1884 = vmatpush1.bf16.msra.mxu1 %v4289_v24  ;;  %v4577_v9 = vcombine.high %v1049_v60, %v1053_v33  ;;  %v1056_v24 = vld [vmem:[#allocation3 + $0x250] sm:$0xff] }
 0x256   :  { %1844 = vmatprep.subr.bf16.mxu0 %v4293_v10  ;;  %1885 = vmatprep.subr.bf16.mxu1 %v4295_v3  ;;  %v1060_v10 = vld [vmem:[#allocation3 + $0x270] sm:$0xff]  ;;  %v1061_v3 = vld [vmem:[#allocation3 + $0x278] sm:$0xff] }
 0x257   :  { %6024 = vst [vmem:[#allocation49_spill] sm:$0xff] %v4577_v9  ;;  %v4593_v1 = vcombine.low %v1056_v24, %v1060_v10 }
 0x259   :  { %1845 = vmatpush1.bf16.msra.mxu0 %v4299_v55  ;;  %1886 = vmatpush1.bf16.msra.mxu1 %v4301_v20  ;;  %v4583_v55 = vcombine.low %v1049_v60, %v1053_v33  ;;  %v1064_v20 = vld [vmem:[#allocation3 + $0x290] sm:$0xff]  ;;  %6029 = vst [vmem:[#allocation54_spill] sm:$0xff] %v4593_v1  ;;  %v4595_v60 = vcombine.low %v1057_v45, %v1061_v3 }
 0x25a   :  { %1846 = vmatprep.subr.bf16.mxu0 %v4305_v47  ;;  %1887 = vmatprep.subr.bf16.mxu1 %v4307_v59  ;;  %v4587_v59 = vcombine.high %v1056_v24, %v1060_v10  ;;  %v4589_v47 = vcombine.high %v1057_v45, %v1061_v3  ;;  %v4599_v41 = vcombine.high %v1064_v20, %v1068_v38 }
 0x25b   :  { %6026 = vst [vmem:[#allocation51_spill] sm:$0xff] %v4583_v55  ;;  %6030 = vst [vmem:[#allocation135_spill] sm:$0xff] %v4595_v60  ;;  %v4601_v33 = vcombine.high %v1065_v31, %v1069_v13  ;;  %v4605_v24 = vcombine.low %v1064_v20, %v1068_v38  ;;  %v4607_v45 = vcombine.low %v1065_v31, %v1069_v13 }
 0x25c   :  { %6027 = vst [vmem:[#allocation52_spill] sm:$0xff] %v4587_v59  ;;  %6028 = vst [vmem:[#allocation53_spill] sm:$0xff] %v4589_v47 }
 0x25d   :  { %1847 = vmatpush1.bf16.msra.mxu0 %v4311_v46  ;;  %1888 = vmatpush1.bf16.msra.mxu1 %v4313_v8  ;;  %6031 = vst [vmem:[#allocation136_spill] sm:$0xff] %v4599_v41  ;;  %6032 = vst [vmem:[#allocation137_spill] sm:$0xff] %v4601_v33  ;;  %v1073_v8 = vld [vmem:[#allocation3 + $0x2d8] sm:$0xff] }
 0x25e   :  { %1848 = vmatprep.subr.bf16.mxu0 %v4575_v29  ;;  %1889 = vmatprep.subr.bf16.mxu1 %v4577_v9  ;;  %v1072_v9 = vld [vmem:[#allocation3 + $0x2d0] sm:$0xff]  ;;  %v1077_v46 = vld [vmem:[#allocation3 + $0x2f8] sm:$0xff]  ;;  %6033 = vst [vmem:[#allocation138_spill] sm:$0xff] %v4605_v24  ;;  %6034 = vst [vmem:[#allocation139_spill] sm:$0xff] %v4607_v45 }
 0x25f   :  { %v1076_v29 = vld [vmem:[#allocation3 + $0x2f0] sm:$0xff]  ;;  %v4613_v3 = vcombine.high %v1073_v8, %v1077_v46  ;;  %v4619_v20 = vcombine.low %v1073_v8, %v1077_v46 }
 0x260   :  { %v4611_v10 = vcombine.high %v1072_v9, %v1076_v29  ;;  %v4617_v38 = vcombine.low %v1072_v9, %v1076_v29 }
 0x261   :  { %1849 = vmatpush1.bf16.msra.mxu0 %v4581_v0  ;;  %1890 = vmatpush1.bf16.msra.mxu1 %v4583_v55  ;;  %6036 = vst [vmem:[#allocation141_spill] sm:$0xff] %v4613_v3  ;;  %v1081_v55 = vld [vmem:[#allocation3 + $0x318] sm:$0xff]  ;;  %6038 = vst [vmem:[#allocation143_spill] sm:$0xff] %v4619_v20 }
 0x262   :  { %1850 = vmatprep.subr.bf16.mxu0 %v4587_v59  ;;  %1891 = vmatprep.subr.bf16.mxu1 %v4589_v47  ;;  %6035 = vst [vmem:[#allocation140_spill] sm:$0xff] %v4611_v10  ;;  %v1080_v47 = vld [vmem:[#allocation3 + $0x310] sm:$0xff]  ;;  %v1085_v0 = vld [vmem:[#allocation3 + $0x338] sm:$0xff]  ;;  %6037 = vst [vmem:[#allocation142_spill] sm:$0xff] %v4617_v38 }
 0x263   :  { %v1084_v59 = vld [vmem:[#allocation3 + $0x330] sm:$0xff]  ;;  %v4625_v31 = vcombine.high %v1081_v55, %v1085_v0  ;;  %v4631_v46 = vcombine.low %v1081_v55, %v1085_v0 }
 0x264   :  { %v4623_v13 = vcombine.high %v1080_v47, %v1084_v59  ;;  %v4629_v29 = vcombine.low %v1080_v47, %v1084_v59 }
 0x265   :  { %1851 = vmatpush1.bf16.msra.mxu0 %v4593_v1  ;;  %1892 = vmatpush1.bf16.msra.mxu1 %v4595_v60  ;;  %6040 = vst [vmem:[#allocation145_spill] sm:$0xff] %v4625_v31  ;;  %v1089_v60 = vld [vmem:[#allocation3 + $0x358] sm:$0xff]  ;;  %6042 = vst [vmem:[#allocation147_spill] sm:$0xff] %v4631_v46 }
 0x266   :  { %1852 = vmatprep.subr.bf16.mxu0 %v4599_v41  ;;  %1893 = vmatprep.subr.bf16.mxu1 %v4601_v33  ;;  %6039 = vst [vmem:[#allocation144_spill] sm:$0xff] %v4623_v13  ;;  %v1088_v33 = vld [vmem:[#allocation3 + $0x350] sm:$0xff]  ;;  %v1093_v1 = vld [vmem:[#allocation3 + $0x378] sm:$0xff]  ;;  %6041 = vst [vmem:[#allocation146_spill] sm:$0xff] %v4629_v29 }
 0x267   :  { %v1092_v41 = vld [vmem:[#allocation3 + $0x370] sm:$0xff]  ;;  %v4637_v9 = vcombine.high %v1089_v60, %v1093_v1  ;;  %v4643_v0 = vcombine.low %v1089_v60, %v1093_v1 }
 0x268   :  { %v4635_v8 = vcombine.high %v1088_v33, %v1092_v41  ;;  %v4641_v47 = vcombine.low %v1088_v33, %v1092_v41 }
 0x269   :  { %1853 = vmatpush1.bf16.msra.mxu0 %v4605_v24  ;;  %1894 = vmatpush1.bf16.msra.mxu1 %v4607_v45  ;;  %6044 = vst [vmem:[#allocation149_spill] sm:$0xff] %v4637_v9  ;;  %v1097_v45 = vld [vmem:[#allocation3 + $0x398] sm:$0xff]  ;;  %6046 = vst [vmem:[#allocation151_spill] sm:$0xff] %v4643_v0 }
 0x26a   :  { %1854 = vmatprep.subr.bf16.mxu0 %v4611_v10  ;;  %1895 = vmatprep.subr.bf16.mxu1 %v4613_v3  ;;  %6043 = vst [vmem:[#allocation148_spill] sm:$0xff] %v4635_v8  ;;  %v1096_v3 = vld [vmem:[#allocation3 + $0x390] sm:$0xff]  ;;  %v1101_v24 = vld [vmem:[#allocation3 + $0x3b8] sm:$0xff]  ;;  %6045 = vst [vmem:[#allocation150_spill] sm:$0xff] %v4641_v47 }
 0x26b   :  { %v1100_v10 = vld [vmem:[#allocation3 + $0x3b0] sm:$0xff]  ;;  %v4649_v59 = vcombine.high %v1097_v45, %v1101_v24  ;;  %v4655_v1 = vcombine.low %v1097_v45, %v1101_v24  ;;  %v6056_v24 = vld [vmem:[#allocation33_spill] sm:$0xff] }
 0x26c   :  { %v4647_v55 = vcombine.high %v1096_v3, %v1100_v10  ;;  %v4653_v41 = vcombine.low %v1096_v3, %v1100_v10  ;;  %v6057_v45 = vld [vmem:[#allocation34_spill] sm:$0xff]  ;;  %v6058_v10 = vld [vmem:[#allocation35_spill] sm:$0xff]  ;;  %v6059_v3 = vld [vmem:[#allocation36_spill] sm:$0xff] }
 0x26d   :  { %1855 = vmatpush1.bf16.msra.mxu0 %v4617_v38  ;;  %1896 = vmatpush1.bf16.msra.mxu1 %v4619_v20  ;;  %6048 = vst [vmem:[#allocation153_spill] sm:$0xff] %v4649_v59  ;;  %v1105_v20 = vld [vmem:[#allocation3 + $0x3d8] sm:$0xff]  ;;  %6050 = vst [vmem:[#allocation155_spill] sm:$0xff] %v4655_v1 }
 0x26e   :  { %1856 = vmatprep.subr.bf16.mxu0 %v4623_v13  ;;  %1897 = vmatprep.subr.bf16.mxu1 %v4625_v31  ;;  %6047 = vst [vmem:[#allocation152_spill] sm:$0xff] %v4647_v55  ;;  %v1104_v31 = vld [vmem:[#allocation3 + $0x3d0] sm:$0xff]  ;;  %v1109_v38 = vld [vmem:[#allocation3 + $0x3f8] sm:$0xff]  ;;  %6049 = vst [vmem:[#allocation154_spill] sm:$0xff] %v4653_v41 }
 0x26f   :  { %v1108_v13 = vld [vmem:[#allocation3 + $0x3f0] sm:$0xff]  ;;  %v4661_v33 = vcombine.high %v1105_v20, %v1109_v38 }
 0x270   :  { %v4659_v60 = vcombine.high %v1104_v31, %v1108_v13 }
 0x271   :  { %1857 = vmatpush1.bf16.msra.mxu0 %v4629_v29  ;;  %1898 = vmatpush1.bf16.msra.mxu1 %v4631_v46  ;;  %6052 = vst [vmem:[#allocation157_spill] sm:$0xff] %v4661_v33 }
 0x272   :  { %1858 = vmatprep.subr.bf16.mxu0 %v4635_v8  ;;  %1899 = vmatprep.subr.bf16.mxu1 %v4637_v9  ;;  %6051 = vst [vmem:[#allocation156_spill] sm:$0xff] %v4659_v60  ;;  %v4665_v9 = vcombine.low %v1104_v31, %v1108_v13  ;;  %v6062_v13 = vld [vmem:[#allocation40_spill] sm:$0xff]  ;;  %v6063_v31 = vld [vmem:[#allocation41_spill] sm:$0xff] }
 0x274   :  { %6053 = vst [vmem:[#allocation158_spill] sm:$0xff] %v4665_v9 }
 0x275   :  { %1859 = vmatpush1.bf16.msra.mxu0 %v4641_v47  ;;  %1900 = vmatpush1.bf16.msra.mxu1 %v4643_v0  ;;  %v4667_v47 = vcombine.low %v1105_v20, %v1109_v38  ;;  %v6060_v38 = vld [vmem:[#allocation37_spill] sm:$0xff]  ;;  %v6061_v20 = vld [vmem:[#allocation38_spill] sm:$0xff] }
 0x276   :  { %1860 = vmatprep.subr.bf16.mxu0 %v4647_v55  ;;  %1901 = vmatprep.subr.bf16.mxu1 %v4649_v59 }
 0x277   :  { %6054 = vst [vmem:[#allocation159_spill] sm:$0xff] %v4667_v47 }
 0x279   :  { %1861 = vmatpush1.bf16.msra.mxu0 %v4653_v41  ;;  %1902 = vmatpush1.bf16.msra.mxu1 %v4655_v1 }
 0x27a   :  { %1862 = vmatprep.subr.bf16.mxu0 %v4659_v60  ;;  %1903 = vmatprep.subr.bf16.mxu1 %v4661_v33 }
 0x27d   :  { %1863 = vmatpush1.bf16.msra.mxu0 %v4665_v9  ;;  %1904 = vmatpush1.bf16.msra.mxu1 %v4667_v47 }
 0x27e   :  { %1976 = vmatprep.subr.bf16.mxu0 %v4061_v15  ;;  %2017 = vmatprep.subr.bf16.mxu1 %v4067_v19 }
 0x280   :  { %1865 = vmatmul.mubr.bf16.vlgmr.msra.gmra.mrb[28].mxu0 %v4543_v28  ;;  %1906 = vmatmul.mubr.bf16.vlgmr.msra.gmra.mrb[28].mxu1 %v4543_v28  ;;  %v6055_v28 = vld [vmem:[#allocation31_spill] sm:$0xff] }
 0x281   :  { %1977 = vmatpush1.bf16.msra.mxu0 %v4063_v17  ;;  %2018 = vmatpush1.bf16.msra.mxu1 %v4065_v18 }
 0x282   :  { %1978 = vmatprep.subr.bf16.mxu0 %v4073_v23  ;;  %2019 = vmatprep.subr.bf16.mxu1 %v4079_v27 }
 0x285   :  { %1979 = vmatpush1.bf16.msra.mxu0 %v4075_v25  ;;  %2020 = vmatpush1.bf16.msra.mxu1 %v4077_v26 }
 0x286   :  { %1980 = vmatprep.subr.bf16.mxu0 %v4089_v32  ;;  %2021 = vmatprep.subr.bf16.mxu1 %v4095_v36 }
 0x289   :  { %1981 = vmatpush1.bf16.msra.mxu0 %v4091_v34  ;;  %2022 = vmatpush1.bf16.msra.mxu1 %v4093_v35 }
 0x28a   :  { %1982 = vmatprep.subr.bf16.mxu0 %v4104_v40  ;;  %2023 = vmatprep.subr.bf16.mxu1 %v4110_v44 }
 0x28d   :  { %1983 = vmatpush1.bf16.msra.mxu0 %v4106_v42  ;;  %2024 = vmatpush1.bf16.msra.mxu1 %v4108_v43 }
 0x28e   :  { %1984 = vmatprep.subr.bf16.mxu0 %v4120_v49  ;;  %2025 = vmatprep.subr.bf16.mxu1 %v4126_v53 }
 0x291   :  { %1985 = vmatpush1.bf16.msra.mxu0 %v4122_v51  ;;  %2026 = vmatpush1.bf16.msra.mxu1 %v4124_v52 }
 0x292   :  { %1986 = vmatprep.subr.bf16.mxu0 %v4137_v58  ;;  %2027 = vmatprep.subr.bf16.mxu1 %v4144_v63  ;;  %v6064_v63 = vld [vmem:[#allocation101_spill] sm:$0xff] }
 0x295   :  { %1987 = vmatpush1.bf16.msra.mxu0 %v4135_v57  ;;  %2028 = vmatpush1.bf16.msra.mxu1 %v6055_v28  ;;  %v6065_v57 = vld [vmem:[#allocation102_spill] sm:$0xff]  ;;  %v6066_v28 = vld [vmem:[#allocation103_spill] sm:$0xff] }
 0x296   :  { %1988 = vmatprep.subr.bf16.mxu0 %v6056_v24  ;;  %2029 = vmatprep.subr.bf16.mxu1 %v6057_v45  ;;  %v6067_v24 = vld [vmem:[#allocation104_spill] sm:$0xff]  ;;  %v6068_v45 = vld [vmem:[#allocation105_spill] sm:$0xff] }
 0x299   :  { %1989 = vmatpush1.bf16.msra.mxu0 %v6058_v10  ;;  %2030 = vmatpush1.bf16.msra.mxu1 %v6059_v3  ;;  %v6069_v10 = vld [vmem:[#allocation106_spill] sm:$0xff]  ;;  %v6070_v3 = vld [vmem:[#allocation107_spill] sm:$0xff] }
 0x29a   :  { %1990 = vmatprep.subr.bf16.mxu0 %v6060_v38  ;;  %2031 = vmatprep.subr.bf16.mxu1 %v6061_v20  ;;  %v6071_v38 = vld [vmem:[#allocation108_spill] sm:$0xff]  ;;  %v6072_v20 = vld [vmem:[#allocation109_spill] sm:$0xff] }
 0x29d   :  { %1991 = vmatpush1.bf16.msra.mxu0 %v6062_v13  ;;  %2032 = vmatpush1.bf16.msra.mxu1 %v6063_v31  ;;  %v6073_v13 = vld [vmem:[#allocation110_spill] sm:$0xff]  ;;  %v6074_v31 = vld [vmem:[#allocation111_spill] sm:$0xff] }
 0x29e   :  { %1992 = vmatprep.subr.bf16.mxu0 %v6064_v63  ;;  %2033 = vmatprep.subr.bf16.mxu1 %v6065_v57  ;;  %v6075_v63 = vld [vmem:[#allocation112_spill] sm:$0xff]  ;;  %v6076_v57 = vld [vmem:[#allocation113_spill] sm:$0xff] }
 0x2a1   :  { %1993 = vmatpush1.bf16.msra.mxu0 %v6066_v28  ;;  %2034 = vmatpush1.bf16.msra.mxu1 %v6067_v24  ;;  %v6077_v28 = vld [vmem:[#allocation114_spill] sm:$0xff]  ;;  %v6078_v24 = vld [vmem:[#allocation115_spill] sm:$0xff] }
 0x2a2   :  { %1994 = vmatprep.subr.bf16.mxu0 %v6068_v45  ;;  %2035 = vmatprep.subr.bf16.mxu1 %v6069_v10  ;;  %v6079_v45 = vld [vmem:[#allocation116_spill] sm:$0xff]  ;;  %v6080_v10 = vld [vmem:[#allocation117_spill] sm:$0xff] }
 0x2a5   :  { %1995 = vmatpush1.bf16.msra.mxu0 %v6070_v3  ;;  %2036 = vmatpush1.bf16.msra.mxu1 %v6071_v38  ;;  %v6081_v3 = vld [vmem:[#allocation118_spill] sm:$0xff]  ;;  %v6082_v38 = vld [vmem:[#allocation119_spill] sm:$0xff] }
 0x2a6   :  { %1996 = vmatprep.subr.bf16.mxu0 %v6072_v20  ;;  %2037 = vmatprep.subr.bf16.mxu1 %v6073_v13  ;;  %v6083_v20 = vld [vmem:[#allocation120_spill] sm:$0xff]  ;;  %v6084_v13 = vld [vmem:[#allocation121_spill] sm:$0xff] }
 0x2a9   :  { %1997 = vmatpush1.bf16.msra.mxu0 %v6074_v31  ;;  %2038 = vmatpush1.bf16.msra.mxu1 %v6075_v63  ;;  %v6098_v63 = vld [vmem:[#allocation133_spill] sm:$0xff] }
 0x2aa   :  { %1998 = vmatprep.subr.bf16.mxu0 %v6076_v57  ;;  %2039 = vmatprep.subr.bf16.mxu1 %v6077_v28  ;;  %v6097_v57 = vld [vmem:[#allocation79_spill] sm:$0xff] }
 0x2ad   :  { %1999 = vmatpush1.bf16.msra.mxu0 %v6078_v24  ;;  %2040 = vmatpush1.bf16.msra.mxu1 %v6079_v45  ;;  %v6085_v24 = vld [vmem:[#allocation126_spill] sm:$0xff]  ;;  %v6086_v45 = vld [vmem:[#allocation127_spill] sm:$0xff] }
 0x2ae   :  { %2000 = vmatprep.subr.bf16.mxu0 %v6080_v10  ;;  %2041 = vmatprep.subr.bf16.mxu1 %v6081_v3  ;;  %v6087_v10 = vld [vmem:[#allocation128_spill] sm:$0xff]  ;;  %v6088_v3 = vld [vmem:[#allocation129_spill] sm:$0xff] }
 0x2b1   :  { %2001 = vmatpush1.bf16.msra.mxu0 %v6082_v38  ;;  %2042 = vmatpush1.bf16.msra.mxu1 %v6083_v20  ;;  %v6089_v38 = vld [vmem:[#allocation130_spill] sm:$0xff]  ;;  %v6090_v20 = vld [vmem:[#allocation131_spill] sm:$0xff] }
 0x2b2   :  { %2002 = vmatprep.subr.bf16.mxu0 %v6084_v13  ;;  %2043 = vmatprep.subr.bf16.mxu1 %v4465_v12  ;;  %v6091_v13 = vld [vmem:[#allocation132_spill] sm:$0xff]  ;;  %v6092_v12 = vld [vmem:[#allocation42_spill] sm:$0xff] }
 0x2b5   :  { %2003 = vmatpush1.bf16.msra.mxu0 %v4463_v22  ;;  %2044 = vmatpush1.bf16.msra.mxu1 %v4467_v48  ;;  %v6093_v22 = vld [vmem:[#allocation43_spill] sm:$0xff]  ;;  %v6094_v48 = vld [vmem:[#allocation44_spill] sm:$0xff] }
 0x2b6   :  { %2004 = vmatprep.subr.bf16.mxu0 %v4469_v61  ;;  %2045 = vmatprep.subr.bf16.mxu1 %v6085_v24  ;;  %v6095_v61 = vld [vmem:[#allocation77_spill] sm:$0xff]  ;;  %v6096_v24 = vld [vmem:[#allocation47_spill] sm:$0xff] }
 0x2b7   :  { %v207_v28 = vadd.f32 %v6095_v61, %v6094_v48 }
 0x2b9   :  { %2005 = vmatpush1.bf16.msra.mxu0 %v6086_v45  ;;  %2046 = vmatpush1.bf16.msra.mxu1 %v6087_v10  ;;  %v280_v45 = vadd.f32 %v6097_v57, %v6096_v24  ;;  %v6099_v10 = vld [vmem:[#allocation78_spill] sm:$0xff] }
 0x2ba   :  { %2006 = vmatprep.subr.bf16.mxu0 %v6088_v3  ;;  %2047 = vmatprep.subr.bf16.mxu1 %v6089_v38  ;;  %v209_v31 = vadd.f32 %v6099_v10, %v6098_v63  ;;  %v6100_v3 = vld [vmem:[#allocation81_spill] sm:$0xff] }
 0x2bb   :  { %v282_v38 = vadd.f32 %v6100_v3, %v4208_v54 }
 0x2bd   :  { %2007 = vmatpush1.bf16.msra.mxu0 %v6090_v20  ;;  %2048 = vmatpush1.bf16.msra.mxu1 %v6091_v13 }
 0x2be   :  { %2058 = vmatprep.subr.bf16.mxu0 %v6092_v12  ;;  %2099 = vmatprep.subr.bf16.mxu1 %v6093_v22 }
 0x313   :  { %v1784_v58 = vpop.f32.mrb[24].mxu0  ;;  %v1825_v20 = vpop.f32.mrb[24].mxu1 }
 0x314   :  { %v1946_v52 = vadd.f32 %v1784_v58, %v207_v28  ;;  %v1948_v13 = vadd.f32 %v1825_v20, %v280_v45  ;;  %v1786_v51 = vpop.f32.mrb[25].mxu0  ;;  %v1827_v12 = vpop.f32.mrb[25].mxu1 }
 0x315   :  { %v1947_v53 = vadd.f32 %v1786_v51, %v209_v31  ;;  %v1949_v22 = vadd.f32 %v1827_v12, %v282_v38  ;;  %v1788_v49 = vpop.f32.mrb[26].mxu0  ;;  %v1829_v43 = vpop.f32.mrb[26].mxu1 }
 0x316   :  { %v3564_v61 = vmul.f32 -1.442695, %v1946_v52  ;;  %v1789_v48 = vpop.f32.mrb[27].mxu0  ;;  %v1830_v42 = vpop.f32.mrb[27].mxu1 }
 0x317   :  { %v3566_v57 = vmul.f32 -1.442695, %v1947_v53  ;;  %v6101_v42 = vsub.s32 1, %v4188_v37 }
 0x318   :  { %3709 = vpow2.f32 %v3564_v61 }
 0x319   :  { %3711 = vpow2.f32 %v3566_v57  ;;  %v4755_v52 = vrot.slane %v4516_v30, %v6101_v42  ;;  %v3565_v30 = vmul.f32 -1.442695, %v1949_v22 }
 0x31a   :  { %3713 = vtanh.f32 %v1948_v13 }
 0x31b   :  { %6102 = vst [vmem:[#allocation77_spill] sm:$0xff] %v4755_v52 }
 0x322   :  { %v3710_v10 = vpop.eup %3709 }
 0x323   :  { %v3712_v63 = vpop.eup %3711  ;;  %v1953_v24 = vadd.f32 1.0, %v3710_v10 }
 0x324   :  { %v1966_v3 = vadd.f32 1.0, %v3712_v63  ;;  %v3714_v58 = vpop.eup %3713 }
 0x325   :  { %3715 = vrcp.f32 %v1953_v24 }
 0x326   :  { %3717 = vrcp.f32 %v1966_v3 }
 0x32f   :  { %v3716_v28 = vpop.eup %3715 }
 0x330   :  { %v3718_v45 = vpop.eup %3717  ;;  %v1970_v51 = vmul.f32 %v3716_v28, %v3714_v58 }
 0x331   :  { %v1969_v49 = vmul.f32 %v3718_v45, %v4524_v14 }
 0x333   :  { %v4750_v43 = vadd.f32 %v1970_v51, %v1969_v49 }
 0x353   :  { %v1866_v53 = vpop.f32.mrb[28].mxu0  ;;  %v1907_v12 = vpop.f32.mrb[28].mxu1 }
 0x354   :  { %v1914_v48 = vadd.f32 %v1866_v53, %v4521_v11  ;;  %v1868_v63 = vpop.f32.mrb[29].mxu0  ;;  %v1909_v24 = vpop.f32.mrb[29].mxu1  ;;  %v1916_v3 = vadd.f32 %v1907_v12, %v4536_v5 }
 0x355   :  { %v1915_v38 = vadd.f32 %v1868_v63, %v4755_v52  ;;  %v1870_v20 = vpop.f32.mrb[30].mxu0  ;;  %v1911_v13 = vpop.f32.mrb[30].mxu1  ;;  %v1917_v37 = vadd.f32 %v1909_v24, %v4530_v21 }
 0x356   :  { %v3561_v31 = vmul.f32 -1.442695, %v1914_v48  ;;  %v1871_v61 = vpop.f32.mrb[31].mxu0  ;;  %v1912_v14 = vpop.f32.mrb[31].mxu1 }
 0x357   :  { %v3563_v57 = vmul.f32 -1.442695, %v1915_v38  ;;  %v3562_v10 = vmul.f32 -1.442695, %v1917_v37 }
 0x358   :  { %3719 = vpow2.f32 %v3561_v31 }
 0x359   :  { %3721 = vpow2.f32 %v3563_v57 }
 0x35a   :  { %3723 = vpow2.f32 %v3565_v30 }
 0x35b   :  { %3725 = vpow2.f32 %v3562_v10 }
 0x35c   :  { %3727 = vtanh.f32 %v1916_v3  ;;  %v6104_v3 = vld [vmem:[#allocation56_spill] sm:$0xff] }
 0x362   :  { %v3720_v58 = vpop.eup %3719 }
 0x363   :  { %v3722_v28 = vpop.eup %3721  ;;  %v1921_v45 = vadd.f32 1.0, %v3720_v58  ;;  %v6105_v58 = vld [vmem:[#allocation57_spill] sm:$0xff] }
 0x364   :  { %v1934_v51 = vadd.f32 1.0, %v3722_v28  ;;  %v3724_v49 = vpop.eup %3723  ;;  %v6106_v28 = vld [vmem:[#allocation58_spill] sm:$0xff] }
 0x365   :  { %3729 = vrcp.f32 %v1921_v45  ;;  %v3726_v42 = vpop.eup %3725  ;;  %v1960_v63 = vadd.f32 1.0, %v3724_v49  ;;  %v6107_v45 = vld [vmem:[#allocation59_spill] sm:$0xff]  ;;  %v6109_v49 = vld [vmem:[#allocation61_spill] sm:$0xff] }
 0x366   :  { %3731 = vrcp.f32 %v1934_v51  ;;  %v3728_v53 = vpop.eup %3727  ;;  %v1928_v22 = vadd.f32 1.0, %v3726_v42  ;;  %v6108_v51 = vld [vmem:[#allocation60_spill] sm:$0xff]  ;;  %v6110_v42 = vld [vmem:[#allocation62_spill] sm:$0xff] }
 0x367   :  { %3733 = vtanh.f32 %v4750_v43 }
 0x368   :  { %3735 = vrcp.f32 %v1960_v63  ;;  %v6113_v63 = vld [vmem:[#allocation65_spill] sm:$0xff] }
 0x369   :  { %3737 = vrcp.f32 %v1928_v22  ;;  %v6116_v22 = vld [vmem:[#allocation68_spill] sm:$0xff] }
 0x36f   :  { %v3730_v48 = vpop.eup %3729 }
 0x370   :  { %v3732_v38 = vpop.eup %3731  ;;  %v1938_v24 = vmul.f32 %v3730_v48, %v3728_v53  ;;  %v6111_v53 = vld [vmem:[#allocation63_spill] sm:$0xff]  ;;  %v6112_v48 = vld [vmem:[#allocation64_spill] sm:$0xff] }
 0x371   :  { %v1937_v20 = vmul.f32 %v3732_v38, %v4540_v56  ;;  %v3734_v13 = vpop.eup %3733  ;;  %v6103_v56 = vld [vmem:[#allocation55_spill] sm:$0xff]  ;;  %v6114_v38 = vld [vmem:[#allocation66_spill] sm:$0xff] }
 0x372   :  { %v3736_v31 = vpop.eup %3735 }
 0x373   :  { %v4763_v12 = vadd.f32 %v1938_v24, %v1937_v20  ;;  %v3738_v61 = vpop.eup %3737  ;;  %v1973_v57 = vmul.f32 %v3736_v31, %v3734_v13  ;;  %v6115_v24 = vld [vmem:[#allocation67_spill] sm:$0xff]  ;;  %v6117_v20 = vld [vmem:[#allocation69_spill] sm:$0xff]  ;;  %v6118_v13 = vld [vmem:[#allocation70_spill] sm:$0xff] }
 0x374   :  { %v6119_v31 = vld [vmem:[#allocation71_spill] sm:$0xff] }
 0x375   :  { %3739 = vtanh.f32 %v4763_v12  ;;  %v4766_v10 = vpack.c.bf16 %v1973_v57, %v1973_v57  ;;  %v6122_v57 = vld [vmem:[#allocation74_spill] sm:$0xff] }
 0x37f   :  { %v3740_v14 = vpop.eup %3739 }
 0x380   :  { %v1941_v37 = vmul.f32 %v3740_v14, %v3738_v61  ;;  %v6120_v61 = vld [vmem:[#allocation72_spill] sm:$0xff]  ;;  %v6121_v14 = vld [vmem:[#allocation73_spill] sm:$0xff] }
 0x382   :  { %v1975_v30 = vpack.c.bf16 %v1941_v37, %v1941_v37  ;;  %v6123_v37 = vld [vmem:[#allocation75_spill] sm:$0xff] }
 0x384   :  { %2008 = vmatprep.mubr.bf16.mxu0 %v1975_v30  ;;  %2049 = vmatprep.mubr.bf16.mxu1 %v1975_v30 }
 0x385   :  { %2009 = vmatmul.mubr.bf16.vlgmr.msra.gmra.mrb[32].mxu0 %v4766_v10  ;;  %2050 = vmatmul.mubr.bf16.vlgmr.msra.gmra.mrb[32].mxu1 %v4766_v10 }
 0x386   :  { %2059 = vmatpush1.bf16.msra.mxu0 %v4161_v16  ;;  %2100 = vmatpush1.bf16.msra.mxu1 %v6006_v7 }
 0x387   :  { %2090 = vmatprep.mubr.bf16.mxu0 %v1975_v30  ;;  %2131 = vmatprep.mubr.bf16.mxu1 %v1975_v30  ;;  %v6124_v30 = vld [vmem:[#allocation76_spill] sm:$0xff] }
 0x388   :  { %2060 = vmatprep.subr.bf16.mxu0 %v6007_v4  ;;  %2101 = vmatprep.subr.bf16.mxu1 %v6008_v62 }
 0x38a   :  { %2061 = vmatpush1.bf16.msra.mxu0 %v6009_v6  ;;  %2102 = vmatpush1.bf16.msra.mxu1 %v6010_v50 }
 0x38b   :  { %2062 = vmatprep.subr.bf16.mxu0 %v6011_v2  ;;  %2103 = vmatprep.subr.bf16.mxu1 %v6012_v39 }
 0x38e   :  { %2063 = vmatpush1.bf16.msra.mxu0 %v6103_v56  ;;  %2104 = vmatpush1.bf16.msra.mxu1 %v6104_v3 }
 0x38f   :  { %2064 = vmatprep.subr.bf16.mxu0 %v6105_v58  ;;  %2105 = vmatprep.subr.bf16.mxu1 %v6106_v28 }
 0x392   :  { %2065 = vmatpush1.bf16.msra.mxu0 %v6107_v45  ;;  %2106 = vmatpush1.bf16.msra.mxu1 %v6108_v51 }
 0x393   :  { %2066 = vmatprep.subr.bf16.mxu0 %v6109_v49  ;;  %2107 = vmatprep.subr.bf16.mxu1 %v6110_v42 }
 0x396   :  { %2067 = vmatpush1.bf16.msra.mxu0 %v6111_v53  ;;  %2108 = vmatpush1.bf16.msra.mxu1 %v6112_v48 }
 0x397   :  { %2068 = vmatprep.subr.bf16.mxu0 %v6113_v63  ;;  %2109 = vmatprep.subr.bf16.mxu1 %v6114_v38  ;;  %v6125_v38 = vld [vmem:[#allocation39_spill] sm:$0xff] }
 0x39a   :  { %2069 = vmatpush1.bf16.msra.mxu0 %v6115_v24  ;;  %2110 = vmatpush1.bf16.msra.mxu1 %v6116_v22  ;;  %v6126_v24 = vld [vmem:[#allocation49_spill] sm:$0xff]  ;;  %v6127_v22 = vld [vmem:[#allocation50_spill] sm:$0xff] }
 0x39b   :  { %2070 = vmatprep.subr.bf16.mxu0 %v6117_v20  ;;  %2111 = vmatprep.subr.bf16.mxu1 %v6118_v13  ;;  %v6128_v20 = vld [vmem:[#allocation51_spill] sm:$0xff]  ;;  %v6129_v13 = vld [vmem:[#allocation52_spill] sm:$0xff] }
 0x39e   :  { %2071 = vmatpush1.bf16.msra.mxu0 %v6119_v31  ;;  %2112 = vmatpush1.bf16.msra.mxu1 %v6120_v61  ;;  %v6130_v31 = vld [vmem:[#allocation53_spill] sm:$0xff]  ;;  %v6131_v61 = vld [vmem:[#allocation54_spill] sm:$0xff] }
 0x39f   :  { %2072 = vmatprep.subr.bf16.mxu0 %v6121_v14  ;;  %2113 = vmatprep.subr.bf16.mxu1 %v6122_v57  ;;  %v6132_v14 = vld [vmem:[#allocation135_spill] sm:$0xff]  ;;  %v6133_v57 = vld [vmem:[#allocation136_spill] sm:$0xff] }
 0x3a2   :  { %2073 = vmatpush1.bf16.msra.mxu0 %v6123_v37  ;;  %2114 = vmatpush1.bf16.msra.mxu1 %v6124_v30  ;;  %v6134_v37 = vld [vmem:[#allocation137_spill] sm:$0xff]  ;;  %v6135_v30 = vld [vmem:[#allocation138_spill] sm:$0xff] }
 0x3a3   :  { %2074 = vmatprep.subr.bf16.mxu0 %v6125_v38  ;;  %2115 = vmatprep.subr.bf16.mxu1 %v6126_v24  ;;  %v6136_v38 = vld [vmem:[#allocation139_spill] sm:$0xff]  ;;  %v6137_v24 = vld [vmem:[#allocation140_spill] sm:$0xff] }
 0x3a6   :  { %2075 = vmatpush1.bf16.msra.mxu0 %v6127_v22  ;;  %2116 = vmatpush1.bf16.msra.mxu1 %v6128_v20  ;;  %v6138_v22 = vld [vmem:[#allocation141_spill] sm:$0xff]  ;;  %v6139_v20 = vld [vmem:[#allocation142_spill] sm:$0xff] }
 0x3a7   :  { %2076 = vmatprep.subr.bf16.mxu0 %v6129_v13  ;;  %2117 = vmatprep.subr.bf16.mxu1 %v6130_v31  ;;  %v6140_v13 = vld [vmem:[#allocation143_spill] sm:$0xff]  ;;  %v6141_v31 = vld [vmem:[#allocation144_spill] sm:$0xff] }
 0x3aa   :  { %2077 = vmatpush1.bf16.msra.mxu0 %v6131_v61  ;;  %2118 = vmatpush1.bf16.msra.mxu1 %v6132_v14  ;;  %v6142_v61 = vld [vmem:[#allocation145_spill] sm:$0xff] }
 0x3ab   :  { %2078 = vmatprep.subr.bf16.mxu0 %v6133_v57  ;;  %2119 = vmatprep.subr.bf16.mxu1 %v6134_v37 }
 0x3ae   :  { %2079 = vmatpush1.bf16.msra.mxu0 %v6135_v30  ;;  %2120 = vmatpush1.bf16.msra.mxu1 %v6136_v38  ;;  %v6143_v30 = vld [vmem:[#allocation149_spill] sm:$0xff]  ;;  %v6144_v38 = vld [vmem:[#allocation150_spill] sm:$0xff] }
 0x3af   :  { %2080 = vmatprep.subr.bf16.mxu0 %v6137_v24  ;;  %2121 = vmatprep.subr.bf16.mxu1 %v6138_v22 }
 0x3b2   :  { %2081 = vmatpush1.bf16.msra.mxu0 %v6139_v20  ;;  %2122 = vmatpush1.bf16.msra.mxu1 %v6140_v13 }
 0x3b3   :  { %2082 = vmatprep.subr.bf16.mxu0 %v6141_v31  ;;  %2123 = vmatprep.subr.bf16.mxu1 %v6142_v61 }
 0x3b6   :  { %2083 = vmatpush1.bf16.msra.mxu0 %v4629_v29  ;;  %2124 = vmatpush1.bf16.msra.mxu1 %v4631_v46 }
 0x3b7   :  { %2084 = vmatprep.subr.bf16.mxu0 %v4635_v8  ;;  %2125 = vmatprep.subr.bf16.mxu1 %v6143_v30 }
 0x3ba   :  { %2085 = vmatpush1.bf16.msra.mxu0 %v6144_v38  ;;  %2126 = vmatpush1.bf16.msra.mxu1 %v4643_v0 }
 0x3bb   :  { %2086 = vmatprep.subr.bf16.mxu0 %v4647_v55  ;;  %2127 = vmatprep.subr.bf16.mxu1 %v4649_v59 }
 0x3be   :  { %2087 = vmatpush1.bf16.msra.mxu0 %v4653_v41  ;;  %2128 = vmatpush1.bf16.msra.mxu1 %v4655_v1 }
 0x3bf   :  { %2088 = vmatprep.subr.bf16.mxu0 %v4659_v60  ;;  %2129 = vmatprep.subr.bf16.mxu1 %v4661_v33 }
 0x3c2   :  { %2089 = vmatpush1.bf16.msra.mxu0 %v4665_v9  ;;  %2130 = vmatpush1.bf16.msra.mxu1 %v4667_v47 }
 0x3c3   :  { %2202 = vmatprep.subr.bf16.mxu0 %v4061_v15  ;;  %2243 = vmatprep.subr.bf16.mxu1 %v4067_v19  ;;  %v6201_v19 = vld [vmem:[#allocation133_spill] sm:$0xff] }
 0x3c5   :  { %2091 = vmatmul.mubr.bf16.vlgmr.msra.gmra.mrb[36].mxu0 %v4766_v10  ;;  %2132 = vmatmul.mubr.bf16.vlgmr.msra.gmra.mrb[36].mxu1 %v4766_v10  ;;  %v6145_v10 = vld [vmem:[#allocation22_spill] sm:$0xff] }
 0x3c6   :  { %2203 = vmatpush1.bf16.msra.mxu0 %v4063_v17  ;;  %2244 = vmatpush1.bf16.msra.mxu1 %v4065_v18  ;;  %v6200_v17 = vld [vmem:[#allocation83_spill] sm:$0xff] }
 0x3c7   :  { %2204 = vmatprep.subr.bf16.mxu0 %v4073_v23  ;;  %2245 = vmatprep.subr.bf16.mxu1 %v4079_v27  ;;  %v6146_v23 = vld [vmem:[#allocation23_spill] sm:$0xff]  ;;  %v6147_v27 = vld [vmem:[#allocation25_spill] sm:$0xff] }
 0x3ca   :  { %2205 = vmatpush1.bf16.msra.mxu0 %v4075_v25  ;;  %2246 = vmatpush1.bf16.msra.mxu1 %v4077_v26  ;;  %v6148_v25 = vld [vmem:[#allocation28_spill] sm:$0xff]  ;;  %v6149_v26 = vld [vmem:[#allocation26_spill] sm:$0xff] }
 0x3cb   :  { %2206 = vmatprep.subr.bf16.mxu0 %v4089_v32  ;;  %2247 = vmatprep.subr.bf16.mxu1 %v4095_v36  ;;  %v6150_v32 = vld [vmem:[#allocation27_spill] sm:$0xff]  ;;  %v6151_v36 = vld [vmem:[#allocation30_spill] sm:$0xff] }
 0x3ce   :  { %2207 = vmatpush1.bf16.msra.mxu0 %v4091_v34  ;;  %2248 = vmatpush1.bf16.msra.mxu1 %v4093_v35  ;;  %v6152_v34 = vld [vmem:[#allocation32_spill] sm:$0xff]  ;;  %v6153_v35 = vld [vmem:[#allocation29_spill] sm:$0xff] }
 0x3cf   :  { %2208 = vmatprep.subr.bf16.mxu0 %v4104_v40  ;;  %2249 = vmatprep.subr.bf16.mxu1 %v4110_v44  ;;  %v6154_v40 = vld [vmem:[#allocation31_spill] sm:$0xff]  ;;  %v6155_v44 = vld [vmem:[#allocation33_spill] sm:$0xff] }
 0x3d2   :  { %2209 = vmatpush1.bf16.msra.mxu0 %v6145_v10  ;;  %2250 = vmatpush1.bf16.msra.mxu1 %v6146_v23  ;;  %v6156_v10 = vld [vmem:[#allocation34_spill] sm:$0xff]  ;;  %v6157_v23 = vld [vmem:[#allocation35_spill] sm:$0xff] }
 0x3d3   :  { %2210 = vmatprep.subr.bf16.mxu0 %v6147_v27  ;;  %2251 = vmatprep.subr.bf16.mxu1 %v6148_v25  ;;  %v6158_v27 = vld [vmem:[#allocation36_spill] sm:$0xff]  ;;  %v6159_v25 = vld [vmem:[#allocation37_spill] sm:$0xff] }
 0x3d6   :  { %2211 = vmatpush1.bf16.msra.mxu0 %v6149_v26  ;;  %2252 = vmatpush1.bf16.msra.mxu1 %v6150_v32  ;;  %v6160_v26 = vld [vmem:[#allocation38_spill] sm:$0xff]  ;;  %v6161_v32 = vld [vmem:[#allocation40_spill] sm:$0xff] }
 0x3d7   :  { %2212 = vmatprep.subr.bf16.mxu0 %v6151_v36  ;;  %2253 = vmatprep.subr.bf16.mxu1 %v6152_v34  ;;  %v6162_v36 = vld [vmem:[#allocation41_spill] sm:$0xff] }
 0x3d8   :  { %v6163_v34 = vld [vmem:[#allocation101_spill] sm:$0xff] }
 0x3da   :  { %2213 = vmatpush1.bf16.msra.mxu0 %v6153_v35  ;;  %2254 = vmatpush1.bf16.msra.mxu1 %v6154_v40  ;;  %v6164_v35 = vld [vmem:[#allocation102_spill] sm:$0xff]  ;;  %v6165_v40 = vld [vmem:[#allocation103_spill] sm:$0xff] }
 0x3db   :  { %2214 = vmatprep.subr.bf16.mxu0 %v6155_v44  ;;  %2255 = vmatprep.subr.bf16.mxu1 %v6156_v10  ;;  %v6166_v44 = vld [vmem:[#allocation104_spill] sm:$0xff]  ;;  %v6167_v10 = vld [vmem:[#allocation105_spill] sm:$0xff] }
 0x3de   :  { %2215 = vmatpush1.bf16.msra.mxu0 %v6157_v23  ;;  %2256 = vmatpush1.bf16.msra.mxu1 %v6158_v27  ;;  %v6168_v23 = vld [vmem:[#allocation106_spill] sm:$0xff]  ;;  %v6169_v27 = vld [vmem:[#allocation107_spill] sm:$0xff] }
 0x3df   :  { %2216 = vmatprep.subr.bf16.mxu0 %v6159_v25  ;;  %2257 = vmatprep.subr.bf16.mxu1 %v6160_v26  ;;  %v6170_v25 = vld [vmem:[#allocation108_spill] sm:$0xff]  ;;  %v6171_v26 = vld [vmem:[#allocation109_spill] sm:$0xff] }
 0x3e2   :  { %2217 = vmatpush1.bf16.msra.mxu0 %v6161_v32  ;;  %2258 = vmatpush1.bf16.msra.mxu1 %v6162_v36  ;;  %v6172_v32 = vld [vmem:[#allocation110_spill] sm:$0xff]  ;;  %v6173_v36 = vld [vmem:[#allocation111_spill] sm:$0xff] }
 0x3e3   :  { %2218 = vmatprep.subr.bf16.mxu0 %v6163_v34  ;;  %2259 = vmatprep.subr.bf16.mxu1 %v6164_v35  ;;  %v6174_v34 = vld [vmem:[#allocation112_spill] sm:$0xff]  ;;  %v6175_v35 = vld [vmem:[#allocation113_spill] sm:$0xff] }
 0x3e6   :  { %2219 = vmatpush1.bf16.msra.mxu0 %v6165_v40  ;;  %2260 = vmatpush1.bf16.msra.mxu1 %v6166_v44  ;;  %v6176_v40 = vld [vmem:[#allocation114_spill] sm:$0xff]  ;;  %v6177_v44 = vld [vmem:[#allocation115_spill] sm:$0xff] }
 0x3e7   :  { %2220 = vmatprep.subr.bf16.mxu0 %v6167_v10  ;;  %2261 = vmatprep.subr.bf16.mxu1 %v6168_v23  ;;  %v6178_v10 = vld [vmem:[#allocation116_spill] sm:$0xff]  ;;  %v6179_v23 = vld [vmem:[#allocation117_spill] sm:$0xff] }
 0x3ea   :  { %2221 = vmatpush1.bf16.msra.mxu0 %v6169_v27  ;;  %2262 = vmatpush1.bf16.msra.mxu1 %v6170_v25  ;;  %v6180_v27 = vld [vmem:[#allocation118_spill] sm:$0xff]  ;;  %v6181_v25 = vld [vmem:[#allocation119_spill] sm:$0xff] }
 0x3eb   :  { %2222 = vmatprep.subr.bf16.mxu0 %v6171_v26  ;;  %2263 = vmatprep.subr.bf16.mxu1 %v6172_v32  ;;  %v6182_v26 = vld [vmem:[#allocation120_spill] sm:$0xff]  ;;  %v6183_v32 = vld [vmem:[#allocation121_spill] sm:$0xff] }
 0x3ee   :  { %2223 = vmatpush1.bf16.msra.mxu0 %v6173_v36  ;;  %2264 = vmatpush1.bf16.msra.mxu1 %v6174_v34  ;;  %v6184_v36 = vld [vmem:[#allocation123_spill] sm:$0xff]  ;;  %v6185_v34 = vld [vmem:[#allocation122_spill] sm:$0xff] }
 0x3ef   :  { %2224 = vmatprep.subr.bf16.mxu0 %v6175_v35  ;;  %2265 = vmatprep.subr.bf16.mxu1 %v6176_v40  ;;  %v6186_v35 = vld [vmem:[#allocation124_spill] sm:$0xff]  ;;  %v6187_v40 = vld [vmem:[#allocation125_spill] sm:$0xff] }
 0x3f2   :  { %2225 = vmatpush1.bf16.msra.mxu0 %v6177_v44  ;;  %2266 = vmatpush1.bf16.msra.mxu1 %v6178_v10  ;;  %v6188_v44 = vld [vmem:[#allocation126_spill] sm:$0xff]  ;;  %v6189_v10 = vld [vmem:[#allocation127_spill] sm:$0xff] }
 0x3f3   :  { %2226 = vmatprep.subr.bf16.mxu0 %v6179_v23  ;;  %2267 = vmatprep.subr.bf16.mxu1 %v6180_v27  ;;  %v6190_v23 = vld [vmem:[#allocation128_spill] sm:$0xff]  ;;  %v6191_v27 = vld [vmem:[#allocation129_spill] sm:$0xff] }
 0x3f6   :  { %2227 = vmatpush1.bf16.msra.mxu0 %v6181_v25  ;;  %2268 = vmatpush1.bf16.msra.mxu1 %v6182_v26  ;;  %v6192_v25 = vld [vmem:[#allocation130_spill] sm:$0xff]  ;;  %v6193_v26 = vld [vmem:[#allocation131_spill] sm:$0xff] }
 0x3f7   :  { %2228 = vmatprep.subr.bf16.mxu0 %v6183_v32  ;;  %2269 = vmatprep.subr.bf16.mxu1 %v6184_v36  ;;  %v6194_v32 = vld [vmem:[#allocation132_spill] sm:$0xff]  ;;  %v6195_v36 = vld [vmem:[#allocation42_spill] sm:$0xff] }
 0x3fa   :  { %2229 = vmatpush1.bf16.msra.mxu0 %v6185_v34  ;;  %2270 = vmatpush1.bf16.msra.mxu1 %v6186_v35  ;;  %v6196_v34 = vld [vmem:[#allocation43_spill] sm:$0xff]  ;;  %v6197_v35 = vld [vmem:[#allocation44_spill] sm:$0xff] }
 0x3fb   :  { %2230 = vmatprep.subr.bf16.mxu0 %v6187_v40  ;;  %2271 = vmatprep.subr.bf16.mxu1 %v6188_v44  ;;  %v6198_v40 = vld [vmem:[#allocation80_spill] sm:$0xff]  ;;  %v6199_v44 = vld [vmem:[#allocation47_spill] sm:$0xff] }
 0x3fc   :  { %v211_v18 = vadd.f32 %v6198_v40, %v6197_v35 }
 0x3fe   :  { %2231 = vmatpush1.bf16.msra.mxu0 %v6189_v10  ;;  %2272 = vmatpush1.bf16.msra.mxu1 %v6190_v23  ;;  %v284_v10 = vadd.f32 %v6200_v17, %v6199_v44  ;;  %v6202_v23 = vld [vmem:[#allocation82_spill] sm:$0xff] }
 0x3ff   :  { %2232 = vmatprep.subr.bf16.mxu0 %v6191_v27  ;;  %2273 = vmatprep.subr.bf16.mxu1 %v6192_v25  ;;  %v213_v15 = vadd.f32 %v6202_v23, %v6201_v19  ;;  %v6203_v27 = vld [vmem:[#allocation84_spill] sm:$0xff] }
 0x400   :  { %v286_v25 = vadd.f32 %v6203_v27, %v4208_v54 }
 0x402   :  { %2233 = vmatpush1.bf16.msra.mxu0 %v6193_v26  ;;  %2274 = vmatpush1.bf16.msra.mxu1 %v6194_v32 }
 0x403   :  { %2284 = vmatprep.subr.bf16.mxu0 %v6195_v36  ;;  %2325 = vmatprep.subr.bf16.mxu1 %v6196_v34 }
 0x458   :  { %v2010_v47 = vpop.f32.mrb[32].mxu0  ;;  %v2051_v26 = vpop.f32.mrb[32].mxu1 }
 0x459   :  { %v2172_v9 = vadd.f32 %v2010_v47, %v211_v18  ;;  %v2174_v32 = vadd.f32 %v2051_v26, %v284_v10  ;;  %v2012_v33 = vpop.f32.mrb[33].mxu0  ;;  %v2053_v36 = vpop.f32.mrb[33].mxu1 }
 0x45a   :  { %v2173_v60 = vadd.f32 %v2012_v33, %v213_v15  ;;  %v2175_v34 = vadd.f32 %v2053_v36, %v286_v25  ;;  %v2014_v1 = vpop.f32.mrb[34].mxu0  ;;  %v2055_v41 = vpop.f32.mrb[34].mxu1 }
 0x45b   :  { %v3570_v40 = vmul.f32 -1.442695, %v2172_v9  ;;  %v2015_v35 = vpop.f32.mrb[35].mxu0  ;;  %v2056_v59 = vpop.f32.mrb[35].mxu1 }
 0x45c   :  { %v3572_v17 = vmul.f32 -1.442695, %v2173_v60 }
 0x45d   :  { %3741 = vpow2.f32 %v3570_v40 }
 0x45e   :  { %3743 = vpow2.f32 %v3572_v17  ;;  %v3571_v17 = vmul.f32 -1.442695, %v2175_v34 }
 0x45f   :  { %3745 = vtanh.f32 %v2174_v32 }
 0x467   :  { %v3742_v23 = vpop.eup %3741 }
 0x468   :  { %v3744_v19 = vpop.eup %3743  ;;  %v2179_v44 = vadd.f32 1.0, %v3742_v23 }
 0x469   :  { %v2192_v27 = vadd.f32 1.0, %v3744_v19  ;;  %v3746_v18 = vpop.eup %3745 }
 0x46a   :  { %3747 = vrcp.f32 %v2179_v44 }
 0x46b   :  { %3749 = vrcp.f32 %v2192_v27 }
 0x474   :  { %v3748_v26 = vpop.eup %3747 }
 0x475   :  { %v3750_v47 = vpop.eup %3749  ;;  %v2196_v15 = vmul.f32 %v3748_v26, %v3746_v18 }
 0x476   :  { %v2195_v25 = vmul.f32 %v3750_v47, %v4750_v43 }
 0x478   :  { %v4909_v36 = vadd.f32 %v2196_v15, %v2195_v25 }
 0x498   :  { %v2092_v35 = vpop.f32.mrb[36].mxu0  ;;  %v2133_v9 = vpop.f32.mrb[36].mxu1 }
 0x499   :  { %v2140_v59 = vadd.f32 %v2092_v35, %v4521_v11  ;;  %v2094_v41 = vpop.f32.mrb[37].mxu0  ;;  %v2135_v1 = vpop.f32.mrb[37].mxu1  ;;  %v2142_v27 = vadd.f32 %v2133_v9, %v4536_v5 }
 0x49a   :  { %v2141_v60 = vadd.f32 %v2094_v41, %v4755_v52  ;;  %v2096_v32 = vpop.f32.mrb[38].mxu0  ;;  %v2137_v19 = vpop.f32.mrb[38].mxu1  ;;  %v2143_v43 = vadd.f32 %v2135_v1, %v4530_v21 }
 0x49b   :  { %v3567_v44 = vmul.f32 -1.442695, %v2140_v59  ;;  %v2097_v33 = vpop.f32.mrb[39].mxu0  ;;  %v2138_v10 = vpop.f32.mrb[39].mxu1 }
 0x49c   :  { %v3569_v40 = vmul.f32 -1.442695, %v2141_v60  ;;  %v3568_v23 = vmul.f32 -1.442695, %v2143_v43 }
 0x49d   :  { %3751 = vpow2.f32 %v3567_v44 }
 0x49e   :  { %3753 = vpow2.f32 %v3569_v40 }
 0x49f   :  { %3755 = vpow2.f32 %v3571_v17 }
 0x4a0   :  { %3757 = vpow2.f32 %v3568_v23 }
 0x4a1   :  { %3759 = vtanh.f32 %v2142_v27 }
 0x4a7   :  { %v3752_v18 = vpop.eup %3751 }
 0x4a8   :  { %v3754_v26 = vpop.eup %3753  ;;  %v2147_v47 = vadd.f32 1.0, %v3752_v18  ;;  %v6205_v18 = vld [vmem:[#allocation67_spill] sm:$0xff] }
 0x4a9   :  { %v2160_v15 = vadd.f32 1.0, %v3754_v26  ;;  %v3756_v25 = vpop.eup %3755  ;;  %v6206_v26 = vld [vmem:[#allocation68_spill] sm:$0xff] }
 0x4aa   :  { %3761 = vrcp.f32 %v2147_v47  ;;  %v3758_v35 = vpop.eup %3757  ;;  %v2186_v60 = vadd.f32 1.0, %v3756_v25  ;;  %v6207_v47 = vld [vmem:[#allocation69_spill] sm:$0xff]  ;;  %v6209_v25 = vld [vmem:[#allocation71_spill] sm:$0xff] }
 0x4ab   :  { %3763 = vrcp.f32 %v2160_v15  ;;  %v3760_v59 = vpop.eup %3759  ;;  %v2154_v34 = vadd.f32 1.0, %v3758_v35  ;;  %v6208_v15 = vld [vmem:[#allocation70_spill] sm:$0xff]  ;;  %v6210_v35 = vld [vmem:[#allocation72_spill] sm:$0xff] }
 0x4ac   :  { %3765 = vtanh.f32 %v4909_v36 }
 0x4ad   :  { %3767 = vrcp.f32 %v2186_v60  ;;  %v6213_v60 = vld [vmem:[#allocation75_spill] sm:$0xff] }
 0x4ae   :  { %3769 = vrcp.f32 %v2154_v34  ;;  %v6216_v34 = vld [vmem:[#allocation49_spill] sm:$0xff] }
 0x4b4   :  { %v3762_v41 = vpop.eup %3761 }
 0x4b5   :  { %v3764_v32 = vpop.eup %3763  ;;  %v2164_v1 = vmul.f32 %v3762_v41, %v3760_v59  ;;  %v6211_v59 = vld [vmem:[#allocation73_spill] sm:$0xff]  ;;  %v6212_v41 = vld [vmem:[#allocation74_spill] sm:$0xff] }
 0x4b6   :  { %v2163_v19 = vmul.f32 %v3764_v32, %v4763_v12  ;;  %v3766_v44 = vpop.eup %3765  ;;  %v6204_v12 = vld [vmem:[#allocation66_spill] sm:$0xff]  ;;  %v6214_v32 = vld [vmem:[#allocation76_spill] sm:$0xff] }
 0x4b7   :  { %v3768_v33 = vpop.eup %3767 }
 0x4b8   :  { %v4917_v9 = vadd.f32 %v2164_v1, %v2163_v19  ;;  %v3770_v10 = vpop.eup %3769  ;;  %v2199_v43 = vmul.f32 %v3768_v33, %v3766_v44  ;;  %v6215_v1 = vld [vmem:[#allocation39_spill] sm:$0xff]  ;;  %v6217_v19 = vld [vmem:[#allocation50_spill] sm:$0xff]  ;;  %v6219_v33 = vld [vmem:[#allocation52_spill] sm:$0xff] }
 0x4b9   :  { %v6218_v44 = vld [vmem:[#allocation51_spill] sm:$0xff] }
 0x4ba   :  { %3771 = vtanh.f32 %v4917_v9  ;;  %v4920_v27 = vpack.c.bf16 %v2199_v43, %v2199_v43  ;;  %v6222_v43 = vld [vmem:[#allocation138_spill] sm:$0xff] }
 0x4c4   :  { %v3772_v40 = vpop.eup %3771 }
 0x4c5   :  { %v2167_v17 = vmul.f32 %v3772_v40, %v3770_v10  ;;  %v6220_v10 = vld [vmem:[#allocation53_spill] sm:$0xff]  ;;  %v6221_v40 = vld [vmem:[#allocation54_spill] sm:$0xff] }
 0x4c7   :  { %v2201_v23 = vpack.c.bf16 %v2167_v17, %v2167_v17  ;;  %v6223_v17 = vld [vmem:[#allocation139_spill] sm:$0xff] }
 0x4c9   :  { %2234 = vmatprep.mubr.bf16.mxu0 %v2201_v23  ;;  %2275 = vmatprep.mubr.bf16.mxu1 %v2201_v23 }
 0x4ca   :  { %2235 = vmatmul.mubr.bf16.vlgmr.msra.gmra.mrb[40].mxu0 %v4920_v27  ;;  %2276 = vmatmul.mubr.bf16.vlgmr.msra.gmra.mrb[40].mxu1 %v4920_v27 }
 0x4cb   :  { %2285 = vmatpush1.bf16.msra.mxu0 %v4161_v16  ;;  %2326 = vmatpush1.bf16.msra.mxu1 %v6006_v7 }
 0x4cc   :  { %2316 = vmatprep.mubr.bf16.mxu0 %v2201_v23  ;;  %2357 = vmatprep.mubr.bf16.mxu1 %v2201_v23  ;;  %v6224_v23 = vld [vmem:[#allocation153_spill] sm:$0xff] }
 0x4cd   :  { %2286 = vmatprep.subr.bf16.mxu0 %v6007_v4  ;;  %2327 = vmatprep.subr.bf16.mxu1 %v6008_v62 }
 0x4cf   :  { %2287 = vmatpush1.bf16.msra.mxu0 %v6009_v6  ;;  %2328 = vmatpush1.bf16.msra.mxu1 %v6010_v50 }
 0x4d0   :  { %2288 = vmatprep.subr.bf16.mxu0 %v6011_v2  ;;  %2329 = vmatprep.subr.bf16.mxu1 %v6012_v39 }
 0x4d3   :  { %2289 = vmatpush1.bf16.msra.mxu0 %v6103_v56  ;;  %2330 = vmatpush1.bf16.msra.mxu1 %v6104_v3 }
 0x4d4   :  { %2290 = vmatprep.subr.bf16.mxu0 %v6105_v58  ;;  %2331 = vmatprep.subr.bf16.mxu1 %v6106_v28 }
 0x4d7   :  { %2291 = vmatpush1.bf16.msra.mxu0 %v6107_v45  ;;  %2332 = vmatpush1.bf16.msra.mxu1 %v6108_v51 }
 0x4d8   :  { %2292 = vmatprep.subr.bf16.mxu0 %v6109_v49  ;;  %2333 = vmatprep.subr.bf16.mxu1 %v6110_v42 }
 0x4db   :  { %2293 = vmatpush1.bf16.msra.mxu0 %v6111_v53  ;;  %2334 = vmatpush1.bf16.msra.mxu1 %v6112_v48 }
 0x4dc   :  { %2294 = vmatprep.subr.bf16.mxu0 %v6113_v63  ;;  %2335 = vmatprep.subr.bf16.mxu1 %v6204_v12 }
 0x4df   :  { %2295 = vmatpush1.bf16.msra.mxu0 %v6205_v18  ;;  %2336 = vmatpush1.bf16.msra.mxu1 %v6206_v26 }
 0x4e0   :  { %2296 = vmatprep.subr.bf16.mxu0 %v6207_v47  ;;  %2337 = vmatprep.subr.bf16.mxu1 %v6208_v15 }
 0x4e3   :  { %2297 = vmatpush1.bf16.msra.mxu0 %v6209_v25  ;;  %2338 = vmatpush1.bf16.msra.mxu1 %v6210_v35 }
 0x4e4   :  { %2298 = vmatprep.subr.bf16.mxu0 %v6211_v59  ;;  %2339 = vmatprep.subr.bf16.mxu1 %v6212_v41 }
 0x4e7   :  { %2299 = vmatpush1.bf16.msra.mxu0 %v6213_v60  ;;  %2340 = vmatpush1.bf16.msra.mxu1 %v6214_v32 }
 0x4e8   :  { %2300 = vmatprep.subr.bf16.mxu0 %v6215_v1  ;;  %2341 = vmatprep.subr.bf16.mxu1 %v6216_v34 }
 0x4eb   :  { %2301 = vmatpush1.bf16.msra.mxu0 %v6217_v19  ;;  %2342 = vmatpush1.bf16.msra.mxu1 %v6218_v44 }
 0x4ec   :  { %2302 = vmatprep.subr.bf16.mxu0 %v6219_v33  ;;  %2343 = vmatprep.subr.bf16.mxu1 %v6220_v10 }
 0x4ef   :  { %2303 = vmatpush1.bf16.msra.mxu0 %v6221_v40  ;;  %2344 = vmatpush1.bf16.msra.mxu1 %v6132_v14 }
 0x4f0   :  { %2304 = vmatprep.subr.bf16.mxu0 %v6133_v57  ;;  %2345 = vmatprep.subr.bf16.mxu1 %v6134_v37 }
 0x4f3   :  { %2305 = vmatpush1.bf16.msra.mxu0 %v6222_v43  ;;  %2346 = vmatpush1.bf16.msra.mxu1 %v6223_v17 }
 0x4f4   :  { %2306 = vmatprep.subr.bf16.mxu0 %v6137_v24  ;;  %2347 = vmatprep.subr.bf16.mxu1 %v6138_v22  ;;  %v6301_v22 = vld [vmem:[#allocation133_spill] sm:$0xff] }
 0x4f7   :  { %2307 = vmatpush1.bf16.msra.mxu0 %v6139_v20  ;;  %2348 = vmatpush1.bf16.msra.mxu1 %v6140_v13  ;;  %v6225_v13 = vld [vmem:[#allocation154_spill] sm:$0xff]  ;;  %v6300_v20 = vld [vmem:[#allocation87_spill] sm:$0xff] }
 0x4f8   :  { %2308 = vmatprep.subr.bf16.mxu0 %v6141_v31  ;;  %2349 = vmatprep.subr.bf16.mxu1 %v6142_v61  ;;  %v6226_v31 = vld [vmem:[#allocation155_spill] sm:$0xff]  ;;  %v6227_v61 = vld [vmem:[#allocation156_spill] sm:$0xff] }
 0x4fb   :  { %2309 = vmatpush1.bf16.msra.mxu0 %v4629_v29  ;;  %2350 = vmatpush1.bf16.msra.mxu1 %v4631_v46  ;;  %v6228_v29 = vld [vmem:[#allocation157_spill] sm:$0xff]  ;;  %v6229_v46 = vld [vmem:[#allocation158_spill] sm:$0xff] }
 0x4fc   :  { %2310 = vmatprep.subr.bf16.mxu0 %v4635_v8  ;;  %2351 = vmatprep.subr.bf16.mxu1 %v6143_v30  ;;  %v6230_v8 = vld [vmem:[#allocation159_spill] sm:$0xff]  ;;  %v6231_v30 = vld [vmem:[#allocation9_spill] sm:$0xff] }
 0x4ff   :  { %2311 = vmatpush1.bf16.msra.mxu0 %v6144_v38  ;;  %2352 = vmatpush1.bf16.msra.mxu1 %v4643_v0  ;;  %v6232_v38 = vld [vmem:[#allocation12_spill] sm:$0xff] }
 0x500   :  { %2312 = vmatprep.subr.bf16.mxu0 %v4647_v55  ;;  %2353 = vmatprep.subr.bf16.mxu1 %v6224_v23  ;;  %v6233_v23 = vld [vmem:[#allocation10_spill] sm:$0xff]  ;;  %v6242_v55 = vld [vmem:[#allocation19_spill] sm:$0xff] }
 0x503   :  { %2313 = vmatpush1.bf16.msra.mxu0 %v6225_v13  ;;  %2354 = vmatpush1.bf16.msra.mxu1 %v6226_v31  ;;  %v6234_v13 = vld [vmem:[#allocation11_spill] sm:$0xff]  ;;  %v6235_v31 = vld [vmem:[#allocation13_spill] sm:$0xff] }
 0x504   :  { %2314 = vmatprep.subr.bf16.mxu0 %v6227_v61  ;;  %2355 = vmatprep.subr.bf16.mxu1 %v6228_v29  ;;  %v6236_v61 = vld [vmem:[#allocation16_spill] sm:$0xff]  ;;  %v6237_v29 = vld [vmem:[#allocation14_spill] sm:$0xff] }
 0x507   :  { %2315 = vmatpush1.bf16.msra.mxu0 %v6229_v46  ;;  %2356 = vmatpush1.bf16.msra.mxu1 %v6230_v8  ;;  %v6238_v46 = vld [vmem:[#allocation15_spill] sm:$0xff]  ;;  %v6239_v8 = vld [vmem:[#allocation17_spill] sm:$0xff] }
 0x508   :  { %2428 = vmatprep.subr.bf16.mxu0 %v6231_v30  ;;  %2469 = vmatprep.subr.bf16.mxu1 %v6232_v38  ;;  %v6240_v30 = vld [vmem:[#allocation20_spill] sm:$0xff]  ;;  %v6241_v38 = vld [vmem:[#allocation18_spill] sm:$0xff] }
 0x50a   :  { %2317 = vmatmul.mubr.bf16.vlgmr.msra.gmra.mrb[44].mxu0 %v4920_v27  ;;  %2358 = vmatmul.mubr.bf16.vlgmr.msra.gmra.mrb[44].mxu1 %v4920_v27  ;;  %v6243_v27 = vld [vmem:[#allocation21_spill] sm:$0xff] }
 0x50b   :  { %2429 = vmatpush1.bf16.msra.mxu0 %v6233_v23  ;;  %2470 = vmatpush1.bf16.msra.mxu1 %v6234_v13  ;;  %v6244_v23 = vld [vmem:[#allocation24_spill] sm:$0xff]  ;;  %v6245_v13 = vld [vmem:[#allocation22_spill] sm:$0xff] }
 0x50c   :  { %2430 = vmatprep.subr.bf16.mxu0 %v6235_v31  ;;  %2471 = vmatprep.subr.bf16.mxu1 %v6236_v61  ;;  %v6246_v31 = vld [vmem:[#allocation23_spill] sm:$0xff]  ;;  %v6247_v61 = vld [vmem:[#allocation25_spill] sm:$0xff] }
 0x50f   :  { %2431 = vmatpush1.bf16.msra.mxu0 %v6237_v29  ;;  %2472 = vmatpush1.bf16.msra.mxu1 %v6238_v46  ;;  %v6248_v29 = vld [vmem:[#allocation28_spill] sm:$0xff]  ;;  %v6249_v46 = vld [vmem:[#allocation26_spill] sm:$0xff] }
 0x510   :  { %2432 = vmatprep.subr.bf16.mxu0 %v6239_v8  ;;  %2473 = vmatprep.subr.bf16.mxu1 %v6240_v30  ;;  %v6250_v8 = vld [vmem:[#allocation27_spill] sm:$0xff]  ;;  %v6251_v30 = vld [vmem:[#allocation30_spill] sm:$0xff] }
 0x513   :  { %2433 = vmatpush1.bf16.msra.mxu0 %v6241_v38  ;;  %2474 = vmatpush1.bf16.msra.mxu1 %v6242_v55  ;;  %v6252_v38 = vld [vmem:[#allocation32_spill] sm:$0xff]  ;;  %v6253_v55 = vld [vmem:[#allocation29_spill] sm:$0xff] }
 0x514   :  { %2434 = vmatprep.subr.bf16.mxu0 %v6243_v27  ;;  %2475 = vmatprep.subr.bf16.mxu1 %v6244_v23  ;;  %v6254_v27 = vld [vmem:[#allocation31_spill] sm:$0xff]  ;;  %v6255_v23 = vld [vmem:[#allocation33_spill] sm:$0xff] }
 0x517   :  { %2435 = vmatpush1.bf16.msra.mxu0 %v6245_v13  ;;  %2476 = vmatpush1.bf16.msra.mxu1 %v6246_v31  ;;  %v6256_v13 = vld [vmem:[#allocation34_spill] sm:$0xff]  ;;  %v6257_v31 = vld [vmem:[#allocation35_spill] sm:$0xff] }
 0x518   :  { %2436 = vmatprep.subr.bf16.mxu0 %v6247_v61  ;;  %2477 = vmatprep.subr.bf16.mxu1 %v6248_v29  ;;  %v6258_v61 = vld [vmem:[#allocation36_spill] sm:$0xff]  ;;  %v6259_v29 = vld [vmem:[#allocation37_spill] sm:$0xff] }
 0x51b   :  { %2437 = vmatpush1.bf16.msra.mxu0 %v6249_v46  ;;  %2478 = vmatpush1.bf16.msra.mxu1 %v6250_v8  ;;  %v6260_v46 = vld [vmem:[#allocation38_spill] sm:$0xff]  ;;  %v6261_v8 = vld [vmem:[#allocation40_spill] sm:$0xff] }
 0x51c   :  { %2438 = vmatprep.subr.bf16.mxu0 %v6251_v30  ;;  %2479 = vmatprep.subr.bf16.mxu1 %v6252_v38  ;;  %v6262_v30 = vld [vmem:[#allocation41_spill] sm:$0xff] }
 0x51d   :  { %v6263_v38 = vld [vmem:[#allocation101_spill] sm:$0xff] }
 0x51f   :  { %2439 = vmatpush1.bf16.msra.mxu0 %v6253_v55  ;;  %2480 = vmatpush1.bf16.msra.mxu1 %v6254_v27  ;;  %v6264_v55 = vld [vmem:[#allocation102_spill] sm:$0xff]  ;;  %v6265_v27 = vld [vmem:[#allocation103_spill] sm:$0xff] }
 0x520   :  { %2440 = vmatprep.subr.bf16.mxu0 %v6255_v23  ;;  %2481 = vmatprep.subr.bf16.mxu1 %v6256_v13  ;;  %v6266_v23 = vld [vmem:[#allocation104_spill] sm:$0xff]  ;;  %v6267_v13 = vld [vmem:[#allocation105_spill] sm:$0xff] }
 0x523   :  { %2441 = vmatpush1.bf16.msra.mxu0 %v6257_v31  ;;  %2482 = vmatpush1.bf16.msra.mxu1 %v6258_v61  ;;  %v6268_v31 = vld [vmem:[#allocation106_spill] sm:$0xff]  ;;  %v6269_v61 = vld [vmem:[#allocation107_spill] sm:$0xff] }
 0x524   :  { %2442 = vmatprep.subr.bf16.mxu0 %v6259_v29  ;;  %2483 = vmatprep.subr.bf16.mxu1 %v6260_v46  ;;  %v6270_v29 = vld [vmem:[#allocation108_spill] sm:$0xff]  ;;  %v6271_v46 = vld [vmem:[#allocation109_spill] sm:$0xff] }
 0x527   :  { %2443 = vmatpush1.bf16.msra.mxu0 %v6261_v8  ;;  %2484 = vmatpush1.bf16.msra.mxu1 %v6262_v30  ;;  %v6272_v8 = vld [vmem:[#allocation110_spill] sm:$0xff]  ;;  %v6273_v30 = vld [vmem:[#allocation111_spill] sm:$0xff] }
 0x528   :  { %2444 = vmatprep.subr.bf16.mxu0 %v6263_v38  ;;  %2485 = vmatprep.subr.bf16.mxu1 %v6264_v55  ;;  %v6274_v38 = vld [vmem:[#allocation112_spill] sm:$0xff]  ;;  %v6275_v55 = vld [vmem:[#allocation113_spill] sm:$0xff] }
 0x52b   :  { %2445 = vmatpush1.bf16.msra.mxu0 %v6265_v27  ;;  %2486 = vmatpush1.bf16.msra.mxu1 %v6266_v23  ;;  %v6276_v27 = vld [vmem:[#allocation114_spill] sm:$0xff]  ;;  %v6277_v23 = vld [vmem:[#allocation115_spill] sm:$0xff] }
 0x52c   :  { %2446 = vmatprep.subr.bf16.mxu0 %v6267_v13  ;;  %2487 = vmatprep.subr.bf16.mxu1 %v6268_v31  ;;  %v6278_v13 = vld [vmem:[#allocation116_spill] sm:$0xff]  ;;  %v6279_v31 = vld [vmem:[#allocation117_spill] sm:$0xff] }
 0x52f   :  { %2447 = vmatpush1.bf16.msra.mxu0 %v6269_v61  ;;  %2488 = vmatpush1.bf16.msra.mxu1 %v6270_v29  ;;  %v6280_v61 = vld [vmem:[#allocation118_spill] sm:$0xff]  ;;  %v6281_v29 = vld [vmem:[#allocation119_spill] sm:$0xff] }
 0x530   :  { %2448 = vmatprep.subr.bf16.mxu0 %v6271_v46  ;;  %2489 = vmatprep.subr.bf16.mxu1 %v6272_v8  ;;  %v6282_v46 = vld [vmem:[#allocation120_spill] sm:$0xff]  ;;  %v6283_v8 = vld [vmem:[#allocation121_spill] sm:$0xff] }
 0x533   :  { %2449 = vmatpush1.bf16.msra.mxu0 %v6273_v30  ;;  %2490 = vmatpush1.bf16.msra.mxu1 %v6274_v38  ;;  %v6284_v30 = vld [vmem:[#allocation123_spill] sm:$0xff]  ;;  %v6285_v38 = vld [vmem:[#allocation122_spill] sm:$0xff] }
 0x534   :  { %2450 = vmatprep.subr.bf16.mxu0 %v6275_v55  ;;  %2491 = vmatprep.subr.bf16.mxu1 %v6276_v27  ;;  %v6286_v55 = vld [vmem:[#allocation124_spill] sm:$0xff]  ;;  %v6287_v27 = vld [vmem:[#allocation125_spill] sm:$0xff] }
 0x537   :  { %2451 = vmatpush1.bf16.msra.mxu0 %v6277_v23  ;;  %2492 = vmatpush1.bf16.msra.mxu1 %v6278_v13  ;;  %v6288_v23 = vld [vmem:[#allocation126_spill] sm:$0xff]  ;;  %v6289_v13 = vld [vmem:[#allocation127_spill] sm:$0xff] }
 0x538   :  { %2452 = vmatprep.subr.bf16.mxu0 %v6279_v31  ;;  %2493 = vmatprep.subr.bf16.mxu1 %v6280_v61  ;;  %v6290_v31 = vld [vmem:[#allocation128_spill] sm:$0xff]  ;;  %v6291_v61 = vld [vmem:[#allocation129_spill] sm:$0xff] }
 0x53b   :  { %2453 = vmatpush1.bf16.msra.mxu0 %v6281_v29  ;;  %2494 = vmatpush1.bf16.msra.mxu1 %v6282_v46  ;;  %v6292_v29 = vld [vmem:[#allocation130_spill] sm:$0xff]  ;;  %v6293_v46 = vld [vmem:[#allocation131_spill] sm:$0xff] }
 0x53c   :  { %2454 = vmatprep.subr.bf16.mxu0 %v6283_v8  ;;  %2495 = vmatprep.subr.bf16.mxu1 %v6284_v30  ;;  %v6294_v8 = vld [vmem:[#allocation132_spill] sm:$0xff]  ;;  %v6295_v30 = vld [vmem:[#allocation42_spill] sm:$0xff] }
 0x53f   :  { %2455 = vmatpush1.bf16.msra.mxu0 %v6285_v38  ;;  %2496 = vmatpush1.bf16.msra.mxu1 %v6286_v55  ;;  %v6296_v38 = vld [vmem:[#allocation43_spill] sm:$0xff]  ;;  %v6297_v55 = vld [vmem:[#allocation44_spill] sm:$0xff] }
 0x540   :  { %2456 = vmatprep.subr.bf16.mxu0 %v6287_v27  ;;  %2497 = vmatprep.subr.bf16.mxu1 %v6288_v23  ;;  %v6298_v27 = vld [vmem:[#allocation85_spill] sm:$0xff]  ;;  %v6299_v23 = vld [vmem:[#allocation47_spill] sm:$0xff] }
 0x541   :  { %v217_v0 = vadd.f32 %v6298_v27, %v6297_v55 }
 0x543   :  { %2457 = vmatpush1.bf16.msra.mxu0 %v6289_v13  ;;  %2498 = vmatpush1.bf16.msra.mxu1 %v6290_v31  ;;  %v290_v13 = vadd.f32 %v6300_v20, %v6299_v23  ;;  %v6302_v31 = vld [vmem:[#allocation86_spill] sm:$0xff] }
 0x544   :  { %2458 = vmatprep.subr.bf16.mxu0 %v6291_v61  ;;  %2499 = vmatprep.subr.bf16.mxu1 %v6292_v29  ;;  %v219_v24 = vadd.f32 %v6302_v31, %v6301_v22  ;;  %v6303_v61 = vld [vmem:[#allocation89_spill] sm:$0xff] }
 0x545   :  { %v292_v29 = vadd.f32 %v6303_v61, %v4208_v54 }
 0x547   :  { %2459 = vmatpush1.bf16.msra.mxu0 %v6293_v46  ;;  %2500 = vmatpush1.bf16.msra.mxu1 %v6294_v8 }
 0x548   :  { %2510 = vmatprep.subr.bf16.mxu0 %v6295_v30  ;;  %2551 = vmatprep.subr.bf16.mxu1 %v6296_v38 }
 0x59d   :  { %v2236_v17 = vpop.f32.mrb[40].mxu0  ;;  %v2277_v46 = vpop.f32.mrb[40].mxu1 }
 0x59e   :  { %v2398_v43 = vadd.f32 %v2236_v17, %v217_v0  ;;  %v2400_v8 = vadd.f32 %v2277_v46, %v290_v13  ;;  %v2238_v37 = vpop.f32.mrb[41].mxu0  ;;  %v2279_v30 = vpop.f32.mrb[41].mxu1 }
 0x59f   :  { %v2399_v57 = vadd.f32 %v2238_v37, %v219_v24  ;;  %v2401_v38 = vadd.f32 %v2279_v30, %v292_v29  ;;  %v2240_v14 = vpop.f32.mrb[42].mxu0  ;;  %v2281_v40 = vpop.f32.mrb[42].mxu1 }
 0x5a0   :  { %v3576_v27 = vmul.f32 -1.442695, %v2398_v43  ;;  %v2241_v55 = vpop.f32.mrb[43].mxu0  ;;  %v2282_v10 = vpop.f32.mrb[43].mxu1 }
 0x5a1   :  { %v3578_v20 = vmul.f32 -1.442695, %v2399_v57 }
 0x5a2   :  { %3773 = vpow2.f32 %v3576_v27 }
 0x5a3   :  { %3775 = vpow2.f32 %v3578_v20  ;;  %v3577_v20 = vmul.f32 -1.442695, %v2401_v38 }
 0x5a4   :  { %3777 = vtanh.f32 %v2400_v8 }
 0x5ac   :  { %v3774_v31 = vpop.eup %3773 }
 0x5ad   :  { %v3776_v22 = vpop.eup %3775  ;;  %v2405_v23 = vadd.f32 1.0, %v3774_v31 }
 0x5ae   :  { %v2418_v61 = vadd.f32 1.0, %v3776_v22  ;;  %v3778_v46 = vpop.eup %3777 }
 0x5af   :  { %3779 = vrcp.f32 %v2405_v23 }
 0x5b0   :  { %3781 = vrcp.f32 %v2418_v61 }
 0x5b9   :  { %v3780_v0 = vpop.eup %3779 }
 0x5ba   :  { %v3782_v13 = vpop.eup %3781  ;;  %v2422_v24 = vmul.f32 %v3780_v0, %v3778_v46 }
 0x5bb   :  { %v2421_v29 = vmul.f32 %v3782_v13, %v4909_v36 }
 0x5bd   :  { %v5063_v14 = vadd.f32 %v2422_v24, %v2421_v29 }
 0x5dd   :  { %v2318_v55 = vpop.f32.mrb[44].mxu0  ;;  %v2359_v37 = vpop.f32.mrb[44].mxu1 }
 0x5de   :  { %v2366_v57 = vadd.f32 %v2318_v55, %v4521_v11  ;;  %v2320_v30 = vpop.f32.mrb[45].mxu0  ;;  %v2361_v10 = vpop.f32.mrb[45].mxu1  ;;  %v2368_v61 = vadd.f32 %v2359_v37, %v4536_v5 }
 0x5df   :  { %v2367_v40 = vadd.f32 %v2320_v30, %v4755_v52  ;;  %v2322_v8 = vpop.f32.mrb[46].mxu0  ;;  %v2363_v22 = vpop.f32.mrb[46].mxu1  ;;  %v2369_v36 = vadd.f32 %v2361_v10, %v4530_v21 }
 0x5e0   :  { %v3573_v43 = vmul.f32 -1.442695, %v2366_v57  ;;  %v2323_v17 = vpop.f32.mrb[47].mxu0  ;;  %v2364_v23 = vpop.f32.mrb[47].mxu1 }
 0x5e1   :  { %v3575_v27 = vmul.f32 -1.442695, %v2367_v40  ;;  %v3574_v31 = vmul.f32 -1.442695, %v2369_v36 }
 0x5e2   :  { %3783 = vpow2.f32 %v3573_v43 }
 0x5e3   :  { %3785 = vpow2.f32 %v3575_v27 }
 0x5e4   :  { %3787 = vpow2.f32 %v3577_v20 }
 0x5e5   :  { %3789 = vpow2.f32 %v3574_v31 }
 0x5e6   :  { %3791 = vtanh.f32 %v2368_v61 }
 0x5ec   :  { %v3784_v46 = vpop.eup %3783 }
 0x5ed   :  { %v3786_v0 = vpop.eup %3785  ;;  %v2373_v13 = vadd.f32 1.0, %v3784_v46  ;;  %v6305_v46 = vld [vmem:[#allocation54_spill] sm:$0xff] }
 0x5ee   :  { %v2386_v24 = vadd.f32 1.0, %v3786_v0  ;;  %v3788_v29 = vpop.eup %3787  ;;  %v6306_v0 = vld [vmem:[#allocation135_spill] sm:$0xff] }
 0x5ef   :  { %3793 = vrcp.f32 %v2373_v13  ;;  %v3790_v55 = vpop.eup %3789  ;;  %v2412_v40 = vadd.f32 1.0, %v3788_v29  ;;  %v6307_v13 = vld [vmem:[#allocation136_spill] sm:$0xff]  ;;  %v6309_v29 = vld [vmem:[#allocation138_spill] sm:$0xff] }
 0x5f0   :  { %3795 = vrcp.f32 %v2386_v24  ;;  %v3792_v57 = vpop.eup %3791  ;;  %v2380_v38 = vadd.f32 1.0, %v3790_v55  ;;  %v6308_v24 = vld [vmem:[#allocation137_spill] sm:$0xff]  ;;  %v6310_v55 = vld [vmem:[#allocation139_spill] sm:$0xff] }
 0x5f1   :  { %3797 = vtanh.f32 %v5063_v14 }
 0x5f2   :  { %3799 = vrcp.f32 %v2412_v40  ;;  %v6313_v40 = vld [vmem:[#allocation142_spill] sm:$0xff] }
 0x5f3   :  { %3801 = vrcp.f32 %v2380_v38  ;;  %v6316_v38 = vld [vmem:[#allocation145_spill] sm:$0xff] }
 0x5f9   :  { %v3794_v30 = vpop.eup %3793 }
 0x5fa   :  { %v3796_v8 = vpop.eup %3795  ;;  %v2390_v10 = vmul.f32 %v3794_v30, %v3792_v57  ;;  %v6311_v57 = vld [vmem:[#allocation140_spill] sm:$0xff]  ;;  %v6312_v30 = vld [vmem:[#allocation141_spill] sm:$0xff] }
 0x5fb   :  { %v2389_v22 = vmul.f32 %v3796_v8, %v4917_v9  ;;  %v3798_v43 = vpop.eup %3797  ;;  %v6304_v9 = vld [vmem:[#allocation53_spill] sm:$0xff]  ;;  %v6314_v8 = vld [vmem:[#allocation143_spill] sm:$0xff] }
 0x5fc   :  { %v3800_v17 = vpop.eup %3799 }
 0x5fd   :  { %v5071_v37 = vadd.f32 %v2390_v10, %v2389_v22  ;;  %v3802_v23 = vpop.eup %3801  ;;  %v2425_v36 = vmul.f32 %v3800_v17, %v3798_v43  ;;  %v6315_v10 = vld [vmem:[#allocation144_spill] sm:$0xff]  ;;  %v6317_v22 = vld [vmem:[#allocation146_spill] sm:$0xff]  ;;  %v6318_v43 = vld [vmem:[#allocation147_spill] sm:$0xff] }
 0x5fe   :  { %v6319_v17 = vld [vmem:[#allocation148_spill] sm:$0xff] }
 0x5ff   :  { %3803 = vtanh.f32 %v5071_v37  ;;  %v5074_v61 = vpack.c.bf16 %v2425_v36, %v2425_v36  ;;  %v6322_v36 = vld [vmem:[#allocation151_spill] sm:$0xff] }
 0x609   :  { %v3804_v27 = vpop.eup %3803 }
 0x60a   :  { %v2393_v20 = vmul.f32 %v3804_v27, %v3802_v23  ;;  %v6320_v23 = vld [vmem:[#allocation149_spill] sm:$0xff]  ;;  %v6321_v27 = vld [vmem:[#allocation150_spill] sm:$0xff] }
 0x60c   :  { %v2427_v31 = vpack.c.bf16 %v2393_v20, %v2393_v20  ;;  %v6323_v20 = vld [vmem:[#allocation152_spill] sm:$0xff] }
 0x60e   :  { %2460 = vmatprep.mubr.bf16.mxu0 %v2427_v31  ;;  %2501 = vmatprep.mubr.bf16.mxu1 %v2427_v31 }
 0x60f   :  { %2461 = vmatmul.mubr.bf16.vlgmr.msra.gmra.mrb[48].mxu0 %v5074_v61  ;;  %2502 = vmatmul.mubr.bf16.vlgmr.msra.gmra.mrb[48].mxu1 %v5074_v61 }
 0x610   :  { %2511 = vmatpush1.bf16.msra.mxu0 %v4161_v16  ;;  %2552 = vmatpush1.bf16.msra.mxu1 %v6006_v7 }
 0x611   :  { %2542 = vmatprep.mubr.bf16.mxu0 %v2427_v31  ;;  %2583 = vmatprep.mubr.bf16.mxu1 %v2427_v31  ;;  %v6324_v31 = vld [vmem:[#allocation153_spill] sm:$0xff] }
 0x612   :  { %2512 = vmatprep.subr.bf16.mxu0 %v6007_v4  ;;  %2553 = vmatprep.subr.bf16.mxu1 %v6008_v62 }
 0x614   :  { %2513 = vmatpush1.bf16.msra.mxu0 %v6009_v6  ;;  %2554 = vmatpush1.bf16.msra.mxu1 %v6010_v50 }
 0x615   :  { %2514 = vmatprep.subr.bf16.mxu0 %v6011_v2  ;;  %2555 = vmatprep.subr.bf16.mxu1 %v6012_v39 }
 0x618   :  { %2515 = vmatpush1.bf16.msra.mxu0 %v6103_v56  ;;  %2556 = vmatpush1.bf16.msra.mxu1 %v6104_v3 }
 0x619   :  { %2516 = vmatprep.subr.bf16.mxu0 %v6105_v58  ;;  %2557 = vmatprep.subr.bf16.mxu1 %v6106_v28 }
 0x61c   :  { %2517 = vmatpush1.bf16.msra.mxu0 %v6107_v45  ;;  %2558 = vmatpush1.bf16.msra.mxu1 %v6108_v51 }
 0x61d   :  { %2518 = vmatprep.subr.bf16.mxu0 %v6109_v49  ;;  %2559 = vmatprep.subr.bf16.mxu1 %v6110_v42 }
 0x620   :  { %2519 = vmatpush1.bf16.msra.mxu0 %v6111_v53  ;;  %2560 = vmatpush1.bf16.msra.mxu1 %v6112_v48 }
 0x621   :  { %2520 = vmatprep.subr.bf16.mxu0 %v6113_v63  ;;  %2561 = vmatprep.subr.bf16.mxu1 %v6204_v12 }
 0x624   :  { %2521 = vmatpush1.bf16.msra.mxu0 %v6205_v18  ;;  %2562 = vmatpush1.bf16.msra.mxu1 %v6206_v26 }
 0x625   :  { %2522 = vmatprep.subr.bf16.mxu0 %v6207_v47  ;;  %2563 = vmatprep.subr.bf16.mxu1 %v6208_v15 }
 0x628   :  { %2523 = vmatpush1.bf16.msra.mxu0 %v6209_v25  ;;  %2564 = vmatpush1.bf16.msra.mxu1 %v6210_v35 }
 0x629   :  { %2524 = vmatprep.subr.bf16.mxu0 %v6211_v59  ;;  %2565 = vmatprep.subr.bf16.mxu1 %v6212_v41 }
 0x62c   :  { %2525 = vmatpush1.bf16.msra.mxu0 %v6213_v60  ;;  %2566 = vmatpush1.bf16.msra.mxu1 %v6214_v32 }
 0x62d   :  { %2526 = vmatprep.subr.bf16.mxu0 %v6215_v1  ;;  %2567 = vmatprep.subr.bf16.mxu1 %v6216_v34 }
 0x630   :  { %2527 = vmatpush1.bf16.msra.mxu0 %v6217_v19  ;;  %2568 = vmatpush1.bf16.msra.mxu1 %v6218_v44 }
 0x631   :  { %2528 = vmatprep.subr.bf16.mxu0 %v6219_v33  ;;  %2569 = vmatprep.subr.bf16.mxu1 %v6304_v9 }
 0x634   :  { %2529 = vmatpush1.bf16.msra.mxu0 %v6305_v46  ;;  %2570 = vmatpush1.bf16.msra.mxu1 %v6306_v0 }
 0x635   :  { %2530 = vmatprep.subr.bf16.mxu0 %v6307_v13  ;;  %2571 = vmatprep.subr.bf16.mxu1 %v6308_v24 }
 0x638   :  { %2531 = vmatpush1.bf16.msra.mxu0 %v6309_v29  ;;  %2572 = vmatpush1.bf16.msra.mxu1 %v6310_v55 }
 0x639   :  { %2532 = vmatprep.subr.bf16.mxu0 %v6311_v57  ;;  %2573 = vmatprep.subr.bf16.mxu1 %v6312_v30  ;;  %v6401_v30 = vld [vmem:[#allocation133_spill] sm:$0xff] }
 0x63c   :  { %2533 = vmatpush1.bf16.msra.mxu0 %v6313_v40  ;;  %2574 = vmatpush1.bf16.msra.mxu1 %v6314_v8  ;;  %v6325_v8 = vld [vmem:[#allocation154_spill] sm:$0xff]  ;;  %v6400_v40 = vld [vmem:[#allocation91_spill] sm:$0xff] }
 0x63d   :  { %2534 = vmatprep.subr.bf16.mxu0 %v6315_v10  ;;  %2575 = vmatprep.subr.bf16.mxu1 %v6316_v38  ;;  %v6326_v10 = vld [vmem:[#allocation155_spill] sm:$0xff]  ;;  %v6327_v38 = vld [vmem:[#allocation156_spill] sm:$0xff] }
 0x640   :  { %2535 = vmatpush1.bf16.msra.mxu0 %v6317_v22  ;;  %2576 = vmatpush1.bf16.msra.mxu1 %v6318_v43  ;;  %v6328_v22 = vld [vmem:[#allocation157_spill] sm:$0xff]  ;;  %v6329_v43 = vld [vmem:[#allocation158_spill] sm:$0xff] }
 0x641   :  { %2536 = vmatprep.subr.bf16.mxu0 %v6319_v17  ;;  %2577 = vmatprep.subr.bf16.mxu1 %v6320_v23  ;;  %v6330_v17 = vld [vmem:[#allocation159_spill] sm:$0xff]  ;;  %v6331_v23 = vld [vmem:[#allocation9_spill] sm:$0xff] }
 0x644   :  { %2537 = vmatpush1.bf16.msra.mxu0 %v6321_v27  ;;  %2578 = vmatpush1.bf16.msra.mxu1 %v6322_v36  ;;  %v6332_v27 = vld [vmem:[#allocation12_spill] sm:$0xff] }
 0x645   :  { %2538 = vmatprep.subr.bf16.mxu0 %v6323_v20  ;;  %2579 = vmatprep.subr.bf16.mxu1 %v6324_v31  ;;  %v6333_v31 = vld [vmem:[#allocation10_spill] sm:$0xff]  ;;  %v6342_v20 = vld [vmem:[#allocation19_spill] sm:$0xff] }
 0x648   :  { %2539 = vmatpush1.bf16.msra.mxu0 %v6325_v8  ;;  %2580 = vmatpush1.bf16.msra.mxu1 %v6326_v10  ;;  %v6334_v8 = vld [vmem:[#allocation11_spill] sm:$0xff]  ;;  %v6335_v10 = vld [vmem:[#allocation13_spill] sm:$0xff] }
 0x649   :  { %2540 = vmatprep.subr.bf16.mxu0 %v6327_v38  ;;  %2581 = vmatprep.subr.bf16.mxu1 %v6328_v22  ;;  %v6336_v38 = vld [vmem:[#allocation16_spill] sm:$0xff]  ;;  %v6337_v22 = vld [vmem:[#allocation14_spill] sm:$0xff] }
 0x64c   :  { %2541 = vmatpush1.bf16.msra.mxu0 %v6329_v43  ;;  %2582 = vmatpush1.bf16.msra.mxu1 %v6330_v17  ;;  %v6338_v43 = vld [vmem:[#allocation15_spill] sm:$0xff]  ;;  %v6339_v17 = vld [vmem:[#allocation17_spill] sm:$0xff] }
 0x64d   :  { %2654 = vmatprep.subr.bf16.mxu0 %v6331_v23  ;;  %2695 = vmatprep.subr.bf16.mxu1 %v6332_v27  ;;  %v6340_v23 = vld [vmem:[#allocation20_spill] sm:$0xff]  ;;  %v6341_v27 = vld [vmem:[#allocation18_spill] sm:$0xff] }
 0x64f   :  { %2543 = vmatmul.mubr.bf16.vlgmr.msra.gmra.mrb[52].mxu0 %v5074_v61  ;;  %2584 = vmatmul.mubr.bf16.vlgmr.msra.gmra.mrb[52].mxu1 %v5074_v61  ;;  %v6343_v61 = vld [vmem:[#allocation21_spill] sm:$0xff] }
 0x650   :  { %2655 = vmatpush1.bf16.msra.mxu0 %v6333_v31  ;;  %2696 = vmatpush1.bf16.msra.mxu1 %v6334_v8  ;;  %v6344_v31 = vld [vmem:[#allocation24_spill] sm:$0xff]  ;;  %v6345_v8 = vld [vmem:[#allocation22_spill] sm:$0xff] }
 0x651   :  { %2656 = vmatprep.subr.bf16.mxu0 %v6335_v10  ;;  %2697 = vmatprep.subr.bf16.mxu1 %v6336_v38  ;;  %v6346_v10 = vld [vmem:[#allocation23_spill] sm:$0xff]  ;;  %v6347_v38 = vld [vmem:[#allocation25_spill] sm:$0xff] }
 0x654   :  { %2657 = vmatpush1.bf16.msra.mxu0 %v6337_v22  ;;  %2698 = vmatpush1.bf16.msra.mxu1 %v6338_v43  ;;  %v6348_v22 = vld [vmem:[#allocation28_spill] sm:$0xff]  ;;  %v6349_v43 = vld [vmem:[#allocation26_spill] sm:$0xff] }
 0x655   :  { %2658 = vmatprep.subr.bf16.mxu0 %v6339_v17  ;;  %2699 = vmatprep.subr.bf16.mxu1 %v6340_v23  ;;  %v6350_v17 = vld [vmem:[#allocation27_spill] sm:$0xff]  ;;  %v6351_v23 = vld [vmem:[#allocation30_spill] sm:$0xff] }
 0x658   :  { %2659 = vmatpush1.bf16.msra.mxu0 %v6341_v27  ;;  %2700 = vmatpush1.bf16.msra.mxu1 %v6342_v20  ;;  %v6352_v27 = vld [vmem:[#allocation32_spill] sm:$0xff]  ;;  %v6353_v20 = vld [vmem:[#allocation29_spill] sm:$0xff] }
 0x659   :  { %2660 = vmatprep.subr.bf16.mxu0 %v6343_v61  ;;  %2701 = vmatprep.subr.bf16.mxu1 %v6344_v31  ;;  %v6354_v61 = vld [vmem:[#allocation31_spill] sm:$0xff]  ;;  %v6355_v31 = vld [vmem:[#allocation33_spill] sm:$0xff] }
 0x65c   :  { %2661 = vmatpush1.bf16.msra.mxu0 %v6345_v8  ;;  %2702 = vmatpush1.bf16.msra.mxu1 %v6346_v10  ;;  %v6356_v8 = vld [vmem:[#allocation34_spill] sm:$0xff]  ;;  %v6357_v10 = vld [vmem:[#allocation35_spill] sm:$0xff] }
 0x65d   :  { %2662 = vmatprep.subr.bf16.mxu0 %v6347_v38  ;;  %2703 = vmatprep.subr.bf16.mxu1 %v6348_v22  ;;  %v6358_v38 = vld [vmem:[#allocation36_spill] sm:$0xff]  ;;  %v6359_v22 = vld [vmem:[#allocation37_spill] sm:$0xff] }
 0x660   :  { %2663 = vmatpush1.bf16.msra.mxu0 %v6349_v43  ;;  %2704 = vmatpush1.bf16.msra.mxu1 %v6350_v17  ;;  %v6360_v43 = vld [vmem:[#allocation38_spill] sm:$0xff]  ;;  %v6361_v17 = vld [vmem:[#allocation40_spill] sm:$0xff] }
 0x661   :  { %2664 = vmatprep.subr.bf16.mxu0 %v6351_v23  ;;  %2705 = vmatprep.subr.bf16.mxu1 %v6352_v27  ;;  %v6362_v23 = vld [vmem:[#allocation41_spill] sm:$0xff] }
 0x662   :  { %v6363_v27 = vld [vmem:[#allocation101_spill] sm:$0xff] }
 0x664   :  { %2665 = vmatpush1.bf16.msra.mxu0 %v6353_v20  ;;  %2706 = vmatpush1.bf16.msra.mxu1 %v6354_v61  ;;  %v6364_v20 = vld [vmem:[#allocation102_spill] sm:$0xff]  ;;  %v6365_v61 = vld [vmem:[#allocation103_spill] sm:$0xff] }
 0x665   :  { %2666 = vmatprep.subr.bf16.mxu0 %v6355_v31  ;;  %2707 = vmatprep.subr.bf16.mxu1 %v6356_v8  ;;  %v6366_v31 = vld [vmem:[#allocation104_spill] sm:$0xff]  ;;  %v6367_v8 = vld [vmem:[#allocation105_spill] sm:$0xff] }
 0x668   :  { %2667 = vmatpush1.bf16.msra.mxu0 %v6357_v10  ;;  %2708 = vmatpush1.bf16.msra.mxu1 %v6358_v38  ;;  %v6368_v10 = vld [vmem:[#allocation106_spill] sm:$0xff]  ;;  %v6369_v38 = vld [vmem:[#allocation107_spill] sm:$0xff] }
 0x669   :  { %2668 = vmatprep.subr.bf16.mxu0 %v6359_v22  ;;  %2709 = vmatprep.subr.bf16.mxu1 %v6360_v43  ;;  %v6370_v22 = vld [vmem:[#allocation108_spill] sm:$0xff]  ;;  %v6371_v43 = vld [vmem:[#allocation109_spill] sm:$0xff] }
 0x66c   :  { %2669 = vmatpush1.bf16.msra.mxu0 %v6361_v17  ;;  %2710 = vmatpush1.bf16.msra.mxu1 %v6362_v23  ;;  %v6372_v17 = vld [vmem:[#allocation110_spill] sm:$0xff]  ;;  %v6373_v23 = vld [vmem:[#allocation111_spill] sm:$0xff] }
 0x66d   :  { %2670 = vmatprep.subr.bf16.mxu0 %v6363_v27  ;;  %2711 = vmatprep.subr.bf16.mxu1 %v6364_v20  ;;  %v6374_v27 = vld [vmem:[#allocation112_spill] sm:$0xff]  ;;  %v6375_v20 = vld [vmem:[#allocation113_spill] sm:$0xff] }
 0x670   :  { %2671 = vmatpush1.bf16.msra.mxu0 %v6365_v61  ;;  %2712 = vmatpush1.bf16.msra.mxu1 %v6366_v31  ;;  %v6376_v61 = vld [vmem:[#allocation114_spill] sm:$0xff]  ;;  %v6377_v31 = vld [vmem:[#allocation115_spill] sm:$0xff] }
 0x671   :  { %2672 = vmatprep.subr.bf16.mxu0 %v6367_v8  ;;  %2713 = vmatprep.subr.bf16.mxu1 %v6368_v10  ;;  %v6378_v8 = vld [vmem:[#allocation116_spill] sm:$0xff]  ;;  %v6379_v10 = vld [vmem:[#allocation117_spill] sm:$0xff] }
 0x674   :  { %2673 = vmatpush1.bf16.msra.mxu0 %v6369_v38  ;;  %2714 = vmatpush1.bf16.msra.mxu1 %v6370_v22  ;;  %v6380_v38 = vld [vmem:[#allocation118_spill] sm:$0xff]  ;;  %v6381_v22 = vld [vmem:[#allocation119_spill] sm:$0xff] }
 0x675   :  { %2674 = vmatprep.subr.bf16.mxu0 %v6371_v43  ;;  %2715 = vmatprep.subr.bf16.mxu1 %v6372_v17  ;;  %v6382_v43 = vld [vmem:[#allocation120_spill] sm:$0xff]  ;;  %v6383_v17 = vld [vmem:[#allocation121_spill] sm:$0xff] }
 0x678   :  { %2675 = vmatpush1.bf16.msra.mxu0 %v6373_v23  ;;  %2716 = vmatpush1.bf16.msra.mxu1 %v6374_v27  ;;  %v6384_v23 = vld [vmem:[#allocation123_spill] sm:$0xff]  ;;  %v6385_v27 = vld [vmem:[#allocation122_spill] sm:$0xff] }
 0x679   :  { %2676 = vmatprep.subr.bf16.mxu0 %v6375_v20  ;;  %2717 = vmatprep.subr.bf16.mxu1 %v6376_v61  ;;  %v6386_v20 = vld [vmem:[#allocation124_spill] sm:$0xff]  ;;  %v6387_v61 = vld [vmem:[#allocation125_spill] sm:$0xff] }
 0x67c   :  { %2677 = vmatpush1.bf16.msra.mxu0 %v6377_v31  ;;  %2718 = vmatpush1.bf16.msra.mxu1 %v6378_v8  ;;  %v6388_v31 = vld [vmem:[#allocation126_spill] sm:$0xff]  ;;  %v6389_v8 = vld [vmem:[#allocation127_spill] sm:$0xff] }
 0x67d   :  { %2678 = vmatprep.subr.bf16.mxu0 %v6379_v10  ;;  %2719 = vmatprep.subr.bf16.mxu1 %v6380_v38  ;;  %v6390_v10 = vld [vmem:[#allocation128_spill] sm:$0xff]  ;;  %v6391_v38 = vld [vmem:[#allocation129_spill] sm:$0xff] }
 0x680   :  { %2679 = vmatpush1.bf16.msra.mxu0 %v6381_v22  ;;  %2720 = vmatpush1.bf16.msra.mxu1 %v6382_v43  ;;  %v6392_v22 = vld [vmem:[#allocation130_spill] sm:$0xff]  ;;  %v6393_v43 = vld [vmem:[#allocation131_spill] sm:$0xff] }
 0x681   :  { %2680 = vmatprep.subr.bf16.mxu0 %v6383_v17  ;;  %2721 = vmatprep.subr.bf16.mxu1 %v6384_v23  ;;  %v6394_v17 = vld [vmem:[#allocation132_spill] sm:$0xff]  ;;  %v6395_v23 = vld [vmem:[#allocation42_spill] sm:$0xff] }
 0x684   :  { %2681 = vmatpush1.bf16.msra.mxu0 %v6385_v27  ;;  %2722 = vmatpush1.bf16.msra.mxu1 %v6386_v20  ;;  %v6396_v27 = vld [vmem:[#allocation43_spill] sm:$0xff]  ;;  %v6397_v20 = vld [vmem:[#allocation44_spill] sm:$0xff] }
 0x685   :  { %2682 = vmatprep.subr.bf16.mxu0 %v6387_v61  ;;  %2723 = vmatprep.subr.bf16.mxu1 %v6388_v31  ;;  %v6398_v61 = vld [vmem:[#allocation88_spill] sm:$0xff]  ;;  %v6399_v31 = vld [vmem:[#allocation47_spill] sm:$0xff] }
 0x686   :  { %v221_v36 = vadd.f32 %v6398_v61, %v6397_v20 }
 0x688   :  { %2683 = vmatpush1.bf16.msra.mxu0 %v6389_v8  ;;  %2724 = vmatpush1.bf16.msra.mxu1 %v6390_v10  ;;  %v294_v8 = vadd.f32 %v6400_v40, %v6399_v31  ;;  %v6402_v10 = vld [vmem:[#allocation90_spill] sm:$0xff] }
 0x689   :  { %2684 = vmatprep.subr.bf16.mxu0 %v6391_v38  ;;  %2725 = vmatprep.subr.bf16.mxu1 %v6392_v22  ;;  %v223_v57 = vadd.f32 %v6402_v10, %v6401_v30  ;;  %v6403_v38 = vld [vmem:[#allocation92_spill] sm:$0xff] }
 0x68a   :  { %v296_v22 = vadd.f32 %v6403_v38, %v4208_v54 }
 0x68c   :  { %2685 = vmatpush1.bf16.msra.mxu0 %v6393_v43  ;;  %2726 = vmatpush1.bf16.msra.mxu1 %v6394_v17 }
 0x68d   :  { %2736 = vmatprep.subr.bf16.mxu0 %v6395_v23  ;;  %2777 = vmatprep.subr.bf16.mxu1 %v6396_v27 }
 0x6e2   :  { %v2462_v55 = vpop.f32.mrb[48].mxu0  ;;  %v2503_v43 = vpop.f32.mrb[48].mxu1 }
 0x6e3   :  { %v2624_v29 = vadd.f32 %v2462_v55, %v221_v36  ;;  %v2626_v17 = vadd.f32 %v2503_v43, %v294_v8  ;;  %v2464_v24 = vpop.f32.mrb[49].mxu0  ;;  %v2505_v23 = vpop.f32.mrb[49].mxu1 }
 0x6e4   :  { %v2625_v13 = vadd.f32 %v2464_v24, %v223_v57  ;;  %v2627_v27 = vadd.f32 %v2505_v23, %v296_v22  ;;  %v2466_v0 = vpop.f32.mrb[50].mxu0  ;;  %v2507_v46 = vpop.f32.mrb[50].mxu1 }
 0x6e5   :  { %v3582_v61 = vmul.f32 -1.442695, %v2624_v29  ;;  %v2467_v20 = vpop.f32.mrb[51].mxu0  ;;  %v2508_v9 = vpop.f32.mrb[51].mxu1 }
 0x6e6   :  { %v3584_v40 = vmul.f32 -1.442695, %v2625_v13 }
 0x6e7   :  { %3805 = vpow2.f32 %v3582_v61 }
 0x6e8   :  { %3807 = vpow2.f32 %v3584_v40  ;;  %v3583_v40 = vmul.f32 -1.442695, %v2627_v27 }
 0x6e9   :  { %3809 = vtanh.f32 %v2626_v17 }
 0x6f1   :  { %v3806_v10 = vpop.eup %3805 }
 0x6f2   :  { %v3808_v30 = vpop.eup %3807  ;;  %v2631_v31 = vadd.f32 1.0, %v3806_v10 }
 0x6f3   :  { %v2644_v38 = vadd.f32 1.0, %v3808_v30  ;;  %v3810_v55 = vpop.eup %3809 }
 0x6f4   :  { %3811 = vrcp.f32 %v2631_v31 }
 0x6f5   :  { %3813 = vrcp.f32 %v2644_v38 }
 0x6fe   :  { %v3812_v8 = vpop.eup %3811 }
 0x6ff   :  { %v3814_v43 = vpop.eup %3813  ;;  %v2648_v24 = vmul.f32 %v3812_v8, %v3810_v55 }
 0x700   :  { %v2647_v0 = vmul.f32 %v3814_v43, %v5063_v14 }
 0x702   :  { %v5217_v46 = vadd.f32 %v2648_v24, %v2647_v0 }
 0x722   :  { %v2544_v29 = vpop.f32.mrb[52].mxu0  ;;  %v2585_v9 = vpop.f32.mrb[52].mxu1 }
 0x723   :  { %v2592_v13 = vadd.f32 %v2544_v29, %v4521_v11  ;;  %v2546_v57 = vpop.f32.mrb[53].mxu0  ;;  %v2587_v22 = vpop.f32.mrb[53].mxu1  ;;  %v2594_v38 = vadd.f32 %v2585_v9, %v4536_v5 }
 0x724   :  { %v2593_v23 = vadd.f32 %v2546_v57, %v4755_v52  ;;  %v2548_v17 = vpop.f32.mrb[54].mxu0  ;;  %v2589_v30 = vpop.f32.mrb[54].mxu1  ;;  %v2595_v14 = vadd.f32 %v2587_v22, %v4530_v21 }
 0x725   :  { %v3579_v36 = vmul.f32 -1.442695, %v2592_v13  ;;  %v2549_v20 = vpop.f32.mrb[55].mxu0  ;;  %v2590_v31 = vpop.f32.mrb[55].mxu1 }
 0x726   :  { %v3581_v61 = vmul.f32 -1.442695, %v2593_v23  ;;  %v3580_v10 = vmul.f32 -1.442695, %v2595_v14 }
 0x727   :  { %3815 = vpow2.f32 %v3579_v36 }
 0x728   :  { %3817 = vpow2.f32 %v3581_v61 }
 0x729   :  { %3819 = vpow2.f32 %v3583_v40 }
 0x72a   :  { %3821 = vpow2.f32 %v3580_v10 }
 0x72b   :  { %3823 = vtanh.f32 %v2594_v38 }
 0x731   :  { %v3816_v55 = vpop.eup %3815 }
 0x732   :  { %v3818_v8 = vpop.eup %3817  ;;  %v2599_v43 = vadd.f32 1.0, %v3816_v55  ;;  %v6405_v55 = vld [vmem:[#allocation54_spill] sm:$0xff] }
 0x733   :  { %v2612_v24 = vadd.f32 1.0, %v3818_v8  ;;  %v3820_v0 = vpop.eup %3819  ;;  %v6406_v8 = vld [vmem:[#allocation135_spill] sm:$0xff] }
 0x734   :  { %3825 = vrcp.f32 %v2599_v43  ;;  %v3822_v29 = vpop.eup %3821  ;;  %v2638_v23 = vadd.f32 1.0, %v3820_v0  ;;  %v6407_v43 = vld [vmem:[#allocation136_spill] sm:$0xff]  ;;  %v6409_v0 = vld [vmem:[#allocation138_spill] sm:$0xff] }
 0x735   :  { %3827 = vrcp.f32 %v2612_v24  ;;  %v3824_v13 = vpop.eup %3823  ;;  %v2606_v27 = vadd.f32 1.0, %v3822_v29  ;;  %v6408_v24 = vld [vmem:[#allocation137_spill] sm:$0xff]  ;;  %v6410_v29 = vld [vmem:[#allocation139_spill] sm:$0xff] }
 0x736   :  { %3829 = vtanh.f32 %v5217_v46 }
 0x737   :  { %3831 = vrcp.f32 %v2638_v23  ;;  %v6413_v23 = vld [vmem:[#allocation142_spill] sm:$0xff] }
 0x738   :  { %3833 = vrcp.f32 %v2606_v27  ;;  %v6416_v27 = vld [vmem:[#allocation145_spill] sm:$0xff] }
 0x73e   :  { %v3826_v57 = vpop.eup %3825 }
 0x73f   :  { %v3828_v17 = vpop.eup %3827  ;;  %v2616_v22 = vmul.f32 %v3826_v57, %v3824_v13  ;;  %v6411_v13 = vld [vmem:[#allocation140_spill] sm:$0xff]  ;;  %v6412_v57 = vld [vmem:[#allocation141_spill] sm:$0xff] }
 0x740   :  { %v2615_v30 = vmul.f32 %v3828_v17, %v5071_v37  ;;  %v3830_v36 = vpop.eup %3829  ;;  %v6404_v37 = vld [vmem:[#allocation53_spill] sm:$0xff]  ;;  %v6414_v17 = vld [vmem:[#allocation143_spill] sm:$0xff] }
 0x741   :  { %v3832_v20 = vpop.eup %3831 }
 0x742   :  { %v5225_v9 = vadd.f32 %v2616_v22, %v2615_v30  ;;  %v3834_v31 = vpop.eup %3833  ;;  %v2651_v14 = vmul.f32 %v3832_v20, %v3830_v36  ;;  %v6415_v22 = vld [vmem:[#allocation144_spill] sm:$0xff]  ;;  %v6417_v30 = vld [vmem:[#allocation146_spill] sm:$0xff]  ;;  %v6418_v36 = vld [vmem:[#allocation147_spill] sm:$0xff] }
 0x743   :  { %v6419_v20 = vld [vmem:[#allocation148_spill] sm:$0xff] }
 0x744   :  { %3835 = vtanh.f32 %v5225_v9  ;;  %v5228_v38 = vpack.c.bf16 %v2651_v14, %v2651_v14  ;;  %v6422_v14 = vld [vmem:[#allocation151_spill] sm:$0xff] }
 0x74e   :  { %v3836_v61 = vpop.eup %3835 }
 0x74f   :  { %v2619_v40 = vmul.f32 %v3836_v61, %v3834_v31  ;;  %v6420_v31 = vld [vmem:[#allocation149_spill] sm:$0xff]  ;;  %v6421_v61 = vld [vmem:[#allocation150_spill] sm:$0xff] }
 0x751   :  { %v2653_v10 = vpack.c.bf16 %v2619_v40, %v2619_v40  ;;  %v6423_v40 = vld [vmem:[#allocation152_spill] sm:$0xff] }
 0x753   :  { %2686 = vmatprep.mubr.bf16.mxu0 %v2653_v10  ;;  %2727 = vmatprep.mubr.bf16.mxu1 %v2653_v10 }
 0x754   :  { %2687 = vmatmul.mubr.bf16.vlgmr.msra.gmra.mrb[56].mxu0 %v5228_v38  ;;  %2728 = vmatmul.mubr.bf16.vlgmr.msra.gmra.mrb[56].mxu1 %v5228_v38 }
 0x755   :  { %2737 = vmatpush1.bf16.msra.mxu0 %v4161_v16  ;;  %2778 = vmatpush1.bf16.msra.mxu1 %v6006_v7 }
 0x756   :  { %2768 = vmatprep.mubr.bf16.mxu0 %v2653_v10  ;;  %2809 = vmatprep.mubr.bf16.mxu1 %v2653_v10  ;;  %v6424_v10 = vld [vmem:[#allocation153_spill] sm:$0xff] }
 0x757   :  { %2738 = vmatprep.subr.bf16.mxu0 %v6007_v4  ;;  %2779 = vmatprep.subr.bf16.mxu1 %v6008_v62 }
 0x759   :  { %2739 = vmatpush1.bf16.msra.mxu0 %v6009_v6  ;;  %2780 = vmatpush1.bf16.msra.mxu1 %v6010_v50 }
 0x75a   :  { %2740 = vmatprep.subr.bf16.mxu0 %v6011_v2  ;;  %2781 = vmatprep.subr.bf16.mxu1 %v6012_v39 }
 0x75d   :  { %2741 = vmatpush1.bf16.msra.mxu0 %v6103_v56  ;;  %2782 = vmatpush1.bf16.msra.mxu1 %v6104_v3 }
 0x75e   :  { %2742 = vmatprep.subr.bf16.mxu0 %v6105_v58  ;;  %2783 = vmatprep.subr.bf16.mxu1 %v6106_v28 }
 0x761   :  { %2743 = vmatpush1.bf16.msra.mxu0 %v6107_v45  ;;  %2784 = vmatpush1.bf16.msra.mxu1 %v6108_v51 }
 0x762   :  { %2744 = vmatprep.subr.bf16.mxu0 %v6109_v49  ;;  %2785 = vmatprep.subr.bf16.mxu1 %v6110_v42 }
 0x765   :  { %2745 = vmatpush1.bf16.msra.mxu0 %v6111_v53  ;;  %2786 = vmatpush1.bf16.msra.mxu1 %v6112_v48 }
 0x766   :  { %2746 = vmatprep.subr.bf16.mxu0 %v6113_v63  ;;  %2787 = vmatprep.subr.bf16.mxu1 %v6204_v12 }
 0x769   :  { %2747 = vmatpush1.bf16.msra.mxu0 %v6205_v18  ;;  %2788 = vmatpush1.bf16.msra.mxu1 %v6206_v26 }
 0x76a   :  { %2748 = vmatprep.subr.bf16.mxu0 %v6207_v47  ;;  %2789 = vmatprep.subr.bf16.mxu1 %v6208_v15 }
 0x76d   :  { %2749 = vmatpush1.bf16.msra.mxu0 %v6209_v25  ;;  %2790 = vmatpush1.bf16.msra.mxu1 %v6210_v35 }
 0x76e   :  { %2750 = vmatprep.subr.bf16.mxu0 %v6211_v59  ;;  %2791 = vmatprep.subr.bf16.mxu1 %v6212_v41 }
 0x771   :  { %2751 = vmatpush1.bf16.msra.mxu0 %v6213_v60  ;;  %2792 = vmatpush1.bf16.msra.mxu1 %v6214_v32 }
 0x772   :  { %2752 = vmatprep.subr.bf16.mxu0 %v6215_v1  ;;  %2793 = vmatprep.subr.bf16.mxu1 %v6216_v34 }
 0x775   :  { %2753 = vmatpush1.bf16.msra.mxu0 %v6217_v19  ;;  %2794 = vmatpush1.bf16.msra.mxu1 %v6218_v44 }
 0x776   :  { %2754 = vmatprep.subr.bf16.mxu0 %v6219_v33  ;;  %2795 = vmatprep.subr.bf16.mxu1 %v6404_v37 }
 0x779   :  { %2755 = vmatpush1.bf16.msra.mxu0 %v6405_v55  ;;  %2796 = vmatpush1.bf16.msra.mxu1 %v6406_v8 }
 0x77a   :  { %2756 = vmatprep.subr.bf16.mxu0 %v6407_v43  ;;  %2797 = vmatprep.subr.bf16.mxu1 %v6408_v24 }
 0x77d   :  { %2757 = vmatpush1.bf16.msra.mxu0 %v6409_v0  ;;  %2798 = vmatpush1.bf16.msra.mxu1 %v6410_v29 }
 0x77e   :  { %2758 = vmatprep.subr.bf16.mxu0 %v6411_v13  ;;  %2799 = vmatprep.subr.bf16.mxu1 %v6412_v57  ;;  %v6501_v57 = vld [vmem:[#allocation133_spill] sm:$0xff] }
 0x781   :  { %2759 = vmatpush1.bf16.msra.mxu0 %v6413_v23  ;;  %2800 = vmatpush1.bf16.msra.mxu1 %v6414_v17  ;;  %v6425_v17 = vld [vmem:[#allocation154_spill] sm:$0xff]  ;;  %v6500_v23 = vld [vmem:[#allocation96_spill] sm:$0xff] }
 0x782   :  { %2760 = vmatprep.subr.bf16.mxu0 %v6415_v22  ;;  %2801 = vmatprep.subr.bf16.mxu1 %v6416_v27  ;;  %v6426_v22 = vld [vmem:[#allocation155_spill] sm:$0xff]  ;;  %v6427_v27 = vld [vmem:[#allocation156_spill] sm:$0xff] }
 0x785   :  { %2761 = vmatpush1.bf16.msra.mxu0 %v6417_v30  ;;  %2802 = vmatpush1.bf16.msra.mxu1 %v6418_v36  ;;  %v6428_v30 = vld [vmem:[#allocation157_spill] sm:$0xff]  ;;  %v6429_v36 = vld [vmem:[#allocation158_spill] sm:$0xff] }
 0x786   :  { %2762 = vmatprep.subr.bf16.mxu0 %v6419_v20  ;;  %2803 = vmatprep.subr.bf16.mxu1 %v6420_v31  ;;  %v6430_v20 = vld [vmem:[#allocation159_spill] sm:$0xff]  ;;  %v6431_v31 = vld [vmem:[#allocation9_spill] sm:$0xff] }
 0x789   :  { %2763 = vmatpush1.bf16.msra.mxu0 %v6421_v61  ;;  %2804 = vmatpush1.bf16.msra.mxu1 %v6422_v14  ;;  %v6432_v61 = vld [vmem:[#allocation12_spill] sm:$0xff] }
 0x78a   :  { %2764 = vmatprep.subr.bf16.mxu0 %v6423_v40  ;;  %2805 = vmatprep.subr.bf16.mxu1 %v6424_v10  ;;  %v6433_v10 = vld [vmem:[#allocation10_spill] sm:$0xff]  ;;  %v6442_v40 = vld [vmem:[#allocation19_spill] sm:$0xff] }
 0x78d   :  { %2765 = vmatpush1.bf16.msra.mxu0 %v6425_v17  ;;  %2806 = vmatpush1.bf16.msra.mxu1 %v6426_v22  ;;  %v6434_v17 = vld [vmem:[#allocation11_spill] sm:$0xff]  ;;  %v6435_v22 = vld [vmem:[#allocation13_spill] sm:$0xff] }
 0x78e   :  { %2766 = vmatprep.subr.bf16.mxu0 %v6427_v27  ;;  %2807 = vmatprep.subr.bf16.mxu1 %v6428_v30  ;;  %v6436_v27 = vld [vmem:[#allocation16_spill] sm:$0xff]  ;;  %v6437_v30 = vld [vmem:[#allocation14_spill] sm:$0xff] }
 0x791   :  { %2767 = vmatpush1.bf16.msra.mxu0 %v6429_v36  ;;  %2808 = vmatpush1.bf16.msra.mxu1 %v6430_v20  ;;  %v6438_v36 = vld [vmem:[#allocation15_spill] sm:$0xff]  ;;  %v6439_v20 = vld [vmem:[#allocation17_spill] sm:$0xff] }
 0x792   :  { %2880 = vmatprep.subr.bf16.mxu0 %v6431_v31  ;;  %2921 = vmatprep.subr.bf16.mxu1 %v6432_v61  ;;  %v6440_v31 = vld [vmem:[#allocation20_spill] sm:$0xff]  ;;  %v6441_v61 = vld [vmem:[#allocation18_spill] sm:$0xff] }
 0x794   :  { %2769 = vmatmul.mubr.bf16.vlgmr.msra.gmra.mrb[60].mxu0 %v5228_v38  ;;  %2810 = vmatmul.mubr.bf16.vlgmr.msra.gmra.mrb[60].mxu1 %v5228_v38  ;;  %v6443_v38 = vld [vmem:[#allocation21_spill] sm:$0xff] }
 0x795   :  { %2881 = vmatpush1.bf16.msra.mxu0 %v6433_v10  ;;  %2922 = vmatpush1.bf16.msra.mxu1 %v6434_v17  ;;  %v6444_v10 = vld [vmem:[#allocation24_spill] sm:$0xff]  ;;  %v6445_v17 = vld [vmem:[#allocation22_spill] sm:$0xff] }
 0x796   :  { %2882 = vmatprep.subr.bf16.mxu0 %v6435_v22  ;;  %2923 = vmatprep.subr.bf16.mxu1 %v6436_v27  ;;  %v6446_v22 = vld [vmem:[#allocation23_spill] sm:$0xff]  ;;  %v6447_v27 = vld [vmem:[#allocation25_spill] sm:$0xff] }
 0x799   :  { %2883 = vmatpush1.bf16.msra.mxu0 %v6437_v30  ;;  %2924 = vmatpush1.bf16.msra.mxu1 %v6438_v36  ;;  %v6448_v30 = vld [vmem:[#allocation28_spill] sm:$0xff]  ;;  %v6449_v36 = vld [vmem:[#allocation26_spill] sm:$0xff] }
 0x79a   :  { %2884 = vmatprep.subr.bf16.mxu0 %v6439_v20  ;;  %2925 = vmatprep.subr.bf16.mxu1 %v6440_v31  ;;  %v6450_v20 = vld [vmem:[#allocation27_spill] sm:$0xff]  ;;  %v6451_v31 = vld [vmem:[#allocation30_spill] sm:$0xff] }
 0x79d   :  { %2885 = vmatpush1.bf16.msra.mxu0 %v6441_v61  ;;  %2926 = vmatpush1.bf16.msra.mxu1 %v6442_v40  ;;  %v6452_v61 = vld [vmem:[#allocation32_spill] sm:$0xff]  ;;  %v6453_v40 = vld [vmem:[#allocation29_spill] sm:$0xff] }
 0x79e   :  { %2886 = vmatprep.subr.bf16.mxu0 %v6443_v38  ;;  %2927 = vmatprep.subr.bf16.mxu1 %v6444_v10  ;;  %v6454_v38 = vld [vmem:[#allocation31_spill] sm:$0xff]  ;;  %v6455_v10 = vld [vmem:[#allocation33_spill] sm:$0xff] }
 0x7a1   :  { %2887 = vmatpush1.bf16.msra.mxu0 %v6445_v17  ;;  %2928 = vmatpush1.bf16.msra.mxu1 %v6446_v22  ;;  %v6456_v17 = vld [vmem:[#allocation34_spill] sm:$0xff]  ;;  %v6457_v22 = vld [vmem:[#allocation35_spill] sm:$0xff] }
 0x7a2   :  { %2888 = vmatprep.subr.bf16.mxu0 %v6447_v27  ;;  %2929 = vmatprep.subr.bf16.mxu1 %v6448_v30  ;;  %v6458_v27 = vld [vmem:[#allocation36_spill] sm:$0xff]  ;;  %v6459_v30 = vld [vmem:[#allocation37_spill] sm:$0xff] }
 0x7a5   :  { %2889 = vmatpush1.bf16.msra.mxu0 %v6449_v36  ;;  %2930 = vmatpush1.bf16.msra.mxu1 %v6450_v20  ;;  %v6460_v36 = vld [vmem:[#allocation38_spill] sm:$0xff]  ;;  %v6461_v20 = vld [vmem:[#allocation40_spill] sm:$0xff] }
 0x7a6   :  { %2890 = vmatprep.subr.bf16.mxu0 %v6451_v31  ;;  %2931 = vmatprep.subr.bf16.mxu1 %v6452_v61  ;;  %v6462_v31 = vld [vmem:[#allocation41_spill] sm:$0xff] }
 0x7a7   :  { %v6463_v61 = vld [vmem:[#allocation101_spill] sm:$0xff] }
 0x7a9   :  { %2891 = vmatpush1.bf16.msra.mxu0 %v6453_v40  ;;  %2932 = vmatpush1.bf16.msra.mxu1 %v6454_v38  ;;  %v6464_v40 = vld [vmem:[#allocation102_spill] sm:$0xff]  ;;  %v6465_v38 = vld [vmem:[#allocation103_spill] sm:$0xff] }
 0x7aa   :  { %2892 = vmatprep.subr.bf16.mxu0 %v6455_v10  ;;  %2933 = vmatprep.subr.bf16.mxu1 %v6456_v17  ;;  %v6466_v10 = vld [vmem:[#allocation104_spill] sm:$0xff]  ;;  %v6467_v17 = vld [vmem:[#allocation105_spill] sm:$0xff] }
 0x7ad   :  { %2893 = vmatpush1.bf16.msra.mxu0 %v6457_v22  ;;  %2934 = vmatpush1.bf16.msra.mxu1 %v6458_v27  ;;  %v6468_v22 = vld [vmem:[#allocation106_spill] sm:$0xff]  ;;  %v6469_v27 = vld [vmem:[#allocation107_spill] sm:$0xff] }
 0x7ae   :  { %2894 = vmatprep.subr.bf16.mxu0 %v6459_v30  ;;  %2935 = vmatprep.subr.bf16.mxu1 %v6460_v36  ;;  %v6470_v30 = vld [vmem:[#allocation108_spill] sm:$0xff]  ;;  %v6471_v36 = vld [vmem:[#allocation109_spill] sm:$0xff] }
 0x7b1   :  { %2895 = vmatpush1.bf16.msra.mxu0 %v6461_v20  ;;  %2936 = vmatpush1.bf16.msra.mxu1 %v6462_v31  ;;  %v6472_v20 = vld [vmem:[#allocation110_spill] sm:$0xff]  ;;  %v6473_v31 = vld [vmem:[#allocation111_spill] sm:$0xff] }
 0x7b2   :  { %2896 = vmatprep.subr.bf16.mxu0 %v6463_v61  ;;  %2937 = vmatprep.subr.bf16.mxu1 %v6464_v40  ;;  %v6474_v61 = vld [vmem:[#allocation112_spill] sm:$0xff]  ;;  %v6475_v40 = vld [vmem:[#allocation113_spill] sm:$0xff] }
 0x7b5   :  { %2897 = vmatpush1.bf16.msra.mxu0 %v6465_v38  ;;  %2938 = vmatpush1.bf16.msra.mxu1 %v6466_v10  ;;  %v6476_v38 = vld [vmem:[#allocation114_spill] sm:$0xff]  ;;  %v6477_v10 = vld [vmem:[#allocation115_spill] sm:$0xff] }
 0x7b6   :  { %2898 = vmatprep.subr.bf16.mxu0 %v6467_v17  ;;  %2939 = vmatprep.subr.bf16.mxu1 %v6468_v22  ;;  %v6478_v17 = vld [vmem:[#allocation116_spill] sm:$0xff]  ;;  %v6479_v22 = vld [vmem:[#allocation117_spill] sm:$0xff] }
 0x7b9   :  { %2899 = vmatpush1.bf16.msra.mxu0 %v6469_v27  ;;  %2940 = vmatpush1.bf16.msra.mxu1 %v6470_v30  ;;  %v6480_v27 = vld [vmem:[#allocation118_spill] sm:$0xff]  ;;  %v6481_v30 = vld [vmem:[#allocation119_spill] sm:$0xff] }
 0x7ba   :  { %2900 = vmatprep.subr.bf16.mxu0 %v6471_v36  ;;  %2941 = vmatprep.subr.bf16.mxu1 %v6472_v20  ;;  %v6482_v36 = vld [vmem:[#allocation120_spill] sm:$0xff]  ;;  %v6483_v20 = vld [vmem:[#allocation121_spill] sm:$0xff] }
 0x7bd   :  { %2901 = vmatpush1.bf16.msra.mxu0 %v6473_v31  ;;  %2942 = vmatpush1.bf16.msra.mxu1 %v6474_v61  ;;  %v6484_v31 = vld [vmem:[#allocation123_spill] sm:$0xff]  ;;  %v6485_v61 = vld [vmem:[#allocation122_spill] sm:$0xff] }
 0x7be   :  { %2902 = vmatprep.subr.bf16.mxu0 %v6475_v40  ;;  %2943 = vmatprep.subr.bf16.mxu1 %v6476_v38  ;;  %v6486_v40 = vld [vmem:[#allocation124_spill] sm:$0xff]  ;;  %v6487_v38 = vld [vmem:[#allocation125_spill] sm:$0xff] }
 0x7c1   :  { %2903 = vmatpush1.bf16.msra.mxu0 %v6477_v10  ;;  %2944 = vmatpush1.bf16.msra.mxu1 %v6478_v17  ;;  %v6488_v10 = vld [vmem:[#allocation126_spill] sm:$0xff]  ;;  %v6489_v17 = vld [vmem:[#allocation127_spill] sm:$0xff] }
 0x7c2   :  { %2904 = vmatprep.subr.bf16.mxu0 %v6479_v22  ;;  %2945 = vmatprep.subr.bf16.mxu1 %v6480_v27  ;;  %v6490_v22 = vld [vmem:[#allocation128_spill] sm:$0xff]  ;;  %v6491_v27 = vld [vmem:[#allocation129_spill] sm:$0xff] }
 0x7c5   :  { %2905 = vmatpush1.bf16.msra.mxu0 %v6481_v30  ;;  %2946 = vmatpush1.bf16.msra.mxu1 %v6482_v36  ;;  %v6492_v30 = vld [vmem:[#allocation130_spill] sm:$0xff]  ;;  %v6493_v36 = vld [vmem:[#allocation131_spill] sm:$0xff] }
 0x7c6   :  { %2906 = vmatprep.subr.bf16.mxu0 %v6483_v20  ;;  %2947 = vmatprep.subr.bf16.mxu1 %v6484_v31  ;;  %v6494_v20 = vld [vmem:[#allocation132_spill] sm:$0xff]  ;;  %v6495_v31 = vld [vmem:[#allocation42_spill] sm:$0xff] }
 0x7c9   :  { %2907 = vmatpush1.bf16.msra.mxu0 %v6485_v61  ;;  %2948 = vmatpush1.bf16.msra.mxu1 %v6486_v40  ;;  %v6496_v61 = vld [vmem:[#allocation43_spill] sm:$0xff]  ;;  %v6497_v40 = vld [vmem:[#allocation44_spill] sm:$0xff] }
 0x7ca   :  { %2908 = vmatprep.subr.bf16.mxu0 %v6487_v38  ;;  %2949 = vmatprep.subr.bf16.mxu1 %v6488_v10  ;;  %v6498_v38 = vld [vmem:[#allocation93_spill] sm:$0xff]  ;;  %v6499_v10 = vld [vmem:[#allocation47_spill] sm:$0xff] }
 0x7cb   :  { %v227_v14 = vadd.f32 %v6498_v38, %v6497_v40 }
 0x7cd   :  { %2909 = vmatpush1.bf16.msra.mxu0 %v6489_v17  ;;  %2950 = vmatpush1.bf16.msra.mxu1 %v6490_v22  ;;  %v300_v17 = vadd.f32 %v6500_v23, %v6499_v10  ;;  %v6502_v22 = vld [vmem:[#allocation94_spill] sm:$0xff] }
 0x7ce   :  { %2910 = vmatprep.subr.bf16.mxu0 %v6491_v27  ;;  %2951 = vmatprep.subr.bf16.mxu1 %v6492_v30  ;;  %v229_v13 = vadd.f32 %v6502_v22, %v6501_v57  ;;  %v6503_v27 = vld [vmem:[#allocation98_spill] sm:$0xff] }
 0x7cf   :  { %v302_v30 = vadd.f32 %v6503_v27, %v4208_v54  ;;  %v6533_v54 = vld [vmem:[#allocation42_spill] sm:$0xff] }
 0x7d1   :  { %2911 = vmatpush1.bf16.msra.mxu0 %v6493_v36  ;;  %2952 = vmatpush1.bf16.msra.mxu1 %v6494_v20 }
 0x7d2   :  { %2962 = vmatprep.subr.bf16.mxu0 %v6495_v31  ;;  %3003 = vmatprep.subr.bf16.mxu1 %v6496_v61 }
 0x827   :  { %v2688_v29 = vpop.f32.mrb[56].mxu0  ;;  %v2729_v36 = vpop.f32.mrb[56].mxu1 }
 0x828   :  { %v2850_v0 = vadd.f32 %v2688_v29, %v227_v14  ;;  %v2852_v20 = vadd.f32 %v2729_v36, %v300_v17  ;;  %v2690_v24 = vpop.f32.mrb[57].mxu0  ;;  %v2731_v31 = vpop.f32.mrb[57].mxu1 }
 0x829   :  { %v2851_v43 = vadd.f32 %v2690_v24, %v229_v13  ;;  %v2853_v61 = vadd.f32 %v2731_v31, %v302_v30  ;;  %v2692_v8 = vpop.f32.mrb[58].mxu0  ;;  %v2733_v55 = vpop.f32.mrb[58].mxu1 }
 0x82a   :  { %v3588_v38 = vmul.f32 -1.442695, %v2850_v0  ;;  %v2693_v40 = vpop.f32.mrb[59].mxu0  ;;  %v2734_v37 = vpop.f32.mrb[59].mxu1 }
 0x82b   :  { %v3590_v23 = vmul.f32 -1.442695, %v2851_v43 }
 0x82c   :  { %3837 = vpow2.f32 %v3588_v38 }
 0x82d   :  { %3839 = vpow2.f32 %v3590_v23  ;;  %v3589_v23 = vmul.f32 -1.442695, %v2853_v61 }
 0x82e   :  { %3841 = vtanh.f32 %v2852_v20 }
 0x836   :  { %v3838_v22 = vpop.eup %3837 }
 0x837   :  { %v3840_v57 = vpop.eup %3839  ;;  %v2857_v10 = vadd.f32 1.0, %v3838_v22 }
 0x838   :  { %v2870_v27 = vadd.f32 1.0, %v3840_v57  ;;  %v3842_v29 = vpop.eup %3841 }
 0x839   :  { %3843 = vrcp.f32 %v2857_v10 }
 0x83a   :  { %3845 = vrcp.f32 %v2870_v27 }
 0x843   :  { %v3844_v14 = vpop.eup %3843 }
 0x844   :  { %v3846_v17 = vpop.eup %3845  ;;  %v2874_v24 = vmul.f32 %v3844_v14, %v3842_v29 }
 0x845   :  { %v2873_v8 = vmul.f32 %v3846_v17, %v5217_v46 }
 0x847   :  { %v5371_v55 = vadd.f32 %v2874_v24, %v2873_v8 }
 0x849   :  { %6504 = vst [vmem:[#allocation79_spill] sm:$0xff] %v5371_v55 }
 0x867   :  { %v2770_v0 = vpop.f32.mrb[60].mxu0  ;;  %v2811_v37 = vpop.f32.mrb[60].mxu1 }
 0x868   :  { %v2818_v43 = vadd.f32 %v2770_v0, %v4521_v11  ;;  %v2772_v13 = vpop.f32.mrb[61].mxu0  ;;  %v2813_v31 = vpop.f32.mrb[61].mxu1  ;;  %v2820_v27 = vadd.f32 %v2811_v37, %v4536_v5  ;;  %v6528_v5 = vld [vmem:[#allocation155_spill] sm:$0xff]  ;;  %v6531_v11 = vld [vmem:[#allocation158_spill] sm:$0xff] }
 0x869   :  { %v2819_v40 = vadd.f32 %v2772_v13, %v4755_v52  ;;  %v2774_v30 = vpop.f32.mrb[62].mxu0  ;;  %v2815_v57 = vpop.f32.mrb[62].mxu1  ;;  %v2821_v46 = vadd.f32 %v2813_v31, %v4530_v21  ;;  %v6529_v21 = vld [vmem:[#allocation156_spill] sm:$0xff]  ;;  %v6530_v52 = vld [vmem:[#allocation157_spill] sm:$0xff] }
 0x86a   :  { %v3585_v10 = vmul.f32 -1.442695, %v2818_v43  ;;  %v2775_v36 = vpop.f32.mrb[63].mxu0  ;;  %v2816_v20 = vpop.f32.mrb[63].mxu1 }
 0x86b   :  { %v3587_v38 = vmul.f32 -1.442695, %v2819_v40  ;;  %v3586_v22 = vmul.f32 -1.442695, %v2821_v46 }
 0x86c   :  { %3847 = vpow2.f32 %v3585_v10 }
 0x86d   :  { %3849 = vpow2.f32 %v3587_v38 }
 0x86e   :  { %3851 = vpow2.f32 %v3589_v23 }
 0x86f   :  { %3853 = vpow2.f32 %v3586_v22 }
 0x870   :  { %3855 = vtanh.f32 %v2820_v27 }
 0x876   :  { %v3848_v29 = vpop.eup %3847 }
 0x877   :  { %v3850_v14 = vpop.eup %3849  ;;  %v2825_v17 = vadd.f32 1.0, %v3848_v29  ;;  %v6507_v29 = vld [vmem:[#allocation54_spill] sm:$0xff] }
 0x878   :  { %v2838_v24 = vadd.f32 1.0, %v3850_v14  ;;  %v3852_v8 = vpop.eup %3851  ;;  %v6508_v14 = vld [vmem:[#allocation135_spill] sm:$0xff] }
 0x879   :  { %3857 = vrcp.f32 %v2825_v17  ;;  %v3854_v0 = vpop.eup %3853  ;;  %v2864_v40 = vadd.f32 1.0, %v3852_v8  ;;  %v6509_v17 = vld [vmem:[#allocation136_spill] sm:$0xff]  ;;  %v6511_v8 = vld [vmem:[#allocation138_spill] sm:$0xff] }
 0x87a   :  { %3859 = vrcp.f32 %v2838_v24  ;;  %v3856_v43 = vpop.eup %3855  ;;  %v2832_v61 = vadd.f32 1.0, %v3854_v0  ;;  %v6510_v24 = vld [vmem:[#allocation137_spill] sm:$0xff]  ;;  %v6512_v0 = vld [vmem:[#allocation139_spill] sm:$0xff] }
 0x87b   :  { %3861 = vtanh.f32 %v5371_v55  ;;  %v6532_v55 = vld [vmem:[#allocation159_spill] sm:$0xff] }
 0x87c   :  { %3863 = vrcp.f32 %v2864_v40  ;;  %v6515_v40 = vld [vmem:[#allocation142_spill] sm:$0xff] }
 0x87d   :  { %3865 = vrcp.f32 %v2832_v61  ;;  %v6518_v61 = vld [vmem:[#allocation145_spill] sm:$0xff] }
 0x883   :  { %v3858_v13 = vpop.eup %3857 }
 0x884   :  { %v3860_v30 = vpop.eup %3859  ;;  %v2842_v31 = vmul.f32 %v3858_v13, %v3856_v43  ;;  %v6513_v43 = vld [vmem:[#allocation140_spill] sm:$0xff]  ;;  %v6514_v13 = vld [vmem:[#allocation141_spill] sm:$0xff] }
 0x885   :  { %v2841_v57 = vmul.f32 %v3860_v30, %v5225_v9  ;;  %v3862_v10 = vpop.eup %3861  ;;  %v6506_v9 = vld [vmem:[#allocation53_spill] sm:$0xff]  ;;  %v6516_v30 = vld [vmem:[#allocation143_spill] sm:$0xff] }
 0x886   :  { %v3864_v36 = vpop.eup %3863 }
 0x887   :  { %v5379_v37 = vadd.f32 %v2842_v31, %v2841_v57  ;;  %v3866_v20 = vpop.eup %3865  ;;  %v2877_v46 = vmul.f32 %v3864_v36, %v3862_v10  ;;  %v6517_v31 = vld [vmem:[#allocation144_spill] sm:$0xff]  ;;  %v6519_v57 = vld [vmem:[#allocation146_spill] sm:$0xff]  ;;  %v6520_v10 = vld [vmem:[#allocation147_spill] sm:$0xff] }
 0x888   :  { %v6521_v36 = vld [vmem:[#allocation148_spill] sm:$0xff] }
 0x889   :  { %6505 = vst [vmem:[#allocation78_spill] sm:$0xff] %v5379_v37  ;;  %3867 = vtanh.f32 %v5379_v37  ;;  %v5382_v27 = vpack.c.bf16 %v2877_v46, %v2877_v46  ;;  %v6524_v46 = vld [vmem:[#allocation151_spill] sm:$0xff]  ;;  %v6527_v37 = vld [vmem:[#allocation154_spill] sm:$0xff] }
 0x893   :  { %v3868_v38 = vpop.eup %3867 }
 0x894   :  { %v2845_v23 = vmul.f32 %v3868_v38, %v3866_v20  ;;  %v6522_v20 = vld [vmem:[#allocation149_spill] sm:$0xff]  ;;  %v6523_v38 = vld [vmem:[#allocation150_spill] sm:$0xff] }
 0x896   :  { %v2879_v22 = vpack.c.bf16 %v2845_v23, %v2845_v23  ;;  %v6525_v23 = vld [vmem:[#allocation152_spill] sm:$0xff] }
 0x898   :  { %2912 = vmatprep.mubr.bf16.mxu0 %v2879_v22  ;;  %2953 = vmatprep.mubr.bf16.mxu1 %v2879_v22 }
 0x899   :  { %2913 = vmatmul.mubr.bf16.vlgmr.msra.gmra.mrb[64].mxu0 %v5382_v27  ;;  %2954 = vmatmul.mubr.bf16.vlgmr.msra.gmra.mrb[64].mxu1 %v5382_v27 }
 0x89a   :  { %2963 = vmatpush1.bf16.msra.mxu0 %v4161_v16  ;;  %3004 = vmatpush1.bf16.msra.mxu1 %v6006_v7 }
 0x89b   :  { %2994 = vmatprep.mubr.bf16.mxu0 %v2879_v22  ;;  %3035 = vmatprep.mubr.bf16.mxu1 %v2879_v22  ;;  %v6526_v22 = vld [vmem:[#allocation153_spill] sm:$0xff] }
 0x89c   :  { %2964 = vmatprep.subr.bf16.mxu0 %v6007_v4  ;;  %3005 = vmatprep.subr.bf16.mxu1 %v6008_v62 }
 0x89e   :  { %2965 = vmatpush1.bf16.msra.mxu0 %v6009_v6  ;;  %3006 = vmatpush1.bf16.msra.mxu1 %v6010_v50 }
 0x89f   :  { %2966 = vmatprep.subr.bf16.mxu0 %v6011_v2  ;;  %3007 = vmatprep.subr.bf16.mxu1 %v6012_v39 }
 0x8a2   :  { %2967 = vmatpush1.bf16.msra.mxu0 %v6103_v56  ;;  %3008 = vmatpush1.bf16.msra.mxu1 %v6104_v3 }
 0x8a3   :  { %2968 = vmatprep.subr.bf16.mxu0 %v6105_v58  ;;  %3009 = vmatprep.subr.bf16.mxu1 %v6106_v28 }
 0x8a6   :  { %2969 = vmatpush1.bf16.msra.mxu0 %v6107_v45  ;;  %3010 = vmatpush1.bf16.msra.mxu1 %v6108_v51 }
 0x8a7   :  { %2970 = vmatprep.subr.bf16.mxu0 %v6109_v49  ;;  %3011 = vmatprep.subr.bf16.mxu1 %v6110_v42 }
 0x8aa   :  { %2971 = vmatpush1.bf16.msra.mxu0 %v6111_v53  ;;  %3012 = vmatpush1.bf16.msra.mxu1 %v6112_v48 }
 0x8ab   :  { %2972 = vmatprep.subr.bf16.mxu0 %v6113_v63  ;;  %3013 = vmatprep.subr.bf16.mxu1 %v6204_v12 }
 0x8ae   :  { %2973 = vmatpush1.bf16.msra.mxu0 %v6205_v18  ;;  %3014 = vmatpush1.bf16.msra.mxu1 %v6206_v26 }
 0x8af   :  { %2974 = vmatprep.subr.bf16.mxu0 %v6207_v47  ;;  %3015 = vmatprep.subr.bf16.mxu1 %v6208_v15 }
 0x8b2   :  { %2975 = vmatpush1.bf16.msra.mxu0 %v6209_v25  ;;  %3016 = vmatpush1.bf16.msra.mxu1 %v6210_v35 }
 0x8b3   :  { %2976 = vmatprep.subr.bf16.mxu0 %v6211_v59  ;;  %3017 = vmatprep.subr.bf16.mxu1 %v6212_v41 }
 0x8b6   :  { %2977 = vmatpush1.bf16.msra.mxu0 %v6213_v60  ;;  %3018 = vmatpush1.bf16.msra.mxu1 %v6214_v32 }
 0x8b7   :  { %2978 = vmatprep.subr.bf16.mxu0 %v6215_v1  ;;  %3019 = vmatprep.subr.bf16.mxu1 %v6216_v34 }
 0x8ba   :  { %2979 = vmatpush1.bf16.msra.mxu0 %v6217_v19  ;;  %3020 = vmatpush1.bf16.msra.mxu1 %v6218_v44 }
 0x8bb   :  { %2980 = vmatprep.subr.bf16.mxu0 %v6219_v33  ;;  %3021 = vmatprep.subr.bf16.mxu1 %v6506_v9 }
 0x8be   :  { %2981 = vmatpush1.bf16.msra.mxu0 %v6507_v29  ;;  %3022 = vmatpush1.bf16.msra.mxu1 %v6508_v14 }
 0x8bf   :  { %2982 = vmatprep.subr.bf16.mxu0 %v6509_v17  ;;  %3023 = vmatprep.subr.bf16.mxu1 %v6510_v24 }
 0x8c2   :  { %2983 = vmatpush1.bf16.msra.mxu0 %v6511_v8  ;;  %3024 = vmatpush1.bf16.msra.mxu1 %v6512_v0 }
 0x8c3   :  { %2984 = vmatprep.subr.bf16.mxu0 %v6513_v43  ;;  %3025 = vmatprep.subr.bf16.mxu1 %v6514_v13 }
 0x8c6   :  { %2985 = vmatpush1.bf16.msra.mxu0 %v6515_v40  ;;  %3026 = vmatpush1.bf16.msra.mxu1 %v6516_v30 }
 0x8c7   :  { %2986 = vmatprep.subr.bf16.mxu0 %v6517_v31  ;;  %3027 = vmatprep.subr.bf16.mxu1 %v6518_v61 }
 0x8ca   :  { %2987 = vmatpush1.bf16.msra.mxu0 %v6519_v57  ;;  %3028 = vmatpush1.bf16.msra.mxu1 %v6520_v10 }
 0x8cb   :  { %2988 = vmatprep.subr.bf16.mxu0 %v6521_v36  ;;  %3029 = vmatprep.subr.bf16.mxu1 %v6522_v20 }
 0x8ce   :  { %2989 = vmatpush1.bf16.msra.mxu0 %v6523_v38  ;;  %3030 = vmatpush1.bf16.msra.mxu1 %v6524_v46  ;;  %v6534_v38 = vld [vmem:[#allocation43_spill] sm:$0xff] }
 0x8cf   :  { %2990 = vmatprep.subr.bf16.mxu0 %v6525_v23  ;;  %3031 = vmatprep.subr.bf16.mxu1 %v6526_v22 }
 0x8d2   :  { %2991 = vmatpush1.bf16.msra.mxu0 %v6527_v37  ;;  %3032 = vmatpush1.bf16.msra.mxu1 %v6528_v5 }
 0x8d3   :  { %2992 = vmatprep.subr.bf16.mxu0 %v6529_v21  ;;  %3033 = vmatprep.subr.bf16.mxu1 %v6530_v52 }
 0x8d6   :  { %2993 = vmatpush1.bf16.msra.mxu0 %v6531_v11  ;;  %3034 = vmatpush1.bf16.msra.mxu1 %v6532_v55 }
 0x8d7   :  { %3106 = vmatprep.subr.bf16.mxu0 %v6533_v54  ;;  %3147 = vmatprep.subr.bf16.mxu1 %v6534_v38  ;;  %v6536_v54 = vld [vmem:[#allocation44_spill] sm:$0xff] }
 0x8d9   :  { %2995 = vmatmul.mubr.bf16.vlgmr.msra.gmra.mrb[68].mxu0 %v5382_v27  ;;  %3036 = vmatmul.mubr.bf16.vlgmr.msra.gmra.mrb[68].mxu1 %v5382_v27 }
 0x8da   :  { %3107 = vmatpush1.bf16.msra.mxu0 %v4161_v16  ;;  %3148 = vmatpush1.bf16.msra.mxu1 %v6006_v7  ;;  %v6535_v16 = vld [vmem:[#allocation150_spill] sm:$0xff]  ;;  %v6537_v7 = vld [vmem:[#allocation95_spill] sm:$0xff] }
 0x8db   :  { %3108 = vmatprep.subr.bf16.mxu0 %v6007_v4  ;;  %3149 = vmatprep.subr.bf16.mxu1 %v6008_v62  ;;  %v231_v4 = vadd.f32 %v6537_v7, %v6536_v54  ;;  %v6538_v62 = vld [vmem:[#allocation47_spill] sm:$0xff] }
 0x8de   :  { %3109 = vmatpush1.bf16.msra.mxu0 %v6009_v6  ;;  %3150 = vmatpush1.bf16.msra.mxu1 %v6010_v50  ;;  %v6539_v6 = vld [vmem:[#allocation99_spill] sm:$0xff] }
 0x8df   :  { %3110 = vmatprep.subr.bf16.mxu0 %v6011_v2  ;;  %3151 = vmatprep.subr.bf16.mxu1 %v6012_v39  ;;  %v304_v50 = vadd.f32 %v6539_v6, %v6538_v62  ;;  %v6540_v2 = vld [vmem:[#allocation133_spill] sm:$0xff] }
 0x8e0   :  { %v6541_v39 = vld [vmem:[#allocation97_spill] sm:$0xff] }
 0x8e2   :  { %3111 = vmatpush1.bf16.msra.mxu0 %v6103_v56  ;;  %3152 = vmatpush1.bf16.msra.mxu1 %v6104_v3  ;;  %v233_v56 = vadd.f32 %v6541_v39, %v6540_v2  ;;  %v6542_v3 = vld [vmem:[#allocation45_spill] sm:$0xff] }
 0x8e3   :  { %3112 = vmatprep.subr.bf16.mxu0 %v6105_v58  ;;  %3153 = vmatprep.subr.bf16.mxu1 %v6106_v28  ;;  %v6543_v58 = vld [vmem:[#allocation100_spill] sm:$0xff] }
 0x8e6   :  { %3113 = vmatpush1.bf16.msra.mxu0 %v6107_v45  ;;  %3154 = vmatpush1.bf16.msra.mxu1 %v6108_v51 }
 0x8e7   :  { %3114 = vmatprep.subr.bf16.mxu0 %v6109_v49  ;;  %3155 = vmatprep.subr.bf16.mxu1 %v6110_v42 }
 0x8ea   :  { %3115 = vmatpush1.bf16.msra.mxu0 %v6111_v53  ;;  %3156 = vmatpush1.bf16.msra.mxu1 %v6112_v48 }
 0x8eb   :  { %3116 = vmatprep.subr.bf16.mxu0 %v6113_v63  ;;  %3157 = vmatprep.subr.bf16.mxu1 %v6204_v12 }
 0x8ee   :  { %3117 = vmatpush1.bf16.msra.mxu0 %v6205_v18  ;;  %3158 = vmatpush1.bf16.msra.mxu1 %v6206_v26 }
 0x8ef   :  { %3118 = vmatprep.subr.bf16.mxu0 %v6207_v47  ;;  %3159 = vmatprep.subr.bf16.mxu1 %v6208_v15 }
 0x8f2   :  { %3119 = vmatpush1.bf16.msra.mxu0 %v6209_v25  ;;  %3160 = vmatpush1.bf16.msra.mxu1 %v6210_v35 }
 0x8f3   :  { %3120 = vmatprep.subr.bf16.mxu0 %v6211_v59  ;;  %3161 = vmatprep.subr.bf16.mxu1 %v6212_v41 }
 0x8f6   :  { %3121 = vmatpush1.bf16.msra.mxu0 %v6213_v60  ;;  %3162 = vmatpush1.bf16.msra.mxu1 %v6214_v32 }
 0x8f7   :  { %3122 = vmatprep.subr.bf16.mxu0 %v6215_v1  ;;  %3163 = vmatprep.subr.bf16.mxu1 %v6216_v34 }
 0x8fa   :  { %3123 = vmatpush1.bf16.msra.mxu0 %v6217_v19  ;;  %3164 = vmatpush1.bf16.msra.mxu1 %v6218_v44  ;;  %v6544_v44 = vld [vmem:[#allocation79_spill] sm:$0xff] }
 0x8fb   :  { %3124 = vmatprep.subr.bf16.mxu0 %v6219_v33  ;;  %3165 = vmatprep.subr.bf16.mxu1 %v6506_v9 }
 0x8fe   :  { %3125 = vmatpush1.bf16.msra.mxu0 %v6507_v29  ;;  %3166 = vmatpush1.bf16.msra.mxu1 %v6508_v14 }
 0x8ff   :  { %3126 = vmatprep.subr.bf16.mxu0 %v6509_v17  ;;  %3167 = vmatprep.subr.bf16.mxu1 %v6510_v24  ;;  %v6545_v17 = vld [vmem:[#allocation46_spill] sm:$0xff] }
 0x902   :  { %3127 = vmatpush1.bf16.msra.mxu0 %v6511_v8  ;;  %3168 = vmatpush1.bf16.msra.mxu1 %v6512_v0 }
 0x903   :  { %3128 = vmatprep.subr.bf16.mxu0 %v6513_v43  ;;  %3169 = vmatprep.subr.bf16.mxu1 %v6514_v13  ;;  %v6546_v43 = vld [vmem:[#allocation77_spill] sm:$0xff] }
 0x906   :  { %3129 = vmatpush1.bf16.msra.mxu0 %v6515_v40  ;;  %3170 = vmatpush1.bf16.msra.mxu1 %v6516_v30 }
 0x907   :  { %3130 = vmatprep.subr.bf16.mxu0 %v6517_v31  ;;  %3171 = vmatprep.subr.bf16.mxu1 %v6518_v61 }
 0x90a   :  { %3131 = vmatpush1.bf16.msra.mxu0 %v6519_v57  ;;  %3172 = vmatpush1.bf16.msra.mxu1 %v6520_v10 }
 0x90b   :  { %3132 = vmatprep.subr.bf16.mxu0 %v6521_v36  ;;  %3173 = vmatprep.subr.bf16.mxu1 %v6522_v20  ;;  %v6547_v36 = vld [vmem:[#allocation48_spill] sm:$0xff] }
 0x90e   :  { %3133 = vmatpush1.bf16.msra.mxu0 %v6535_v16  ;;  %3174 = vmatpush1.bf16.msra.mxu1 %v6524_v46  ;;  %v6548_v46 = vld [vmem:[#allocation134_spill] sm:$0xff] }
 0x90f   :  { %3134 = vmatprep.subr.bf16.mxu0 %v6525_v23  ;;  %3175 = vmatprep.subr.bf16.mxu1 %v6526_v22 }
 0x912   :  { %3135 = vmatpush1.bf16.msra.mxu0 %v6527_v37  ;;  %3176 = vmatpush1.bf16.msra.mxu1 %v6528_v5  ;;  %v306_v5 = vadd.f32 %v6543_v58, %v6542_v3 }
 0x913   :  { %3136 = vmatprep.subr.bf16.mxu0 %v6529_v21  ;;  %3177 = vmatprep.subr.bf16.mxu1 %v6530_v52 }
 0x916   :  { %3137 = vmatpush1.bf16.msra.mxu0 %v6531_v11  ;;  %3178 = vmatpush1.bf16.msra.mxu1 %v6532_v55 }
 0x96c   :  { %v2914_v28 = vpop.f32.mrb[64].mxu0  ;;  %v2955_v21 = vpop.f32.mrb[64].mxu1 }
 0x96d   :  { %v3076_v45 = vadd.f32 %v2914_v28, %v231_v4  ;;  %v3078_v52 = vadd.f32 %v2955_v21, %v304_v50  ;;  %v2916_v51 = vpop.f32.mrb[65].mxu0  ;;  %v2957_v11 = vpop.f32.mrb[65].mxu1 }
 0x96e   :  { %v3077_v49 = vadd.f32 %v2916_v51, %v233_v56  ;;  %v3079_v42 = vadd.f32 %v2957_v11, %v306_v5  ;;  %v2918_v53 = vpop.f32.mrb[66].mxu0  ;;  %v2959_v48 = vpop.f32.mrb[66].mxu1  ;;  %v6549_v56 = vld [vmem:[#allocation78_spill] sm:$0xff]  ;;  %v3661_v51 = vld [vmem:[%s5580_s5] sm:$0xff]   ;;  %v3969_v11 = vmov 0.0  }
 0x96f   :  { %v3594_v63 = vmul.f32 -1.442695, %v3076_v45  ;;  %v2919_v12 = vpop.f32.mrb[67].mxu0  ;;  %v2960_v18 = vpop.f32.mrb[67].mxu1  ;;  %3618 = vmatprep.subr.bf16.mxu0 %v3969_v11  ;;  %v3664_v53 = vld [vmem:[%s5580_s5 + $0x18] sm:$0xff]   ;;  %v3665_v48 = vld [vmem:[%s5580_s5 + $0x20] sm:$0xff]  }
 0x970   :  { %v3596_v26 = vmul.f32 -1.442695, %v3077_v49  ;;  %v3595_v47 = vmul.f32 -1.442695, %v3079_v42  ;;  %v3662_v49 = vld [vmem:[%s5580_s5 + $0x8] sm:$0xff]   ;;  %v3663_v42 = vld [vmem:[%s5580_s5 + $0x10] sm:$0xff]  }
 0x971   :  { %3869 = vpow2.f32 %v3594_v63  ;;  %v3666_v63 = vld [vmem:[%s5580_s5 + $0x28] sm:$0xff]   ;;  %v3667_v12 = vld [vmem:[%s5580_s5 + $0x30] sm:$0xff]   ;;  %v3668_v18 = vld [vmem:[%s5580_s5 + $0x38] sm:$0xff]  }
 0x972   :  { %3871 = vpow2.f32 %v3596_v26 }
 0x973   :  { %3873 = vpow2.f32 %v3595_v47 }
 0x974   :  { %3875 = vtanh.f32 %v3078_v52 }
 0x97b   :  { %v3870_v15 = vpop.eup %3869 }
 0x97c   :  { %v3872_v25 = vpop.eup %3871  ;;  %v3083_v35 = vadd.f32 1.0, %v3870_v15 }
 0x97d   :  { %v3096_v59 = vadd.f32 1.0, %v3872_v25  ;;  %v3874_v41 = vpop.eup %3873 }
 0x97e   :  { %3877 = vrcp.f32 %v3083_v35  ;;  %v3876_v60 = vpop.eup %3875  ;;  %v3090_v19 = vadd.f32 1.0, %v3874_v41 }
 0x97f   :  { %3879 = vrcp.f32 %v3096_v59 }
 0x980   :  { %3881 = vrcp.f32 %v3090_v19 }
 0x988   :  { %v3878_v32 = vpop.eup %3877 }
 0x989   :  { %v3880_v1 = vpop.eup %3879  ;;  %v3100_v34 = vmul.f32 %v3878_v32, %v3876_v60 }
 0x98a   :  { %v3099_v33 = vmul.f32 %v3880_v1, %v6544_v44  ;;  %v3882_v37 = vpop.eup %3881 }
 0x98c   :  { %v3101_v55 = vadd.f32 %v3100_v34, %v3099_v33 }
 0x98e   :  { %3883 = vtanh.f32 %v3101_v55 }
 0x998   :  { %v3884_v27 = vpop.eup %3883 }
 0x999   :  { %v3103_v9 = vmul.f32 %v3884_v27, %v3882_v37 }
 0x99b   :  { %v3104_v52 = vpack.c.bf16 %v3103_v9, %v3103_v9 }
 0x9ac   :  { %v2996_v29 = vpop.f32.mrb[68].mxu0  ;;  %v3037_v14 = vpop.f32.mrb[68].mxu1 }
 0x9ad   :  { %v3044_v24 = vadd.f32 %v2996_v29, %v6545_v17  ;;  %v2998_v8 = vpop.f32.mrb[69].mxu0  ;;  %v3039_v0 = vpop.f32.mrb[69].mxu1  ;;  %v3046_v23 = vadd.f32 %v3037_v14, %v6548_v46 }
 0x9ae   :  { %v3045_v13 = vadd.f32 %v2998_v8, %v6546_v43  ;;  %v3000_v40 = vpop.f32.mrb[70].mxu0  ;;  %v3041_v30 = vpop.f32.mrb[70].mxu1  ;;  %v3047_v20 = vadd.f32 %v3039_v0, %v6547_v36 }
 0x9af   :  { %v3591_v31 = vmul.f32 -1.442695, %v3044_v24  ;;  %v3001_v61 = vpop.f32.mrb[71].mxu0  ;;  %v3042_v57 = vpop.f32.mrb[71].mxu1 }
 0x9b0   :  { %v3593_v10 = vmul.f32 -1.442695, %v3045_v13  ;;  %v3592_v38 = vmul.f32 -1.442695, %v3047_v20 }
 0x9b1   :  { %3885 = vpow2.f32 %v3591_v31 }
 0x9b2   :  { %3887 = vpow2.f32 %v3593_v10  ;;  %v3600_v10 = vld [vmem:[%s5581_s6] ss:$0 sm:$0xff] }
 0x9b3   :  { %3889 = vpow2.f32 %v3592_v38 }
 0x9b4   :  { %3891 = vtanh.f32 %v3046_v23 }
 0x9bb   :  { %v3886_v22 = vpop.eup %3885 }
 0x9bc   :  { %v3888_v16 = vpop.eup %3887  ;;  %v3051_v54 = vadd.f32 1.0, %v3886_v22 }
 0x9bd   :  { %v3064_v7 = vadd.f32 1.0, %v3888_v16  ;;  %v3890_v4 = vpop.eup %3889 }
 0x9be   :  { %3893 = vrcp.f32 %v3051_v54  ;;  %v3892_v62 = vpop.eup %3891  ;;  %v3058_v39 = vadd.f32 1.0, %v3890_v4 }
 0x9bf   :  { %3895 = vrcp.f32 %v3064_v7 }
 0x9c0   :  { %3897 = vrcp.f32 %v3058_v39 }
 0x9c8   :  { %v3894_v6 = vpop.eup %3893 }
 0x9c9   :  { %v3896_v50 = vpop.eup %3895  ;;  %v3068_v2 = vmul.f32 %v3894_v6, %v3892_v62 }
 0x9ca   :  { %v3067_v3 = vmul.f32 %v3896_v50, %v6549_v56  ;;  %v3898_v5 = vpop.eup %3897 }
 0x9cc   :  { %v5528_v58 = vadd.f32 %v3068_v2, %v3067_v3 }
 0x9ce   :  { %3899 = vtanh.f32 %v5528_v58 }
 0x9d8   :  { %v3900_v28 = vpop.eup %3899 }
 0x9d9   :  { %v3071_v21 = vmul.f32 %v3900_v28, %v3898_v5 }
 0x9db   :  { %v3105_v45 = vpack.c.bf16 %v3071_v21, %v3071_v21 }
 0x9dd   :  { %3138 = vmatprep.mubr.bf16.mxu0 %v3105_v45  ;;  %3179 = vmatprep.mubr.bf16.mxu1 %v3105_v45 }
 0x9de   :  { %3139 = vmatmul.mubr.bf16.vlgmr.msra.gmra.mrb[72].mxu0 %v3104_v52  ;;  %3180 = vmatmul.mubr.bf16.vlgmr.msra.gmra.mrb[72].mxu1 %v3104_v52 }
 0x9df   :  { %3619 = vmatpush3.bf16.msra.mxu0 %v3661_v51  ;;  %3634 = vmatprep.mubr.msk.bf16.mxu0 %vm3970_vm2, %v3969_v11 }
 0x9e0   :  { %3620 = vmatprep.subr.bf16.mxu0 %v3969_v11 }
 0x9e3   :  { %3621 = vmatpush3.bf16.msra.mxu0 %v3662_v49 }
 0x9e4   :  { %3622 = vmatprep.subr.bf16.mxu0 %v3969_v11 }
 0x9e7   :  { %3623 = vmatpush3.bf16.msra.mxu0 %v3663_v42 }
 0x9e8   :  { %3624 = vmatprep.subr.bf16.mxu0 %v3969_v11 }
 0x9eb   :  { %3625 = vmatpush3.bf16.msra.mxu0 %v3664_v53 }
 0x9ec   :  { %3626 = vmatprep.subr.bf16.mxu0 %v3969_v11 }
 0x9ef   :  { %3627 = vmatpush3.bf16.msra.mxu0 %v3665_v48 }
 0x9f0   :  { %3628 = vmatprep.subr.bf16.mxu0 %v3969_v11 }
 0x9f3   :  { %3629 = vmatpush3.bf16.msra.mxu0 %v3666_v63 }
 0x9f4   :  { %3630 = vmatprep.subr.bf16.mxu0 %v3969_v11 }
 0x9f7   :  { %3631 = vmatpush3.bf16.msra.mxu0 %v3667_v12 }
 0x9f8   :  { %3632 = vmatprep.subr.bf16.mxu0 %v3969_v11 }
 0x9fb   :  { %3633 = vmatpush3.bf16.msra.mxu0 %v3668_v18 }
 0xab1   :  { %v3140_v26 = vpop.f32.mrb[72].mxu0  ;;  %v3181_v47 = vpop.f32.mrb[72].mxu1 }
 0xab2   :  { %v3141_v15 = vadd.f32 %v3140_v26, %v6545_v17  ;;  %v3142_v25 = vpop.f32.mrb[73].mxu0  ;;  %v3183_v35 = vpop.f32.mrb[73].mxu1  ;;  %v3182_v55 = vadd.f32 %v3181_v47, %v6548_v46 }
 0xab3   :  { %v3143_v59 = vadd.f32 %v3142_v25, %v6546_v43  ;;  %v3144_v41 = vpop.f32.mrb[74].mxu0  ;;  %v3185_v60 = vpop.f32.mrb[74].mxu1  ;;  %v3184_v44 = vadd.f32 %v3183_v35, %v6547_v36 }
 0xab4   :  { %v3597_v32 = vmul.f32 -1.442695, %v3141_v15  ;;  %v3145_v1 = vpop.f32.mrb[75].mxu0  ;;  %v3186_v34 = vpop.f32.mrb[75].mxu1 }
 0xab5   :  { %v3599_v19 = vmul.f32 -1.442695, %v3143_v59  ;;  %v3598_v33 = vmul.f32 -1.442695, %v3184_v44 }
 0xab6   :  { %3901 = vpow2.f32 %v3597_v32 }
 0xab7   :  { %3903 = vpow2.f32 %v3599_v19 }
 0xab8   :  { %3905 = vpow2.f32 %v3598_v33 }
 0xab9   :  { %3907 = vtanh.f32 %v3182_v55 }
 0xac0   :  { %v3902_v37 = vpop.eup %3901 }
 0xac1   :  { %v3904_v27 = vpop.eup %3903  ;;  %v3191_v9 = vadd.f32 1.0, %v3902_v37 }
 0xac2   :  { %v3204_v29 = vadd.f32 1.0, %v3904_v27  ;;  %v3906_v14 = vpop.eup %3905 }
 0xac3   :  { %3909 = vrcp.f32 %v3191_v9  ;;  %v3908_v17 = vpop.eup %3907  ;;  %v3198_v43 = vadd.f32 1.0, %v3906_v14 }
 0xac4   :  { %3911 = vrcp.f32 %v3204_v29 }
 0xac5   :  { %3913 = vrcp.f32 %v3198_v43 }
 0xacd   :  { %v3910_v24 = vpop.eup %3909 }
 0xace   :  { %v3912_v8 = vpop.eup %3911  ;;  %v3208_v0 = vmul.f32 %v3910_v24, %v3908_v17 }
 0xacf   :  { %v3207_v13 = vmul.f32 %v3912_v8, %v5528_v58  ;;  %v3914_v30 = vpop.eup %3913 }
 0xad1   :  { %v3209_v40 = vadd.f32 %v3208_v0, %v3207_v13 }
 0xad3   :  { %3915 = vtanh.f32 %v3209_v40 }
 0xadd   :  { %v3916_v31 = vpop.eup %3915 }
 0xade   :  { %v3211_v61 = vmul.f32 %v3916_v31, %v3914_v30 }
 0xae0   :  { %v3212_v57 = vpack.c.bf16 %v3211_v61, %v3211_v61 }
 0xae2   :  { %3635 = vmatmul.mubr.bf16.vlgmr.msra.gmra.mrb[76].mxu0 %v3212_v57 }
 0xbb5   :  { %v3318_v36 = vpop.f32.mrb[76].mxu0 }
 0xbb6   :  { %v3319_v20 = vadd.f32 %v3600_v10, %v3318_v36  ;;  %v3636_v38 = vpop.f32.mrb[77].mxu0 }
 0xbb7   :  { %v3321_v46 = vpop.f32.mrb[78].mxu0 }
 0xbb8   :  { %3324 = vst [vmem:[#allocation6] sm:$0xff] %v3319_v20  ;;  %v3637_v23 = vpop.f32.mrb[79].mxu0 }
 0xbb9   :  { %3950 = shalt.err (!%p3947_p12)
}
 0xbba   :  { %s3951_s6 = scalar_lea.hbm %s5582_s7, 128 }
 0xbbb   :  { %p3952_p13 = scmp.ne.s32.totalorder %s5582_s7, %s3951_s6  ;;  %p3955_p0 = scmp.lt.u32.totalorder %s3951_s6, %s5582_s7 }
 0xbbd   :  { %p3957_p1 = pnand %p3955_p0, %p3952_p13 }
 0xbbf   :  { %3960 = shalt.err (!%p3957_p1)
}
 0xbc0   :  { %3334 = dma.vmem_to_hbm [thread:$0]  %s3332_s1, 128, %s5582_s7, [#allocation5]  }
 0xbc1   :  { %3963 = dma.done.wait [#allocation5], 128  }
 0xbc2   :  { %3964 = vsyncadd [#allocation5], 4294967168 }
 0xbc3   :  { %3338 = vsyncpa [#allocation4], 1 }
 0xbc4   :  { %3339 = vsyncpa [#allocation5], 1 }

</bundles_post_ra>
